<compile_context>
chip_gen: v7x
topology: tpu7x:2x2x1
jax: 0.10.0
libtpu: 0.0.40
codegen_flags: <defaults>
</compile_context>

<pallas_src>
import functools

import jax
import jax.numpy as jnp
from jax import lax
from jax.experimental import pallas as pl
from jax.experimental.pallas import tpu as pltpu

NEG_INF = -1e30
F32 = jnp.float32
BF16 = jnp.bfloat16

# model dims (synthetic, small)
D_WORD, D_POS, D_ENT, N_FEAT = 32, 8, 8, 4
ENC = 32                      # conv encoder width (per layer)
ATT_H = 32                    # attention hidden per head
QHIGH = 64                    # question high-level width
HID = 64                      # context final / question final width


# ----------------------------------------------------------------------------
# small in-kernel helpers
# ----------------------------------------------------------------------------
def _dot(a, b):
    """MXU matmul: bf16 operands, f32 accumulate."""
    return jnp.dot(a.astype(BF16), b.astype(BF16), preferred_element_type=F32)


def _dot_t(a, b):
    """a @ b.T with bf16 operands, f32 accumulate."""
    return lax.dot_general(a.astype(BF16), b.astype(BF16),
                           (((1,), (1,)), ((), ())),
                           preferred_element_type=F32)


def _softmax_lanes(s):
    """Masked-score softmax over the last (lane) axis; f32 epilogue."""
    s = s - jnp.max(s, axis=-1, keepdims=True)
    e = jnp.exp(s)
    return e * pl.reciprocal(jnp.sum(e, axis=-1, keepdims=True), approx=True)


def _window3_conv(h, w_ref, b_ref, seq):
    """ReLU(window-3 'same' conv) along the batch-folded row axis.

    h: [N, Din] f32, rows ordered batch-major with per-example length `seq`.
    w_ref: [3, Din, Dout] (prev, center, next) bf16; b_ref: [1, Dout] f32.
    Shifted views are built in-register with pltpu.roll (XLU slot) and the
    batch boundaries are re-zeroed, so no HBM im2col tensor is ever formed.
    """
    n = h.shape[0]
    ridx = lax.broadcasted_iota(jnp.int32, (n, 1), 0) % seq
    prev = jnp.where(ridx == 0, 0.0, pltpu.roll(h, shift=1, axis=0))
    nxt = jnp.where(ridx == seq - 1, 0.0, pltpu.roll(h, shift=n - 1, axis=0))
    y = _dot(prev, w_ref[0]) + _dot(h, w_ref[1]) + _dot(nxt, w_ref[2]) + b_ref[...]
    return jnp.maximum(y, 0.0)


def _cost(flops, bytes_accessed, transcendentals=0):
    try:
        return pl.CostEstimate(flops=int(flops),
                               transcendentals=int(transcendentals),
                               bytes_accessed=int(bytes_accessed))
    except Exception:  # pragma: no cover - cost hint is best-effort only
        return None


def _bytes_of(*arrays):
    return sum(int(a.size) * a.dtype.itemsize for a in arrays)


# ----------------------------------------------------------------------------
# Kernel 1: pre_align attention + x_input assembly + 2-layer context conv
# ----------------------------------------------------------------------------
def _context_encoder_kernel(xw_ref, xpos_ref, xent_ref, xfeat_ref,
                            qw_ref, qmask_ref,
                            pre_w_ref, pre_diag_ref,
                            c1w_ref, c1b_ref, c2w_ref, c2b_ref,
                            xl12_ref, *, batch, t_len, q_len):
    xw = xw_ref[...]                                             # [T, Dw] shared
    xpos = xpos_ref[...]                                         # [T, 8]
    xent = xent_ref[...]                                         # [T, 8]

    # pre_align projections: x side is shared, q side done for the whole batch
    xp = jnp.maximum(_dot(xw, pre_w_ref[...]), 0.0) * pre_diag_ref[...]   # [T, H]
    qw_all = qw_ref[...]                                         # [B*L, Dw]
    yp_all = jnp.maximum(_dot(qw_all, pre_w_ref[...]), 0.0)      # [B*L, H]

    rows = []
    for b in range(batch):                                       # static unroll
        yp = yp_all[b * q_len:(b + 1) * q_len, :]                # [L, H]
        qv = qw_all[b * q_len:(b + 1) * q_len, :]                # [L, Dw]
        qm = qmask_ref[pl.ds(b, 1), :]                           # [1, L] (1 = pad)
        s = _dot_t(xp, yp)                                       # [T, L]
        s = jnp.where(qm > 0.5, NEG_INF, s)
        p = _softmax_lanes(s)
        prealign = _dot(p, qv)                                   # [T, Dw]
        feat = xfeat_ref[pl.ds(b * t_len, t_len), :]             # [T, F]
        rows.append(jnp.concatenate([xw, prealign, xpos, xent, feat], axis=1))
    x_input = jnp.concatenate(rows, axis=0)                      # [B*T, 84]

    h1 = _window3_conv(x_input, c1w_ref, c1b_ref, t_len)         # [B*T, ENC]
    h2 = _window3_conv(h1, c2w_ref, c2b_ref, t_len)              # [B*T, ENC]
    xl12_ref[...] = jnp.concatenate([h1, h2], axis=1)            # [B*T, 2*ENC]


def context_encoder(xw, xpos, xent, xfeat, qw, qmask, p, *, batch, t_len, q_len):
    n = batch * t_len
    x_in = D_WORD + D_WORD + D_POS + D_ENT + N_FEAT
    flops = 2 * n * 3 * (x_in * ENC + ENC * ENC) \
        + 2 * batch * t_len * q_len * (ATT_H + D_WORD) \
        + 2 * (t_len + batch * q_len) * D_WORD * ATT_H
    byts = _bytes_of(xw, xpos, xent, xfeat, qw, qmask) + n * 2 * ENC * 4
    return pl.pallas_call(
        functools.partial(_context_encoder_kernel,
                          batch=batch, t_len=t_len, q_len=q_len),
        out_shape=jax.ShapeDtypeStruct((n, 2 * ENC), F32),
        cost_estimate=_cost(flops, byts, transcendentals=batch * t_len * q_len),
    )(xw, xpos, xent, xfeat, qw, qmask,
      p["prealign_w"], p["prealign_diag"],
      p["ctx1_w"], p["ctx1_b"], p["ctx2_w"], p["ctx2_b"])


# ----------------------------------------------------------------------------
# Kernel 2: question tower (conv x2 + high-lvl dense + self-attn + merge)
# ----------------------------------------------------------------------------
def _question_tower_kernel(qw_ref, qmask_ref,
                           q1w_ref, q1b_ref, q2w_ref, q2b_ref,
                           qhw_ref, qhb_ref,
                           qsw_ref, qsd_ref,
                           qmw_ref, qmb_ref,
                           qatt_ref, qvals_ref, qmerged_ref, *, batch, q_len):
    qw = qw_ref[...]                                             # [B*L, Dw]
    h1 = _window3_conv(qw, q1w_ref, q1b_ref, q_len)              # [B*L, ENC]
    h2 = _window3_conv(h1, q2w_ref, q2b_ref, q_len)              # [B*L, ENC]
    qh = jnp.maximum(_dot(jnp.concatenate([h1, h2], axis=1), qhw_ref[...])
                     + qhb_ref[...], 0.0)                        # [B*L, QHIGH]

    # lane-dense fused outputs consumed by the deep-attention kernel
    qatt_ref[...] = jnp.concatenate([qw, h1, h2], axis=1)        # [B*L, 96]
    qvals_ref[...] = jnp.concatenate([h1, h2, qh], axis=1)       # [B*L, 128]

    diag = qsd_ref[...]
    r = lax.broadcasted_iota(jnp.int32, (q_len, q_len), 0)
    c = lax.broadcasted_iota(jnp.int32, (q_len, q_len), 1)
    diag_mask = r == c
    for b in range(batch):                                       # static unroll
        qh_b = qh[b * q_len:(b + 1) * q_len, :]                  # [L, QHIGH]
        qm = qmask_ref[pl.ds(b, 1), :]                           # [1, L]
        proj = jnp.maximum(_dot(qh_b, qsw_ref[...]), 0.0)        # [L, H]
        s = _dot_t(proj * diag, proj)                            # [L, L]
        s = jnp.where(qm > 0.5, NEG_INF, s)
        s = jnp.where(diag_mask, NEG_INF, s)                     # drop_diagonal
        p = _softmax_lanes(s)
        q_final = _dot(p, qh_b)                                  # [L, QHIGH]
        # LinearSelfAttn + weighted_avg (scores kept lane-major: [1, L])
        sc = lax.dot_general(qmw_ref[...].astype(BF16), q_final.astype(BF16),
                             (((0,), (1,)), ((), ())),
                             preferred_element_type=F32) + qmb_ref[...]
        sc = jnp.where(qm > 0.5, NEG_INF, sc)
        pm = _softmax_lanes(sc)                                  # [1, L]
        qmerged_ref[pl.ds(b, 1), :] = _dot(pm, q_final)          # [1, QHIGH]


def question_tower(qw, qmask, p, *, batch, q_len):
    n = batch * q_len
    flops = 2 * n * (3 * (D_WORD * ENC + ENC * ENC) + 2 * ENC * QHIGH) \
        + 2 * batch * q_len * (QHIGH * ATT_H + q_len * (ATT_H + QHIGH) + QHIGH)
    byts = _bytes_of(qw, qmask) + n * (96 + 128) * 4 + batch * QHIGH * 4
    return pl.pallas_call(
        functools.partial(_question_tower_kernel, batch=batch, q_len=q_len),
        out_shape=(jax.ShapeDtypeStruct((n, 3 * D_WORD), F32),      # q_att   [B*L, 96]
                   jax.ShapeDtypeStruct((n, 2 * ENC + QHIGH), F32),  # q_vals  [B*L, 128]
                   jax.ShapeDtypeStruct((batch, QHIGH), F32)),       # q_merged[B, 64]
        cost_estimate=_cost(flops, byts,
                            transcendentals=batch * (q_len * q_len + q_len)),
    )(qw, qmask,
      p["q1_w"], p["q1_b"], p["q2_w"], p["q2_b"],
      p["qhigh_w"], p["qhigh_b"],
      p["qself_w"], p["qself_diag"],
      p["qmerge_w"], p["qmerge_b"])


# ----------------------------------------------------------------------------
# Kernel 3: deep attention (3 fused heads) + deep projection + high-lvl
#           self-attention (drop_diagonal) + hlc projection
# ----------------------------------------------------------------------------
def _context_deep_kernel(xw_ref, xl12_ref, qatt_ref, qvals_ref,
                         qmask_ref, xmask_ref,
                         dw_ref, ddiag_ref, drw_ref, drb_ref,
                         sw_ref, sdiag_ref, hw_ref, hb_ref,
                         xfin_ref, *, batch, t_len, q_len, head_dim, v_dims):
    xw = xw_ref[...]                                             # [T, Dw] shared
    xmask = xmask_ref[...]                                       # [1, T]  shared
    dd = ddiag_ref[...]                                          # [1, heads*H]
    sdiag = sdiag_ref[...]                                       # [1, H]
    r = lax.broadcasted_iota(jnp.int32, (t_len, t_len), 0)
    c = lax.broadcasted_iota(jnp.int32, (t_len, t_len), 1)
    diag_mask = r == c

    # question-side projection for all heads / batches in one matmul
    yp_all = jnp.maximum(_dot(qatt_ref[...], dw_ref[...]), 0.0)  # [B*L, heads*H]
    qv_all = qvals_ref[...]                                      # [B*L, 128]

    for b in range(batch):                                       # static unroll
        xl = xl12_ref[pl.ds(b * t_len, t_len), :]                # [T, 2*ENC]
        x_att = jnp.concatenate([xw, xl], axis=1)                # [T, 96]
        qm = qmask_ref[pl.ds(b, 1), :]                           # [1, L]
        yp = yp_all[b * q_len:(b + 1) * q_len, :]
        qv = qv_all[b * q_len:(b + 1) * q_len, :]

        xp = jnp.maximum(_dot(x_att, dw_ref[...]), 0.0) * dd     # [T, heads*H]
        heads = []
        voff = 0
        for h, dv in enumerate(v_dims):
            s = _dot_t(xp[:, h * head_dim:(h + 1) * head_dim],
                       yp[:, h * head_dim:(h + 1) * head_dim])   # [T, L]
            s = jnp.where(qm > 0.5, NEG_INF, s)
            p = _softmax_lanes(s)
            heads.append(_dot(p, qv[:, voff:voff + dv]))         # [T, dv]
            voff += dv

        x_inter = jnp.concatenate([xl] + heads, axis=1)          # [T, 192]
        # TODO(synk): DeepAttention BiLSTM replaced by dense+ReLU projection.
        x_after = jnp.maximum(_dot(x_inter, drw_ref[...]) + drb_ref[...], 0.0)  # [T, 64]

        # high-level self attention (drop_diagonal, values = x_after)
        x_self_in = jnp.concatenate([x_after, x_inter, xw], axis=1)   # [T, 288]
        sp = jnp.maximum(_dot(x_self_in, sw_ref[...]), 0.0)      # [T, H]
        ss = _dot_t(sp * sdiag, sp)                              # [T, T]
        ss = jnp.where(xmask > 0.5, NEG_INF, ss)
        ss = jnp.where(diag_mask, NEG_INF, ss)
        ps = _softmax_lanes(ss)
        x_self = _dot(ps, x_after)                               # [T, 64]

        # TODO(synk): high_lvl_context_rnn (BiLSTM) replaced by dense+ReLU.
        x_fin = jnp.maximum(_dot(jnp.concatenate([x_after, x_self], axis=1),
                                 hw_ref[...]) + hb_ref[...], 0.0)
        xfin_ref[pl.ds(b * t_len, t_len), :] = x_fin             # [T, 64]


def context_deep(xw, xl12, qatt, qvals, qmask, xmask, p, *, batch, t_len, q_len):
    n = batch * t_len
    att_in, heads_h, deep_in, self_in = 96, 3 * ATT_H, 192, 288
    flops = 2 * batch * q_len * att_in * heads_h \
        + 2 * n * (att_in * heads_h + deep_in * HID + self_in * ATT_H + 2 * HID * HID) \
        + 2 * batch * t_len * (3 * q_len * (ATT_H + HID) + t_len * (ATT_H + HID))
    byts = _bytes_of(xw, xl12, qatt, qvals, qmask, xmask) + n * HID * 4
    return pl.pallas_call(
        functools.partial(_context_deep_kernel, batch=batch, t_len=t_len,
                          q_len=q_len, head_dim=ATT_H, v_dims=(ENC, ENC, QHIGH)),
        out_shape=jax.ShapeDtypeStruct((n, HID), F32),
        cost_estimate=_cost(flops, byts,
                            transcendentals=batch * (3 * t_len * q_len + t_len * t_len)),
    )(xw, xl12, qatt, qvals, qmask, xmask,
      p["deep_w"], p["deep_diag"], p["deep_rnn_w"], p["deep_rnn_b"],
      p["selfatt_w"], p["selfatt_diag"], p["hlc_w"], p["hlc_b"])


# ----------------------------------------------------------------------------
# Kernel 4: GetFinalScores (4 fused bilinear heads + pointer GRU + end head)
# ----------------------------------------------------------------------------
def _final_scores_kernel(xfin_ref, qmerged_ref, xmask_ref,
                         w4_ref, b4_ref,
                         gih_w_ref, gih_b_ref, ghh_w_ref, ghh_b_ref,
                         ew_ref, eb_ref, ynw_ref, ynb_ref,
                         probs_ref, yn_ref, *, batch, t_len, hid):
    xmask = xmask_ref[...]                                       # [1, T] shared
    b4 = b4_ref[...]                                             # [4, hid]
    ynw = ynw_ref[...]                                           # [3, hid]
    ynb = ynb_ref[...]                                           # [1, 3]
    for b in range(batch):                                       # static unroll
        xf = xfin_ref[pl.ds(b * t_len, t_len), :]                # [T, hid]
        qm = qmerged_ref[pl.ds(b, 1), :]                         # [1, hid]

        # heads: (start, no, yes, noanswer) -- one score matmul for all four
        hp = jnp.concatenate(
            [_dot(qm, w4_ref[k]) + b4[k:k + 1, :] for k in range(4)], axis=0)  # [4, hid]
        s4 = _dot_t(hp, xf)                                      # [4, T] lane-major
        s4 = jnp.where(xmask > 0.5, NEG_INF, s4)
        p4 = _softmax_lanes(s4)                                  # [4, T]
        merged = _dot(p4, xf)                                    # [4, hid]

        # pointer GRU cell (gate order r, z, n -- matches nn.GRUCell)
        ptr = merged[0:1, :]
        gx = _dot(ptr, gih_w_ref[...]) + gih_b_ref[...]          # [1, 3*hid]
        gh = _dot(qm, ghh_w_ref[...]) + ghh_b_ref[...]           # [1, 3*hid]
        rg = jax.nn.sigmoid(gx[:, 0:hid] + gh[:, 0:hid])
        zg = jax.nn.sigmoid(gx[:, hid:2 * hid] + gh[:, hid:2 * hid])
        ng = jnp.tanh(gx[:, 2 * hid:3 * hid] + rg * gh[:, 2 * hid:3 * hid])
        h1 = (1.0 - zg) * ng + zg * qm                           # [1, hid]

        # end-pointer bilinear head
        hpe = _dot(h1, ew_ref[...]) + eb_ref[...]                # [1, hid]
        se = _dot_t(hpe, xf)                                     # [1, T]
        se = jnp.where(xmask > 0.5, NEG_INF, se)
        pe = _softmax_lanes(se)                                  # [1, T]
        probs_ref[b] = jnp.concatenate([p4[0:1, :], pe], axis=0)  # [2, T]

        # scalar scores for no / yes / no-answer
        yn_cols = [lax.dot_general(merged[k + 1:k + 2, :], ynw[k:k + 1, :],
                                   (((1,), (1,)), ((), ())),
                                   preferred_element_type=F32)
                   for k in range(3)]
        yn_ref[pl.ds(b, 1), :] = jnp.concatenate(yn_cols, axis=1) + ynb


def final_scores(xfin, qmerged, xmask, p, *, batch, t_len):
    flops = 2 * batch * (4 * HID * HID + 5 * t_len * HID * 2
                         + 2 * HID * 3 * HID + HID * HID + 3 * HID)
    byts = _bytes_of(xfin, qmerged, xmask) + batch * (2 * t_len + 3) * 4
    return pl.pallas_call(
        functools.partial(_final_scores_kernel, batch=batch, t_len=t_len, hid=HID),
        out_shape=(jax.ShapeDtypeStruct((batch, 2, t_len), F32),   # [s; e] probs
                   jax.ShapeDtypeStruct((batch, 3), F32)),          # no / yes / na
        cost_estimate=_cost(flops, byts, transcendentals=batch * (5 * t_len + 6 * HID)),
    )(xfin, qmerged, xmask,
      p["ptr_lin_w"], p["ptr_lin_b"],
      p["gru_w_ih"], p["gru_b_ih"], p["gru_w_hh"], p["gru_b_hh"],
      p["e_w"], p["e_b"], p["yn_w"], p["yn_b"])


# ----------------------------------------------------------------------------
# forward pass (glue is only embedding gathers + reshapes)
# ----------------------------------------------------------------------------
def sdnet_forward(params, x, x_single_mask, x_features, x_pos, x_ent, q, q_mask):
    B, L = q.shape
    T = x.shape[1]

    # shared (batch=1) context tensors stay un-broadcast
    x_word = params["vocab_embed"][x[0]]                         # [T, 32]
    x_pos_emb = params["pos_embed"][x_pos[0]]                    # [T, 8]
    x_ent_emb = params["ent_embed"][x_ent[0]]                    # [T, 8]
    q_word = params["vocab_embed"][q].reshape(B * L, -1)         # [B*L, 32]
    x_feat = x_features.reshape(B * T, -1).astype(F32)           # [B*T, 4]

    q_maskf = q_mask.astype(F32)                                 # [B, L]
    x_maskf = x_single_mask.astype(F32).reshape(1, T)            # [1, T]

    # 1) pre_align attention + x_input assembly + context conv encoder
    x_l12 = context_encoder(x_word, x_pos_emb, x_ent_emb, x_feat, q_word,
                            q_maskf, params, batch=B, t_len=T, q_len=L)

    # 2) question tower (conv encoder + high-lvl + self-attn + merger)
    q_att, q_vals, q_merged = question_tower(q_word, q_maskf, params,
                                             batch=B, q_len=L)

    # 3) deep attention + high-lvl context self-attention
    x_final = context_deep(x_word, x_l12, q_att, q_vals, q_maskf, x_maskf,
                           params, batch=B, t_len=T, q_len=L)

    # 4) GetFinalScores
    probs, yn = final_scores(x_final, q_merged, x_maskf, params, batch=B, t_len=T)
    score_s = probs[:, 0, :]
    score_e = probs[:, 1, :]
    score_no = yn[:, 0:1]
    score_yes = yn[:, 1:2]
    score_noanswer = yn[:, 2:3]
    return score_s, score_e, score_no, score_yes, score_noanswer


# ----------------------------------------------------------------------------
# Deterministic parameter init (synthetic, no checkpoints).
# Matmul weights are stored bf16 (MXU operands); biases / diagonals stay f32.
# ----------------------------------------------------------------------------
def init_params(key):
    keys = iter(jax.random.split(key, 64))

    def nrm(shape, fan_in, dtype=BF16):
        w = jax.random.normal(next(keys), shape, F32) * (float(fan_in) ** -0.5)
        return w.astype(dtype)

    p = {}
    ve = jax.random.normal(next(keys), (64, D_WORD), F32) * 0.1
    p["vocab_embed"] = ve.at[1].set(0.0)                         # padding_idx = 1
    p["pos_embed"] = jax.random.normal(next(keys), (12, D_POS), F32) * 0.1
    p["ent_embed"] = jax.random.normal(next(keys), (8, D_ENT), F32) * 0.1

    p["prealign_w"] = nrm((D_WORD, ATT_H), D_WORD)
    p["prealign_diag"] = jnp.full((1, ATT_H), 1.0 / (ATT_H ** 0.5), F32)

    x_in = D_WORD + D_WORD + D_POS + D_ENT + N_FEAT              # 84
    p["ctx1_w"] = nrm((3, x_in, ENC), 3 * x_in); p["ctx1_b"] = jnp.zeros((1, ENC), F32)
    p["ctx2_w"] = nrm((3, ENC, ENC), 3 * ENC);   p["ctx2_b"] = jnp.zeros((1, ENC), F32)
    p["q1_w"] = nrm((3, D_WORD, ENC), 3 * D_WORD); p["q1_b"] = jnp.zeros((1, ENC), F32)
    p["q2_w"] = nrm((3, ENC, ENC), 3 * ENC);       p["q2_b"] = jnp.zeros((1, ENC), F32)

    p["qhigh_w"] = nrm((2 * ENC, QHIGH), 2 * ENC); p["qhigh_b"] = jnp.zeros((1, QHIGH), F32)

    att_in = D_WORD + 2 * ENC                                    # 96
    p["deep_w"] = nrm((att_in, 3 * ATT_H), att_in)               # 3 heads stacked
    p["deep_diag"] = jnp.ones((1, 3 * ATT_H), F32)

    deep_in = 2 * ENC + ENC + ENC + QHIGH                        # 192
    p["deep_rnn_w"] = nrm((deep_in, HID), deep_in); p["deep_rnn_b"] = jnp.zeros((1, HID), F32)

    self_in = HID + deep_in + D_WORD                             # 288
    p["selfatt_w"] = nrm((self_in, ATT_H), self_in)
    p["selfatt_diag"] = jnp.ones((1, ATT_H), F32)
    p["hlc_w"] = nrm((2 * HID, HID), 2 * HID); p["hlc_b"] = jnp.zeros((1, HID), F32)

    p["qself_w"] = nrm((QHIGH, ATT_H), QHIGH); p["qself_diag"] = jnp.ones((1, ATT_H), F32)
    p["qmerge_w"] = nrm((QHIGH, 1), QHIGH);    p["qmerge_b"] = jnp.zeros((1, 1), F32)

    # stacked bilinear heads: (start, no, yes, noanswer)
    p["ptr_lin_w"] = jnp.stack([nrm((QHIGH, HID), QHIGH) for _ in range(4)], axis=0)
    p["ptr_lin_b"] = jnp.zeros((4, HID), F32)
    p["e_w"] = nrm((QHIGH, HID), QHIGH); p["e_b"] = jnp.zeros((1, HID), F32)
    p["yn_w"] = jax.random.normal(next(keys), (3, HID), F32) * (HID ** -0.5)
    p["yn_b"] = jnp.zeros((1, 3), F32)

    p["gru_w_ih"] = nrm((HID, 3 * HID), HID); p["gru_b_ih"] = jnp.zeros((1, 3 * HID), F32)
    p["gru_w_hh"] = nrm((HID, 3 * HID), HID); p["gru_b_hh"] = jnp.zeros((1, 3 * HID), F32)
    return p


# ----------------------------------------------------------------------------
if __name__ == "__main__":
    key = jax.random.PRNGKey(0)
    pkey, dkey = jax.random.split(key)
    params = init_params(pkey)

    B, T, L = 2, 16, 8
    ks = jax.random.split(dkey, 8)
    x = jax.random.randint(ks[0], (1, T), 2, 64)                 # context word ids
    x_single_mask = jnp.zeros((1, T), F32)                       # 1.0 = padding
    x_features = jax.random.normal(ks[1], (B, T, N_FEAT), F32)
    x_pos = jax.random.randint(ks[2], (1, T), 0, 12)
    x_ent = jax.random.randint(ks[3], (1, T), 0, 8)
    q = jax.random.randint(ks[4], (B, L), 2, 64)                 # question word ids
    q_mask = jnp.zeros((B, L), F32).at[1, -2:].set(1.0)

    fwd = jax.jit(sdnet_forward)
    outs = fwd(params, x, x_single_mask, x_features, x_pos, x_ent, q, q_mask)
    outs = jax.block_until_ready(outs)

    score_s, score_e, score_no, score_yes, score_noanswer = outs
    assert score_s.shape == (B, T) and score_e.shape == (B, T)
    assert score_no.shape == (B, 1) and score_yes.shape == (B, 1)
    assert score_noanswer.shape == (B, 1)
    assert all(bool(jnp.all(jnp.isfinite(o))) for o in outs)
    print("KERNEL_OK")
</pallas_src>

<mosaic_0001>
module attributes {stable_mosaic.version = 11 : i64} {
  func.func @_context_encoder_kernel(%arg0: memref<16x32xf32, #tpu.memory_space<vmem>>, %arg1: memref<16x8xf32, #tpu.memory_space<vmem>>, %arg2: memref<16x8xf32, #tpu.memory_space<vmem>>, %arg3: memref<32x4xf32, #tpu.memory_space<vmem>>, %arg4: memref<16x32xf32, #tpu.memory_space<vmem>>, %arg5: memref<2x8xf32, #tpu.memory_space<vmem>>, %arg6: memref<32x32xbf16, #tpu.memory_space<vmem>>, %arg7: memref<1x32xf32, #tpu.memory_space<vmem>>, %arg8: memref<3x84x32xbf16, #tpu.memory_space<vmem>>, %arg9: memref<1x32xf32, #tpu.memory_space<vmem>>, %arg10: memref<3x32x32xbf16, #tpu.memory_space<vmem>>, %arg11: memref<1x32xf32, #tpu.memory_space<vmem>>, %arg12: memref<32x64xf32, #tpu.memory_space<vmem>>) attributes {dimension_semantics = [], scalar_prefetch = 0 : i64, scratch_operands = 0 : i64, tpu.core_type = #tpu.core_type<tc>} {
    %c0 = arith.constant 0 : index
    %c0_0 = arith.constant 0 : index
    %0 = vector.load %arg0[%c0, %c0_0] : memref<16x32xf32, #tpu.memory_space<vmem>>, vector<16x32xf32>
    %c0_1 = arith.constant 0 : index
    %c0_2 = arith.constant 0 : index
    %1 = vector.load %arg1[%c0_1, %c0_2] : memref<16x8xf32, #tpu.memory_space<vmem>>, vector<16x8xf32>
    %c0_3 = arith.constant 0 : index
    %c0_4 = arith.constant 0 : index
    %2 = vector.load %arg2[%c0_3, %c0_4] : memref<16x8xf32, #tpu.memory_space<vmem>>, vector<16x8xf32>
    %c0_5 = arith.constant 0 : index
    %c0_6 = arith.constant 0 : index
    %3 = vector.load %arg6[%c0_5, %c0_6] : memref<32x32xbf16, #tpu.memory_space<vmem>>, vector<32x32xbf16>
    %4 = arith.truncf %0 : vector<16x32xf32> to vector<16x32xbf16>
    %cst = arith.constant dense<0.000000e+00> : vector<16x32xf32>
    %5 = tpu.matmul %4, %3, %cst {dimension_numbers = #tpu.dot_dimension_numbers<[1], [0], [0], [1], [0, 0, 1, 1], [], []>} : vector<16x32xbf16>, vector<32x32xbf16>, vector<16x32xf32> -> vector<16x32xf32>
    %cst_7 = arith.constant 0.000000e+00 : f32
    %6 = vector.broadcast %cst_7 : f32 to vector<16x32xf32>
    %7 = arith.maximumf %5, %6 : vector<16x32xf32>
    %c0_8 = arith.constant 0 : index
    %c0_9 = arith.constant 0 : index
    %8 = vector.load %arg7[%c0_8, %c0_9] : memref<1x32xf32, #tpu.memory_space<vmem>>, vector<1x32xf32>
    %9 = vector.broadcast %8 : vector<1x32xf32> to vector<16x32xf32>
    %10 = arith.mulf %7, %9 : vector<16x32xf32>
    %c0_10 = arith.constant 0 : index
    %c0_11 = arith.constant 0 : index
    %11 = vector.load %arg4[%c0_10, %c0_11] : memref<16x32xf32, #tpu.memory_space<vmem>>, vector<16x32xf32>
    %c0_12 = arith.constant 0 : index
    %c0_13 = arith.constant 0 : index
    %12 = vector.load %arg6[%c0_12, %c0_13] : memref<32x32xbf16, #tpu.memory_space<vmem>>, vector<32x32xbf16>
    %13 = arith.truncf %11 : vector<16x32xf32> to vector<16x32xbf16>
    %cst_14 = arith.constant dense<0.000000e+00> : vector<16x32xf32>
    %14 = tpu.matmul %13, %12, %cst_14 {dimension_numbers = #tpu.dot_dimension_numbers<[1], [0], [0], [1], [0, 0, 1, 1], [], []>} : vector<16x32xbf16>, vector<32x32xbf16>, vector<16x32xf32> -> vector<16x32xf32>
    %cst_15 = arith.constant 0.000000e+00 : f32
    %15 = vector.broadcast %cst_15 : f32 to vector<16x32xf32>
    %16 = arith.maximumf %14, %15 : vector<16x32xf32>
    %17 = vector.extract_strided_slice %16 {offsets = [0, 0], sizes = [8, 32], strides = [1, 1]} : vector<16x32xf32> to vector<8x32xf32>
    %18 = vector.extract_strided_slice %11 {offsets = [0, 0], sizes = [8, 32], strides = [1, 1]} : vector<16x32xf32> to vector<8x32xf32>
    %c0_16 = arith.constant 0 : index
    %c0_17 = arith.constant 0 : index
    %19 = vector.load %arg5[%c0_16, %c0_17] : memref<2x8xf32, #tpu.memory_space<vmem>>, vector<1x8xf32>
    %20 = arith.truncf %10 : vector<16x32xf32> to vector<16x32xbf16>
    %21 = arith.truncf %17 : vector<8x32xf32> to vector<8x32xbf16>
    %cst_18 = arith.constant dense<0.000000e+00> : vector<16x8xf32>
    %22 = tpu.matmul %20, %21, %cst_18 {dimension_numbers = #tpu.dot_dimension_numbers<[1], [1], [0], [0], [0, 0, 1, 0], [], []>} : vector<16x32xbf16>, vector<8x32xbf16>, vector<16x8xf32> -> vector<16x8xf32>
    %cst_19 = arith.constant 5.000000e-01 : f32
    %23 = vector.broadcast %cst_19 : f32 to vector<1x8xf32>
    %24 = arith.cmpf ogt, %19, %23 : vector<1x8xf32>
    %cst_20 = arith.constant -1.000000e+30 : f32
    %25 = vector.shape_cast %24 : vector<1x8xi1> to vector<1x8xi1>
    %26 = vector.broadcast %25 : vector<1x8xi1> to vector<16x8xi1>
    %27 = vector.broadcast %cst_20 : f32 to vector<16x8xf32>
    %28 = arith.select %26, %27, %22 : vector<16x8xi1>, vector<16x8xf32>
    %cst_21 = arith.constant dense<0xFF800000> : vector<16xf32>
    %29 = vector.multi_reduction <maximumf>, %28, %cst_21 [1] : vector<16x8xf32> to vector<16xf32>
    %30 = vector.shape_cast %29 : vector<16xf32> to vector<16x1xf32>
    %31 = vector.broadcast %30 : vector<16x1xf32> to vector<16x8xf32>
    %32 = arith.subf %28, %31 : vector<16x8xf32>
    %33 = math.exp %32 : vector<16x8xf32>
    %cst_22 = arith.constant dense<0.000000e+00> : vector<16xf32>
    %34 = vector.multi_reduction <add>, %33, %cst_22 [1] : vector<16x8xf32> to vector<16xf32>
    %35 = vector.shape_cast %34 : vector<16xf32> to vector<16x1xf32>
    %36 = tpu.reciprocal %35 {approx = true} : vector<16x1xf32> -> vector<16x1xf32>
    %37 = vector.broadcast %36 : vector<16x1xf32> to vector<16x8xf32>
    %38 = arith.mulf %33, %37 : vector<16x8xf32>
    %39 = arith.truncf %38 : vector<16x8xf32> to vector<16x8xbf16>
    %40 = arith.truncf %18 : vector<8x32xf32> to vector<8x32xbf16>
    %cst_23 = arith.constant dense<0.000000e+00> : vector<16x32xf32>
    %41 = tpu.matmul %39, %40, %cst_23 {dimension_numbers = #tpu.dot_dimension_numbers<[1], [0], [0], [1], [0, 0, 1, 1], [], []>} : vector<16x8xbf16>, vector<8x32xbf16>, vector<16x32xf32> -> vector<16x32xf32>
    %c0_24 = arith.constant 0 : index
    %c0_25 = arith.constant 0 : index
    %42 = vector.load %arg3[%c0_24, %c0_25] : memref<32x4xf32, #tpu.memory_space<vmem>>, vector<16x4xf32>
    %43 = tpu.concatenate %0, %41, %1, %2, %42 in 1 : vector<16x32xf32>, vector<16x32xf32>, vector<16x8xf32>, vector<16x8xf32>, vector<16x4xf32> -> vector<16x84xf32>
    %44 = vector.extract_strided_slice %16 {offsets = [8, 0], sizes = [8, 32], strides = [1, 1]} : vector<16x32xf32> to vector<8x32xf32>
    %45 = vector.extract_strided_slice %11 {offsets = [8, 0], sizes = [8, 32], strides = [1, 1]} : vector<16x32xf32> to vector<8x32xf32>
    %c1 = arith.constant 1 : index
    %c0_26 = arith.constant 0 : index
    %46 = vector.load %arg5[%c1, %c0_26] : memref<2x8xf32, #tpu.memory_space<vmem>>, vector<1x8xf32>
    %47 = arith.truncf %10 : vector<16x32xf32> to vector<16x32xbf16>
    %48 = arith.truncf %44 : vector<8x32xf32> to vector<8x32xbf16>
    %cst_27 = arith.constant dense<0.000000e+00> : vector<16x8xf32>
    %49 = tpu.matmul %47, %48, %cst_27 {dimension_numbers = #tpu.dot_dimension_numbers<[1], [1], [0], [0], [0, 0, 1, 0], [], []>} : vector<16x32xbf16>, vector<8x32xbf16>, vector<16x8xf32> -> vector<16x8xf32>
    %cst_28 = arith.constant 5.000000e-01 : f32
    %50 = vector.broadcast %cst_28 : f32 to vector<1x8xf32>
    %51 = arith.cmpf ogt, %46, %50 : vector<1x8xf32>
    %cst_29 = arith.constant -1.000000e+30 : f32
    %52 = vector.shape_cast %51 : vector<1x8xi1> to vector<1x8xi1>
    %53 = vector.broadcast %52 : vector<1x8xi1> to vector<16x8xi1>
    %54 = vector.broadcast %cst_29 : f32 to vector<16x8xf32>
    %55 = arith.select %53, %54, %49 : vector<16x8xi1>, vector<16x8xf32>
    %cst_30 = arith.constant dense<0xFF800000> : vector<16xf32>
    %56 = vector.multi_reduction <maximumf>, %55, %cst_30 [1] : vector<16x8xf32> to vector<16xf32>
    %57 = vector.shape_cast %56 : vector<16xf32> to vector<16x1xf32>
    %58 = vector.broadcast %57 : vector<16x1xf32> to vector<16x8xf32>
    %59 = arith.subf %55, %58 : vector<16x8xf32>
    %60 = math.exp %59 : vector<16x8xf32>
    %cst_31 = arith.constant dense<0.000000e+00> : vector<16xf32>
    %61 = vector.multi_reduction <add>, %60, %cst_31 [1] : vector<16x8xf32> to vector<16xf32>
    %62 = vector.shape_cast %61 : vector<16xf32> to vector<16x1xf32>
    %63 = tpu.reciprocal %62 {approx = true} : vector<16x1xf32> -> vector<16x1xf32>
    %64 = vector.broadcast %63 : vector<16x1xf32> to vector<16x8xf32>
    %65 = arith.mulf %60, %64 : vector<16x8xf32>
    %66 = arith.truncf %65 : vector<16x8xf32> to vector<16x8xbf16>
    %67 = arith.truncf %45 : vector<8x32xf32> to vector<8x32xbf16>
    %cst_32 = arith.constant dense<0.000000e+00> : vector<16x32xf32>
    %68 = tpu.matmul %66, %67, %cst_32 {dimension_numbers = #tpu.dot_dimension_numbers<[1], [0], [0], [1], [0, 0, 1, 1], [], []>} : vector<16x8xbf16>, vector<8x32xbf16>, vector<16x32xf32> -> vector<16x32xf32>
    %c16 = arith.constant 16 : index
    %c0_33 = arith.constant 0 : index
    %69 = vector.load %arg3[%c16, %c0_33] : memref<32x4xf32, #tpu.memory_space<vmem>>, vector<16x4xf32>
    %70 = tpu.concatenate %0, %68, %1, %2, %69 in 1 : vector<16x32xf32>, vector<16x32xf32>, vector<16x8xf32>, vector<16x8xf32>, vector<16x4xf32> -> vector<16x84xf32>
    %71 = tpu.concatenate %43, %70 in 0 : vector<16x84xf32>, vector<16x84xf32> -> vector<32x84xf32>
    %72 = tpu.iota {dimensions = array<i32: 0>} : vector<32x1xi32>
    %c16_i32 = arith.constant 16 : i32
    %c0_i32 = arith.constant 0 : i32
    %73 = arith.cmpi eq, %c16_i32, %c0_i32 : i32
    %c1_i32 = arith.constant 1 : i32
    %74 = arith.select %73, %c1_i32, %c16_i32 : i32
    %75 = vector.broadcast %74 : i32 to vector<32x1xi32>
    %76 = arith.remsi %72, %75 : vector<32x1xi32>
    %c0_i32_34 = arith.constant 0 : i32
    %77 = vector.broadcast %c0_i32_34 : i32 to vector<32x1xi32>
    %78 = arith.cmpi ne, %76, %77 : vector<32x1xi32>
    %c0_i32_35 = arith.constant 0 : i32
    %79 = vector.broadcast %c0_i32_35 : i32 to vector<32x1xi32>
    %80 = arith.cmpi slt, %76, %79 : vector<32x1xi32>
    %c0_i32_36 = arith.constant 0 : i32
    %81 = arith.cmpi slt, %74, %c0_i32_36 : i32
    %82 = vector.broadcast %81 : i1 to vector<32x1xi1>
    %83 = vector.broadcast %82 : vector<32x1xi1> to vector<32x1xi1>
    %84 = arith.xori %80, %83 : vector<32x1xi1>
    %85 = arith.andi %84, %78 : vector<32x1xi1>
    %86 = vector.broadcast %74 : i32 to vector<32x1xi32>
    %87 = arith.addi %76, %86 : vector<32x1xi32>
    %88 = arith.select %85, %87, %76 : vector<32x1xi1>, vector<32x1xi32>
    %c0_i32_37 = arith.constant 0 : i32
    %89 = vector.broadcast %c0_i32_37 : i32 to vector<32x1xi32>
    %90 = arith.cmpi eq, %88, %89 : vector<32x1xi32>
    %c1_i32_38 = arith.constant 1 : i32
    %91 = tpu.dynamic_rotate %71 by %c1_i32_38 dim 0 : vector<32x84xf32>, i32 -> vector<32x84xf32>
    %cst_39 = arith.constant 0.000000e+00 : f32
    %92 = vector.shape_cast %90 : vector<32x1xi1> to vector<32x1xi1>
    %93 = vector.broadcast %92 : vector<32x1xi1> to vector<32x84xi1>
    %94 = vector.broadcast %cst_39 : f32 to vector<32x84xf32>
    %95 = arith.select %93, %94, %91 : vector<32x84xi1>, vector<32x84xf32>
    %c15_i32 = arith.constant 15 : i32
    %96 = vector.broadcast %c15_i32 : i32 to vector<32x1xi32>
    %97 = arith.cmpi eq, %88, %96 : vector<32x1xi32>
    %c31_i32 = arith.constant 31 : i32
    %98 = tpu.dynamic_rotate %71 by %c31_i32 dim 0 : vector<32x84xf32>, i32 -> vector<32x84xf32>
    %cst_40 = arith.constant 0.000000e+00 : f32
    %99 = vector.shape_cast %97 : vector<32x1xi1> to vector<32x1xi1>
    %100 = vector.broadcast %99 : vector<32x1xi1> to vector<32x84xi1>
    %101 = vector.broadcast %cst_40 : f32 to vector<32x84xf32>
    %102 = arith.select %100, %101, %98 : vector<32x84xi1>, vector<32x84xf32>
    %c0_41 = arith.constant 0 : index
    %c0_42 = arith.constant 0 : index
    %c0_43 = arith.constant 0 : index
    %103 = vector.load %arg8[%c0_41, %c0_42, %c0_43] : memref<3x84x32xbf16, #tpu.memory_space<vmem>>, vector<1x84x32xbf16>
    %104 = vector.shape_cast %103 : vector<1x84x32xbf16> to vector<84x32xbf16>
    %105 = arith.truncf %95 : vector<32x84xf32> to vector<32x84xbf16>
    %cst_44 = arith.constant dense<0.000000e+00> : vector<32x32xf32>
    %106 = tpu.matmul %105, %104, %cst_44 {dimension_numbers = #tpu.dot_dimension_numbers<[1], [0], [0], [1], [0, 0, 1, 1], [], []>} : vector<32x84xbf16>, vector<84x32xbf16>, vector<32x32xf32> -> vector<32x32xf32>
    %c1_45 = arith.constant 1 : index
    %c0_46 = arith.constant 0 : index
    %c0_47 = arith.constant 0 : index
    %107 = vector.load %arg8[%c1_45, %c0_46, %c0_47] : memref<3x84x32xbf16, #tpu.memory_space<vmem>>, vector<1x84x32xbf16>
    %108 = vector.shape_cast %107 : vector<1x84x32xbf16> to vector<84x32xbf16>
    %109 = arith.truncf %71 : vector<32x84xf32> to vector<32x84xbf16>
    %cst_48 = arith.constant dense<0.000000e+00> : vector<32x32xf32>
    %110 = tpu.matmul %109, %108, %cst_48 {dimension_numbers = #tpu.dot_dimension_numbers<[1], [0], [0], [1], [0, 0, 1, 1], [], []>} : vector<32x84xbf16>, vector<84x32xbf16>, vector<32x32xf32> -> vector<32x32xf32>
    %111 = arith.addf %106, %110 : vector<32x32xf32>
    %c2 = arith.constant 2 : index
    %c0_49 = arith.constant 0 : index
    %c0_50 = arith.constant 0 : index
    %112 = vector.load %arg8[%c2, %c0_49, %c0_50] : memref<3x84x32xbf16, #tpu.memory_space<vmem>>, vector<1x84x32xbf16>
    %113 = vector.shape_cast %112 : vector<1x84x32xbf16> to vector<84x32xbf16>
    %114 = arith.truncf %102 : vector<32x84xf32> to vector<32x84xbf16>
    %cst_51 = arith.constant dense<0.000000e+00> : vector<32x32xf32>
    %115 = tpu.matmul %114, %113, %cst_51 {dimension_numbers = #tpu.dot_dimension_numbers<[1], [0], [0], [1], [0, 0, 1, 1], [], []>} : vector<32x84xbf16>, vector<84x32xbf16>, vector<32x32xf32> -> vector<32x32xf32>
    %116 = arith.addf %111, %115 : vector<32x32xf32>
    %c0_52 = arith.constant 0 : index
    %c0_53 = arith.constant 0 : index
    %117 = vector.load %arg9[%c0_52, %c0_53] : memref<1x32xf32, #tpu.memory_space<vmem>>, vector<1x32xf32>
    %118 = vector.broadcast %117 : vector<1x32xf32> to vector<32x32xf32>
    %119 = arith.addf %116, %118 : vector<32x32xf32>
    %cst_54 = arith.constant 0.000000e+00 : f32
    %120 = vector.broadcast %cst_54 : f32 to vector<32x32xf32>
    %121 = arith.maximumf %119, %120 : vector<32x32xf32>
    %122 = tpu.iota {dimensions = array<i32: 0>} : vector<32x1xi32>
    %c16_i32_55 = arith.constant 16 : i32
    %c0_i32_56 = arith.constant 0 : i32
    %123 = arith.cmpi eq, %c16_i32_55, %c0_i32_56 : i32
    %c1_i32_57 = arith.constant 1 : i32
    %124 = arith.select %123, %c1_i32_57, %c16_i32_55 : i32
    %125 = vector.broadcast %124 : i32 to vector<32x1xi32>
    %126 = arith.remsi %122, %125 : vector<32x1xi32>
    %c0_i32_58 = arith.constant 0 : i32
    %127 = vector.broadcast %c0_i32_58 : i32 to vector<32x1xi32>
    %128 = arith.cmpi ne, %126, %127 : vector<32x1xi32>
    %c0_i32_59 = arith.constant 0 : i32
    %129 = vector.broadcast %c0_i32_59 : i32 to vector<32x1xi32>
    %130 = arith.cmpi slt, %126, %129 : vector<32x1xi32>
    %c0_i32_60 = arith.constant 0 : i32
    %131 = arith.cmpi slt, %124, %c0_i32_60 : i32
    %132 = vector.broadcast %131 : i1 to vector<32x1xi1>
    %133 = vector.broadcast %132 : vector<32x1xi1> to vector<32x1xi1>
    %134 = arith.xori %130, %133 : vector<32x1xi1>
    %135 = arith.andi %134, %128 : vector<32x1xi1>
    %136 = vector.broadcast %124 : i32 to vector<32x1xi32>
    %137 = arith.addi %126, %136 : vector<32x1xi32>
    %138 = arith.select %135, %137, %126 : vector<32x1xi1>, vector<32x1xi32>
    %c0_i32_61 = arith.constant 0 : i32
    %139 = vector.broadcast %c0_i32_61 : i32 to vector<32x1xi32>
    %140 = arith.cmpi eq, %138, %139 : vector<32x1xi32>
    %c1_i32_62 = arith.constant 1 : i32
    %141 = tpu.dynamic_rotate %121 by %c1_i32_62 dim 0 : vector<32x32xf32>, i32 -> vector<32x32xf32>
    %cst_63 = arith.constant 0.000000e+00 : f32
    %142 = vector.shape_cast %140 : vector<32x1xi1> to vector<32x1xi1>
    %143 = vector.broadcast %142 : vector<32x1xi1> to vector<32x32xi1>
    %144 = vector.broadcast %cst_63 : f32 to vector<32x32xf32>
    %145 = arith.select %143, %144, %141 : vector<32x32xi1>, vector<32x32xf32>
    %c15_i32_64 = arith.constant 15 : i32
    %146 = vector.broadcast %c15_i32_64 : i32 to vector<32x1xi32>
    %147 = arith.cmpi eq, %138, %146 : vector<32x1xi32>
    %c31_i32_65 = arith.constant 31 : i32
    %148 = tpu.dynamic_rotate %121 by %c31_i32_65 dim 0 : vector<32x32xf32>, i32 -> vector<32x32xf32>
    %cst_66 = arith.constant 0.000000e+00 : f32
    %149 = vector.shape_cast %147 : vector<32x1xi1> to vector<32x1xi1>
    %150 = vector.broadcast %149 : vector<32x1xi1> to vector<32x32xi1>
    %151 = vector.broadcast %cst_66 : f32 to vector<32x32xf32>
    %152 = arith.select %150, %151, %148 : vector<32x32xi1>, vector<32x32xf32>
    %c0_67 = arith.constant 0 : index
    %c0_68 = arith.constant 0 : index
    %c0_69 = arith.constant 0 : index
    %153 = vector.load %arg10[%c0_67, %c0_68, %c0_69] : memref<3x32x32xbf16, #tpu.memory_space<vmem>>, vector<1x32x32xbf16>
    %154 = vector.shape_cast %153 : vector<1x32x32xbf16> to vector<32x32xbf16>
    %155 = arith.truncf %145 : vector<32x32xf32> to vector<32x32xbf16>
    %cst_70 = arith.constant dense<0.000000e+00> : vector<32x32xf32>
    %156 = tpu.matmul %155, %154, %cst_70 {dimension_numbers = #tpu.dot_dimension_numbers<[1], [0], [0], [1], [0, 0, 1, 1], [], []>} : vector<32x32xbf16>, vector<32x32xbf16>, vector<32x32xf32> -> vector<32x32xf32>
    %c1_71 = arith.constant 1 : index
    %c0_72 = arith.constant 0 : index
    %c0_73 = arith.constant 0 : index
    %157 = vector.load %arg10[%c1_71, %c0_72, %c0_73] : memref<3x32x32xbf16, #tpu.memory_space<vmem>>, vector<1x32x32xbf16>
    %158 = vector.shape_cast %157 : vector<1x32x32xbf16> to vector<32x32xbf16>
    %159 = arith.truncf %121 : vector<32x32xf32> to vector<32x32xbf16>
    %cst_74 = arith.constant dense<0.000000e+00> : vector<32x32xf32>
    %160 = tpu.matmul %159, %158, %cst_74 {dimension_numbers = #tpu.dot_dimension_numbers<[1], [0], [0], [1], [0, 0, 1, 1], [], []>} : vector<32x32xbf16>, vector<32x32xbf16>, vector<32x32xf32> -> vector<32x32xf32>
    %161 = arith.addf %156, %160 : vector<32x32xf32>
    %c2_75 = arith.constant 2 : index
    %c0_76 = arith.constant 0 : index
    %c0_77 = arith.constant 0 : index
    %162 = vector.load %arg10[%c2_75, %c0_76, %c0_77] : memref<3x32x32xbf16, #tpu.memory_space<vmem>>, vector<1x32x32xbf16>
    %163 = vector.shape_cast %162 : vector<1x32x32xbf16> to vector<32x32xbf16>
    %164 = arith.truncf %152 : vector<32x32xf32> to vector<32x32xbf16>
    %cst_78 = arith.constant dense<0.000000e+00> : vector<32x32xf32>
    %165 = tpu.matmul %164, %163, %cst_78 {dimension_numbers = #tpu.dot_dimension_numbers<[1], [0], [0], [1], [0, 0, 1, 1], [], []>} : vector<32x32xbf16>, vector<32x32xbf16>, vector<32x32xf32> -> vector<32x32xf32>
    %166 = arith.addf %161, %165 : vector<32x32xf32>
    %c0_79 = arith.constant 0 : index
    %c0_80 = arith.constant 0 : index
    %167 = vector.load %arg11[%c0_79, %c0_80] : memref<1x32xf32, #tpu.memory_space<vmem>>, vector<1x32xf32>
    %168 = vector.broadcast %167 : vector<1x32xf32> to vector<32x32xf32>
    %169 = arith.addf %166, %168 : vector<32x32xf32>
    %cst_81 = arith.constant 0.000000e+00 : f32
    %170 = vector.broadcast %cst_81 : f32 to vector<32x32xf32>
    %171 = arith.maximumf %169, %170 : vector<32x32xf32>
    %172 = tpu.concatenate %121, %171 in 1 : vector<32x32xf32>, vector<32x32xf32> -> vector<32x64xf32>
    %c0_82 = arith.constant 0 : index
    %c0_83 = arith.constant 0 : index
    %173 = vector.load %arg12[%c0_82, %c0_83] : memref<32x64xf32, #tpu.memory_space<vmem>>, vector<32x64xf32>
    tpu.vector_store %arg12[%c0_82, %c0_83], %172 {strides = array<i32>} : memref<32x64xf32, #tpu.memory_space<vmem>>, vector<32x64xf32>,
    return
  }
}

module attributes {stable_mosaic.version = 11 : i64} {
  func.func @_question_tower_kernel(%arg0: memref<16x32xf32, #tpu.memory_space<vmem>>, %arg1: memref<2x8xf32, #tpu.memory_space<vmem>>, %arg2: memref<3x32x32xbf16, #tpu.memory_space<vmem>>, %arg3: memref<1x32xf32, #tpu.memory_space<vmem>>, %arg4: memref<3x32x32xbf16, #tpu.memory_space<vmem>>, %arg5: memref<1x32xf32, #tpu.memory_space<vmem>>, %arg6: memref<64x64xbf16, #tpu.memory_space<vmem>>, %arg7: memref<1x64xf32, #tpu.memory_space<vmem>>, %arg8: memref<64x32xbf16, #tpu.memory_space<vmem>>, %arg9: memref<1x32xf32, #tpu.memory_space<vmem>>, %arg10: memref<64x1xbf16, #tpu.memory_space<vmem>>, %arg11: memref<1x1xf32, #tpu.memory_space<vmem>>, %arg12: memref<16x96xf32, #tpu.memory_space<vmem>>, %arg13: memref<16x128xf32, #tpu.memory_space<vmem>>, %arg14: memref<2x64xf32, #tpu.memory_space<vmem>>) attributes {dimension_semantics = [], scalar_prefetch = 0 : i64, scratch_operands = 0 : i64, tpu.core_type = #tpu.core_type<tc>} {
    %c0 = arith.constant 0 : index
    %c0_0 = arith.constant 0 : index
    %0 = vector.load %arg0[%c0, %c0_0] : memref<16x32xf32, #tpu.memory_space<vmem>>, vector<16x32xf32>
    %1 = tpu.iota {dimensions = array<i32: 0>} : vector<16x1xi32>
    %c8_i32 = arith.constant 8 : i32
    %c0_i32 = arith.constant 0 : i32
    %2 = arith.cmpi eq, %c8_i32, %c0_i32 : i32
    %c1_i32 = arith.constant 1 : i32
    %3 = arith.select %2, %c1_i32, %c8_i32 : i32
    %4 = vector.broadcast %3 : i32 to vector<16x1xi32>
    %5 = arith.remsi %1, %4 : vector<16x1xi32>
    %c0_i32_1 = arith.constant 0 : i32
    %6 = vector.broadcast %c0_i32_1 : i32 to vector<16x1xi32>
    %7 = arith.cmpi ne, %5, %6 : vector<16x1xi32>
    %c0_i32_2 = arith.constant 0 : i32
    %8 = vector.broadcast %c0_i32_2 : i32 to vector<16x1xi32>
    %9 = arith.cmpi slt, %5, %8 : vector<16x1xi32>
    %c0_i32_3 = arith.constant 0 : i32
    %10 = arith.cmpi slt, %3, %c0_i32_3 : i32
    %11 = vector.broadcast %10 : i1 to vector<16x1xi1>
    %12 = vector.broadcast %11 : vector<16x1xi1> to vector<16x1xi1>
    %13 = arith.xori %9, %12 : vector<16x1xi1>
    %14 = arith.andi %13, %7 : vector<16x1xi1>
    %15 = vector.broadcast %3 : i32 to vector<16x1xi32>
    %16 = arith.addi %5, %15 : vector<16x1xi32>
    %17 = arith.select %14, %16, %5 : vector<16x1xi1>, vector<16x1xi32>
    %c0_i32_4 = arith.constant 0 : i32
    %18 = vector.broadcast %c0_i32_4 : i32 to vector<16x1xi32>
    %19 = arith.cmpi eq, %17, %18 : vector<16x1xi32>
    %c1_i32_5 = arith.constant 1 : i32
    %20 = tpu.dynamic_rotate %0 by %c1_i32_5 dim 0 : vector<16x32xf32>, i32 -> vector<16x32xf32>
    %cst = arith.constant 0.000000e+00 : f32
    %21 = vector.shape_cast %19 : vector<16x1xi1> to vector<16x1xi1>
    %22 = vector.broadcast %21 : vector<16x1xi1> to vector<16x32xi1>
    %23 = vector.broadcast %cst : f32 to vector<16x32xf32>
    %24 = arith.select %22, %23, %20 : vector<16x32xi1>, vector<16x32xf32>
    %c7_i32 = arith.constant 7 : i32
    %25 = vector.broadcast %c7_i32 : i32 to vector<16x1xi32>
    %26 = arith.cmpi eq, %17, %25 : vector<16x1xi32>
    %c15_i32 = arith.constant 15 : i32
    %27 = tpu.dynamic_rotate %0 by %c15_i32 dim 0 : vector<16x32xf32>, i32 -> vector<16x32xf32>
    %cst_6 = arith.constant 0.000000e+00 : f32
    %28 = vector.shape_cast %26 : vector<16x1xi1> to vector<16x1xi1>
    %29 = vector.broadcast %28 : vector<16x1xi1> to vector<16x32xi1>
    %30 = vector.broadcast %cst_6 : f32 to vector<16x32xf32>
    %31 = arith.select %29, %30, %27 : vector<16x32xi1>, vector<16x32xf32>
    %c0_7 = arith.constant 0 : index
    %c0_8 = arith.constant 0 : index
    %c0_9 = arith.constant 0 : index
    %32 = vector.load %arg2[%c0_7, %c0_8, %c0_9] : memref<3x32x32xbf16, #tpu.memory_space<vmem>>, vector<1x32x32xbf16>
    %33 = vector.shape_cast %32 : vector<1x32x32xbf16> to vector<32x32xbf16>
    %34 = arith.truncf %24 : vector<16x32xf32> to vector<16x32xbf16>
    %cst_10 = arith.constant dense<0.000000e+00> : vector<16x32xf32>
    %35 = tpu.matmul %34, %33, %cst_10 {dimension_numbers = #tpu.dot_dimension_numbers<[1], [0], [0], [1], [0, 0, 1, 1], [], []>} : vector<16x32xbf16>, vector<32x32xbf16>, vector<16x32xf32> -> vector<16x32xf32>
    %c1 = arith.constant 1 : index
    %c0_11 = arith.constant 0 : index
    %c0_12 = arith.constant 0 : index
    %36 = vector.load %arg2[%c1, %c0_11, %c0_12] : memref<3x32x32xbf16, #tpu.memory_space<vmem>>, vector<1x32x32xbf16>
    %37 = vector.shape_cast %36 : vector<1x32x32xbf16> to vector<32x32xbf16>
    %38 = arith.truncf %0 : vector<16x32xf32> to vector<16x32xbf16>
    %cst_13 = arith.constant dense<0.000000e+00> : vector<16x32xf32>
    %39 = tpu.matmul %38, %37, %cst_13 {dimension_numbers = #tpu.dot_dimension_numbers<[1], [0], [0], [1], [0, 0, 1, 1], [], []>} : vector<16x32xbf16>, vector<32x32xbf16>, vector<16x32xf32> -> vector<16x32xf32>
    %40 = arith.addf %35, %39 : vector<16x32xf32>
    %c2 = arith.constant 2 : index
    %c0_14 = arith.constant 0 : index
    %c0_15 = arith.constant 0 : index
    %41 = vector.load %arg2[%c2, %c0_14, %c0_15] : memref<3x32x32xbf16, #tpu.memory_space<vmem>>, vector<1x32x32xbf16>
    %42 = vector.shape_cast %41 : vector<1x32x32xbf16> to vector<32x32xbf16>
    %43 = arith.truncf %31 : vector<16x32xf32> to vector<16x32xbf16>
    %cst_16 = arith.constant dense<0.000000e+00> : vector<16x32xf32>
    %44 = tpu.matmul %43, %42, %cst_16 {dimension_numbers = #tpu.dot_dimension_numbers<[1], [0], [0], [1], [0, 0, 1, 1], [], []>} : vector<16x32xbf16>, vector<32x32xbf16>, vector<16x32xf32> -> vector<16x32xf32>
    %45 = arith.addf %40, %44 : vector<16x32xf32>
    %c0_17 = arith.constant 0 : index
    %c0_18 = arith.constant 0 : index
    %46 = vector.load %arg3[%c0_17, %c0_18] : memref<1x32xf32, #tpu.memory_space<vmem>>, vector<1x32xf32>
    %47 = vector.broadcast %46 : vector<1x32xf32> to vector<16x32xf32>
    %48 = arith.addf %45, %47 : vector<16x32xf32>
    %cst_19 = arith.constant 0.000000e+00 : f32
    %49 = vector.broadcast %cst_19 : f32 to vector<16x32xf32>
    %50 = arith.maximumf %48, %49 : vector<16x32xf32>
    %51 = tpu.iota {dimensions = array<i32: 0>} : vector<16x1xi32>
    %c8_i32_20 = arith.constant 8 : i32
    %c0_i32_21 = arith.constant 0 : i32
    %52 = arith.cmpi eq, %c8_i32_20, %c0_i32_21 : i32
    %c1_i32_22 = arith.constant 1 : i32
    %53 = arith.select %52, %c1_i32_22, %c8_i32_20 : i32
    %54 = vector.broadcast %53 : i32 to vector<16x1xi32>
    %55 = arith.remsi %51, %54 : vector<16x1xi32>
    %c0_i32_23 = arith.constant 0 : i32
    %56 = vector.broadcast %c0_i32_23 : i32 to vector<16x1xi32>
    %57 = arith.cmpi ne, %55, %56 : vector<16x1xi32>
    %c0_i32_24 = arith.constant 0 : i32
    %58 = vector.broadcast %c0_i32_24 : i32 to vector<16x1xi32>
    %59 = arith.cmpi slt, %55, %58 : vector<16x1xi32>
    %c0_i32_25 = arith.constant 0 : i32
    %60 = arith.cmpi slt, %53, %c0_i32_25 : i32
    %61 = vector.broadcast %60 : i1 to vector<16x1xi1>
    %62 = vector.broadcast %61 : vector<16x1xi1> to vector<16x1xi1>
    %63 = arith.xori %59, %62 : vector<16x1xi1>
    %64 = arith.andi %63, %57 : vector<16x1xi1>
    %65 = vector.broadcast %53 : i32 to vector<16x1xi32>
    %66 = arith.addi %55, %65 : vector<16x1xi32>
    %67 = arith.select %64, %66, %55 : vector<16x1xi1>, vector<16x1xi32>
    %c0_i32_26 = arith.constant 0 : i32
    %68 = vector.broadcast %c0_i32_26 : i32 to vector<16x1xi32>
    %69 = arith.cmpi eq, %67, %68 : vector<16x1xi32>
    %c1_i32_27 = arith.constant 1 : i32
    %70 = tpu.dynamic_rotate %50 by %c1_i32_27 dim 0 : vector<16x32xf32>, i32 -> vector<16x32xf32>
    %cst_28 = arith.constant 0.000000e+00 : f32
    %71 = vector.shape_cast %69 : vector<16x1xi1> to vector<16x1xi1>
    %72 = vector.broadcast %71 : vector<16x1xi1> to vector<16x32xi1>
    %73 = vector.broadcast %cst_28 : f32 to vector<16x32xf32>
    %74 = arith.select %72, %73, %70 : vector<16x32xi1>, vector<16x32xf32>
    %c7_i32_29 = arith.constant 7 : i32
    %75 = vector.broadcast %c7_i32_29 : i32 to vector<16x1xi32>
    %76 = arith.cmpi eq, %67, %75 : vector<16x1xi32>
    %c15_i32_30 = arith.constant 15 : i32
    %77 = tpu.dynamic_rotate %50 by %c15_i32_30 dim 0 : vector<16x32xf32>, i32 -> vector<16x32xf32>
    %cst_31 = arith.constant 0.000000e+00 : f32
    %78 = vector.shape_cast %76 : vector<16x1xi1> to vector<16x1xi1>
    %79 = vector.broadcast %78 : vector<16x1xi1> to vector<16x32xi1>
    %80 = vector.broadcast %cst_31 : f32 to vector<16x32xf32>
    %81 = arith.select %79, %80, %77 : vector<16x32xi1>, vector<16x32xf32>
    %c0_32 = arith.constant 0 : index
    %c0_33 = arith.constant 0 : index
    %c0_34 = arith.constant 0 : index
    %82 = vector.load %arg4[%c0_32, %c0_33, %c0_34] : memref<3x32x32xbf16, #tpu.memory_space<vmem>>, vector<1x32x32xbf16>
    %83 = vector.shape_cast %82 : vector<1x32x32xbf16> to vector<32x32xbf16>
    %84 = arith.truncf %74 : vector<16x32xf32> to vector<16x32xbf16>
    %cst_35 = arith.constant dense<0.000000e+00> : vector<16x32xf32>
    %85 = tpu.matmul %84, %83, %cst_35 {dimension_numbers = #tpu.dot_dimension_numbers<[1], [0], [0], [1], [0, 0, 1, 1], [], []>} : vector<16x32xbf16>, vector<32x32xbf16>, vector<16x32xf32> -> vector<16x32xf32>
    %c1_36 = arith.constant 1 : index
    %c0_37 = arith.constant 0 : index
    %c0_38 = arith.constant 0 : index
    %86 = vector.load %arg4[%c1_36, %c0_37, %c0_38] : memref<3x32x32xbf16, #tpu.memory_space<vmem>>, vector<1x32x32xbf16>
    %87 = vector.shape_cast %86 : vector<1x32x32xbf16> to vector<32x32xbf16>
    %88 = arith.truncf %50 : vector<16x32xf32> to vector<16x32xbf16>
    %cst_39 = arith.constant dense<0.000000e+00> : vector<16x32xf32>
    %89 = tpu.matmul %88, %87, %cst_39 {dimension_numbers = #tpu.dot_dimension_numbers<[1], [0], [0], [1], [0, 0, 1, 1], [], []>} : vector<16x32xbf16>, vector<32x32xbf16>, vector<16x32xf32> -> vector<16x32xf32>
    %90 = arith.addf %85, %89 : vector<16x32xf32>
    %c2_40 = arith.constant 2 : index
    %c0_41 = arith.constant 0 : index
    %c0_42 = arith.constant 0 : index
    %91 = vector.load %arg4[%c2_40, %c0_41, %c0_42] : memref<3x32x32xbf16, #tpu.memory_space<vmem>>, vector<1x32x32xbf16>
    %92 = vector.shape_cast %91 : vector<1x32x32xbf16> to vector<32x32xbf16>
    %93 = arith.truncf %81 : vector<16x32xf32> to vector<16x32xbf16>
    %cst_43 = arith.constant dense<0.000000e+00> : vector<16x32xf32>
    %94 = tpu.matmul %93, %92, %cst_43 {dimension_numbers = #tpu.dot_dimension_numbers<[1], [0], [0], [1], [0, 0, 1, 1], [], []>} : vector<16x32xbf16>, vector<32x32xbf16>, vector<16x32xf32> -> vector<16x32xf32>
    %95 = arith.addf %90, %94 : vector<16x32xf32>
    %c0_44 = arith.constant 0 : index
    %c0_45 = arith.constant 0 : index
    %96 = vector.load %arg5[%c0_44, %c0_45] : memref<1x32xf32, #tpu.memory_space<vmem>>, vector<1x32xf32>
    %97 = vector.broadcast %96 : vector<1x32xf32> to vector<16x32xf32>
    %98 = arith.addf %95, %97 : vector<16x32xf32>
    %cst_46 = arith.constant 0.000000e+00 : f32
    %99 = vector.broadcast %cst_46 : f32 to vector<16x32xf32>
    %100 = arith.maximumf %98, %99 : vector<16x32xf32>
    %101 = tpu.concatenate %50, %100 in 1 : vector<16x32xf32>, vector<16x32xf32> -> vector<16x64xf32>
    %c0_47 = arith.constant 0 : index
    %c0_48 = arith.constant 0 : index
    %102 = vector.load %arg6[%c0_47, %c0_48] : memref<64x64xbf16, #tpu.memory_space<vmem>>, vector<64x64xbf16>
    %103 = arith.truncf %101 : vector<16x64xf32> to vector<16x64xbf16>
    %cst_49 = arith.constant dense<0.000000e+00> : vector<16x64xf32>
    %104 = tpu.matmul %103, %102, %cst_49 {dimension_numbers = #tpu.dot_dimension_numbers<[1], [0], [0], [1], [0, 0, 1, 1], [], []>} : vector<16x64xbf16>, vector<64x64xbf16>, vector<16x64xf32> -> vector<16x64xf32>
    %c0_50 = arith.constant 0 : index
    %c0_51 = arith.constant 0 : index
    %105 = vector.load %arg7[%c0_50, %c0_51] : memref<1x64xf32, #tpu.memory_space<vmem>>, vector<1x64xf32>
    %106 = vector.broadcast %105 : vector<1x64xf32> to vector<16x64xf32>
    %107 = arith.addf %104, %106 : vector<16x64xf32>
    %cst_52 = arith.constant 0.000000e+00 : f32
    %108 = vector.broadcast %cst_52 : f32 to vector<16x64xf32>
    %109 = arith.maximumf %107, %108 : vector<16x64xf32>
    %110 = tpu.concatenate %0, %50, %100 in 1 : vector<16x32xf32>, vector<16x32xf32>, vector<16x32xf32> -> vector<16x96xf32>
    %c0_53 = arith.constant 0 : index
    %c0_54 = arith.constant 0 : index
    %111 = vector.load %arg12[%c0_53, %c0_54] : memref<16x96xf32, #tpu.memory_space<vmem>>, vector<16x96xf32>
    tpu.vector_store %arg12[%c0_53, %c0_54], %110 {strides = array<i32>} : memref<16x96xf32, #tpu.memory_space<vmem>>, vector<16x96xf32>,
    %112 = tpu.concatenate %50, %100, %109 in 1 : vector<16x32xf32>, vector<16x32xf32>, vector<16x64xf32> -> vector<16x128xf32>
    %c0_55 = arith.constant 0 : index
    %c0_56 = arith.constant 0 : index
    %113 = vector.load %arg13[%c0_55, %c0_56] : memref<16x128xf32, #tpu.memory_space<vmem>>, vector<16x128xf32>
    tpu.vector_store %arg13[%c0_55, %c0_56], %112 {strides = array<i32>} : memref<16x128xf32, #tpu.memory_space<vmem>>, vector<16x128xf32>,
    %c0_57 = arith.constant 0 : index
    %c0_58 = arith.constant 0 : index
    %114 = vector.load %arg9[%c0_57, %c0_58] : memref<1x32xf32, #tpu.memory_space<vmem>>, vector<1x32xf32>
    %115 = tpu.iota {dimensions = array<i32: 0>} : vector<8x8xi32>
    %116 = tpu.iota {dimensions = array<i32: 1>} : vector<8x8xi32>
    %117 = arith.cmpi eq, %115, %116 : vector<8x8xi32>
    %118 = vector.extract_strided_slice %109 {offsets = [0, 0], sizes = [8, 64], strides = [1, 1]} : vector<16x64xf32> to vector<8x64xf32>
    %c0_59 = arith.constant 0 : index
    %c0_60 = arith.constant 0 : index
    %119 = vector.load %arg1[%c0_59, %c0_60] : memref<2x8xf32, #tpu.memory_space<vmem>>, vector<1x8xf32>
    %c0_61 = arith.constant 0 : index
    %c0_62 = arith.constant 0 : index
    %120 = vector.load %arg8[%c0_61, %c0_62] : memref<64x32xbf16, #tpu.memory_space<vmem>>, vector<64x32xbf16>
    %121 = arith.truncf %118 : vector<8x64xf32> to vector<8x64xbf16>
    %cst_63 = arith.constant dense<0.000000e+00> : vector<8x32xf32>
    %122 = tpu.matmul %121, %120, %cst_63 {dimension_numbers = #tpu.dot_dimension_numbers<[1], [0], [0], [1], [0, 0, 1, 1], [], []>} : vector<8x64xbf16>, vector<64x32xbf16>, vector<8x32xf32> -> vector<8x32xf32>
    %cst_64 = arith.constant 0.000000e+00 : f32
    %123 = vector.broadcast %cst_64 : f32 to vector<8x32xf32>
    %124 = arith.maximumf %122, %123 : vector<8x32xf32>
    %125 = vector.broadcast %114 : vector<1x32xf32> to vector<8x32xf32>
    %126 = arith.mulf %124, %125 : vector<8x32xf32>
    %127 = arith.truncf %126 : vector<8x32xf32> to vector<8x32xbf16>
    %128 = arith.truncf %124 : vector<8x32xf32> to vector<8x32xbf16>
    %cst_65 = arith.constant dense<0.000000e+00> : vector<8x8xf32>
    %129 = tpu.matmul %127, %128, %cst_65 {dimension_numbers = #tpu.dot_dimension_numbers<[1], [1], [0], [0], [0, 0, 1, 0], [], []>} : vector<8x32xbf16>, vector<8x32xbf16>, vector<8x8xf32> -> vector<8x8xf32>
    %cst_66 = arith.constant 5.000000e-01 : f32
    %130 = vector.broadcast %cst_66 : f32 to vector<1x8xf32>
    %131 = arith.cmpf ogt, %119, %130 : vector<1x8xf32>
    %cst_67 = arith.constant -1.000000e+30 : f32
    %132 = vector.shape_cast %131 : vector<1x8xi1> to vector<1x8xi1>
    %133 = vector.broadcast %132 : vector<1x8xi1> to vector<8x8xi1>
    %134 = vector.broadcast %cst_67 : f32 to vector<8x8xf32>
    %135 = arith.select %133, %134, %129 : vector<8x8xi1>, vector<8x8xf32>
    %cst_68 = arith.constant -1.000000e+30 : f32
    %136 = vector.broadcast %cst_68 : f32 to vector<8x8xf32>
    %137 = arith.select %117, %136, %135 : vector<8x8xi1>, vector<8x8xf32>
    %cst_69 = arith.constant dense<0xFF800000> : vector<8xf32>
    %138 = vector.multi_reduction <maximumf>, %137, %cst_69 [1] : vector<8x8xf32> to vector<8xf32>
    %139 = vector.shape_cast %138 : vector<8xf32> to vector<8x1xf32>
    %140 = vector.broadcast %139 : vector<8x1xf32> to vector<8x8xf32>
    %141 = arith.subf %137, %140 : vector<8x8xf32>
    %142 = math.exp %141 : vector<8x8xf32>
    %cst_70 = arith.constant dense<0.000000e+00> : vector<8xf32>
    %143 = vector.multi_reduction <add>, %142, %cst_70 [1] : vector<8x8xf32> to vector<8xf32>
    %144 = vector.shape_cast %143 : vector<8xf32> to vector<8x1xf32>
    %145 = tpu.reciprocal %144 {approx = true} : vector<8x1xf32> -> vector<8x1xf32>
    %146 = vector.broadcast %145 : vector<8x1xf32> to vector<8x8xf32>
    %147 = arith.mulf %142, %146 : vector<8x8xf32>
    %148 = arith.truncf %147 : vector<8x8xf32> to vector<8x8xbf16>
    %149 = arith.truncf %118 : vector<8x64xf32> to vector<8x64xbf16>
    %cst_71 = arith.constant dense<0.000000e+00> : vector<8x64xf32>
    %150 = tpu.matmul %148, %149, %cst_71 {dimension_numbers = #tpu.dot_dimension_numbers<[1], [0], [0], [1], [0, 0, 1, 1], [], []>} : vector<8x8xbf16>, vector<8x64xbf16>, vector<8x64xf32> -> vector<8x64xf32>
    %c0_72 = arith.constant 0 : index
    %c0_73 = arith.constant 0 : index
    %151 = vector.load %arg10[%c0_72, %c0_73] : memref<64x1xbf16, #tpu.memory_space<vmem>>, vector<64x1xbf16>
    %152 = arith.truncf %150 : vector<8x64xf32> to vector<8x64xbf16>
    %cst_74 = arith.constant dense<0.000000e+00> : vector<1x8xf32>
    %153 = tpu.matmul %151, %152, %cst_74 {dimension_numbers = #tpu.dot_dimension_numbers<[0], [1], [1], [0], [0, 1, 1, 0], [], []>} : vector<64x1xbf16>, vector<8x64xbf16>, vector<1x8xf32> -> vector<1x8xf32>
    %c0_75 = arith.constant 0 : index
    %c0_76 = arith.constant 0 : index
    %154 = vector.load %arg11[%c0_75, %c0_76] : memref<1x1xf32, #tpu.memory_space<vmem>>, vector<1x1xf32>
    %155 = vector.broadcast %154 : vector<1x1xf32> to vector<1x8xf32>
    %156 = arith.addf %153, %155 : vector<1x8xf32>
    %cst_77 = arith.constant 5.000000e-01 : f32
    %157 = vector.broadcast %cst_77 : f32 to vector<1x8xf32>
    %158 = arith.cmpf ogt, %119, %157 : vector<1x8xf32>
    %cst_78 = arith.constant -1.000000e+30 : f32
    %159 = vector.broadcast %cst_78 : f32 to vector<1x8xf32>
    %160 = arith.select %158, %159, %156 : vector<1x8xi1>, vector<1x8xf32>
    %cst_79 = arith.constant dense<0xFF800000> : vector<1xf32>
    %161 = vector.multi_reduction <maximumf>, %160, %cst_79 [1] : vector<1x8xf32> to vector<1xf32>
    %162 = vector.shape_cast %161 : vector<1xf32> to vector<1x1xf32>
    %163 = vector.broadcast %162 : vector<1x1xf32> to vector<1x8xf32>
    %164 = arith.subf %160, %163 : vector<1x8xf32>
    %165 = math.exp %164 : vector<1x8xf32>
    %cst_80 = arith.constant dense<0.000000e+00> : vector<1xf32>
    %166 = vector.multi_reduction <add>, %165, %cst_80 [1] : vector<1x8xf32> to vector<1xf32>
    %167 = vector.shape_cast %166 : vector<1xf32> to vector<1x1xf32>
    %168 = tpu.reciprocal %167 {approx = true} : vector<1x1xf32> -> vector<1x1xf32>
    %169 = vector.broadcast %168 : vector<1x1xf32> to vector<1x8xf32>
    %170 = arith.mulf %165, %169 : vector<1x8xf32>
    %171 = arith.truncf %170 : vector<1x8xf32> to vector<1x8xbf16>
    %172 = arith.truncf %150 : vector<8x64xf32> to vector<8x64xbf16>
    %cst_81 = arith.constant dense<0.000000e+00> : vector<1x64xf32>
    %173 = tpu.matmul %171, %172, %cst_81 {dimension_numbers = #tpu.dot_dimension_numbers<[1], [0], [0], [1], [0, 0, 1, 1], [], []>} : vector<1x8xbf16>, vector<8x64xbf16>, vector<1x64xf32> -> vector<1x64xf32>
    %c0_82 = arith.constant 0 : index
    %c0_83 = arith.constant 0 : index
    %174 = vector.load %arg14[%c0_82, %c0_83] : memref<2x64xf32, #tpu.memory_space<vmem>>, vector<1x64xf32>
    tpu.vector_store %arg14[%c0_82, %c0_83], %173 {strides = array<i32>} : memref<2x64xf32, #tpu.memory_space<vmem>>, vector<1x64xf32>,
    %175 = vector.extract_strided_slice %109 {offsets = [8, 0], sizes = [8, 64], strides = [1, 1]} : vector<16x64xf32> to vector<8x64xf32>
    %c1_84 = arith.constant 1 : index
    %c0_85 = arith.constant 0 : index
    %176 = vector.load %arg1[%c1_84, %c0_85] : memref<2x8xf32, #tpu.memory_space<vmem>>, vector<1x8xf32>
    %c0_86 = arith.constant 0 : index
    %c0_87 = arith.constant 0 : index
    %177 = vector.load %arg8[%c0_86, %c0_87] : memref<64x32xbf16, #tpu.memory_space<vmem>>, vector<64x32xbf16>
    %178 = arith.truncf %175 : vector<8x64xf32> to vector<8x64xbf16>
    %cst_88 = arith.constant dense<0.000000e+00> : vector<8x32xf32>
    %179 = tpu.matmul %178, %177, %cst_88 {dimension_numbers = #tpu.dot_dimension_numbers<[1], [0], [0], [1], [0, 0, 1, 1], [], []>} : vector<8x64xbf16>, vector<64x32xbf16>, vector<8x32xf32> -> vector<8x32xf32>
    %cst_89 = arith.constant 0.000000e+00 : f32
    %180 = vector.broadcast %cst_89 : f32 to vector<8x32xf32>
    %181 = arith.maximumf %179, %180 : vector<8x32xf32>
    %182 = vector.broadcast %114 : vector<1x32xf32> to vector<8x32xf32>
    %183 = arith.mulf %181, %182 : vector<8x32xf32>
    %184 = arith.truncf %183 : vector<8x32xf32> to vector<8x32xbf16>
    %185 = arith.truncf %181 : vector<8x32xf32> to vector<8x32xbf16>
    %cst_90 = arith.constant dense<0.000000e+00> : vector<8x8xf32>
    %186 = tpu.matmul %184, %185, %cst_90 {dimension_numbers = #tpu.dot_dimension_numbers<[1], [1], [0], [0], [0, 0, 1, 0], [], []>} : vector<8x32xbf16>, vector<8x32xbf16>, vector<8x8xf32> -> vector<8x8xf32>
    %cst_91 = arith.constant 5.000000e-01 : f32
    %187 = vector.broadcast %cst_91 : f32 to vector<1x8xf32>
    %188 = arith.cmpf ogt, %176, %187 : vector<1x8xf32>
    %cst_92 = arith.constant -1.000000e+30 : f32
    %189 = vector.shape_cast %188 : vector<1x8xi1> to vector<1x8xi1>
    %190 = vector.broadcast %189 : vector<1x8xi1> to vector<8x8xi1>
    %191 = vector.broadcast %cst_92 : f32 to vector<8x8xf32>
    %192 = arith.select %190, %191, %186 : vector<8x8xi1>, vector<8x8xf32>
    %cst_93 = arith.constant -1.000000e+30 : f32
    %193 = vector.broadcast %cst_93 : f32 to vector<8x8xf32>
    %194 = arith.select %117, %193, %192 : vector<8x8xi1>, vector<8x8xf32>
    %cst_94 = arith.constant dense<0xFF800000> : vector<8xf32>
    %195 = vector.multi_reduction <maximumf>, %194, %cst_94 [1] : vector<8x8xf32> to vector<8xf32>
    %196 = vector.shape_cast %195 : vector<8xf32> to vector<8x1xf32>
    %197 = vector.broadcast %196 : vector<8x1xf32> to vector<8x8xf32>
    %198 = arith.subf %194, %197 : vector<8x8xf32>
    %199 = math.exp %198 : vector<8x8xf32>
    %cst_95 = arith.constant dense<0.000000e+00> : vector<8xf32>
    %200 = vector.multi_reduction <add>, %199, %cst_95 [1] : vector<8x8xf32> to vector<8xf32>
    %201 = vector.shape_cast %200 : vector<8xf32> to vector<8x1xf32>
    %202 = tpu.reciprocal %201 {approx = true} : vector<8x1xf32> -> vector<8x1xf32>
    %203 = vector.broadcast %202 : vector<8x1xf32> to vector<8x8xf32>
    %204 = arith.mulf %199, %203 : vector<8x8xf32>
    %205 = arith.truncf %204 : vector<8x8xf32> to vector<8x8xbf16>
    %206 = arith.truncf %175 : vector<8x64xf32> to vector<8x64xbf16>
    %cst_96 = arith.constant dense<0.000000e+00> : vector<8x64xf32>
    %207 = tpu.matmul %205, %206, %cst_96 {dimension_numbers = #tpu.dot_dimension_numbers<[1], [0], [0], [1], [0, 0, 1, 1], [], []>} : vector<8x8xbf16>, vector<8x64xbf16>, vector<8x64xf32> -> vector<8x64xf32>
    %c0_97 = arith.constant 0 : index
    %c0_98 = arith.constant 0 : index
    %208 = vector.load %arg10[%c0_97, %c0_98] : memref<64x1xbf16, #tpu.memory_space<vmem>>, vector<64x1xbf16>
    %209 = arith.truncf %207 : vector<8x64xf32> to vector<8x64xbf16>
    %cst_99 = arith.constant dense<0.000000e+00> : vector<1x8xf32>
    %210 = tpu.matmul %208, %209, %cst_99 {dimension_numbers = #tpu.dot_dimension_numbers<[0], [1], [1], [0], [0, 1, 1, 0], [], []>} : vector<64x1xbf16>, vector<8x64xbf16>, vector<1x8xf32> -> vector<1x8xf32>
    %c0_100 = arith.constant 0 : index
    %c0_101 = arith.constant 0 : index
    %211 = vector.load %arg11[%c0_100, %c0_101] : memref<1x1xf32, #tpu.memory_space<vmem>>, vector<1x1xf32>
    %212 = vector.broadcast %211 : vector<1x1xf32> to vector<1x8xf32>
    %213 = arith.addf %210, %212 : vector<1x8xf32>
    %cst_102 = arith.constant 5.000000e-01 : f32
    %214 = vector.broadcast %cst_102 : f32 to vector<1x8xf32>
    %215 = arith.cmpf ogt, %176, %214 : vector<1x8xf32>
    %cst_103 = arith.constant -1.000000e+30 : f32
    %216 = vector.broadcast %cst_103 : f32 to vector<1x8xf32>
    %217 = arith.select %215, %216, %213 : vector<1x8xi1>, vector<1x8xf32>
    %cst_104 = arith.constant dense<0xFF800000> : vector<1xf32>
    %218 = vector.multi_reduction <maximumf>, %217, %cst_104 [1] : vector<1x8xf32> to vector<1xf32>
    %219 = vector.shape_cast %218 : vector<1xf32> to vector<1x1xf32>
    %220 = vector.broadcast %219 : vector<1x1xf32> to vector<1x8xf32>
    %221 = arith.subf %217, %220 : vector<1x8xf32>
    %222 = math.exp %221 : vector<1x8xf32>
    %cst_105 = arith.constant dense<0.000000e+00> : vector<1xf32>
    %223 = vector.multi_reduction <add>, %222, %cst_105 [1] : vector<1x8xf32> to vector<1xf32>
    %224 = vector.shape_cast %223 : vector<1xf32> to vector<1x1xf32>
    %225 = tpu.reciprocal %224 {approx = true} : vector<1x1xf32> -> vector<1x1xf32>
    %226 = vector.broadcast %225 : vector<1x1xf32> to vector<1x8xf32>
    %227 = arith.mulf %222, %226 : vector<1x8xf32>
    %228 = arith.truncf %227 : vector<1x8xf32> to vector<1x8xbf16>
    %229 = arith.truncf %207 : vector<8x64xf32> to vector<8x64xbf16>
    %cst_106 = arith.constant dense<0.000000e+00> : vector<1x64xf32>
    %230 = tpu.matmul %228, %229, %cst_106 {dimension_numbers = #tpu.dot_dimension_numbers<[1], [0], [0], [1], [0, 0, 1, 1], [], []>} : vector<1x8xbf16>, vector<8x64xbf16>, vector<1x64xf32> -> vector<1x64xf32>
    %c1_107 = arith.constant 1 : index
    %c0_108 = arith.constant 0 : index
    %231 = vector.load %arg14[%c1_107, %c0_108] : memref<2x64xf32, #tpu.memory_space<vmem>>, vector<1x64xf32>
    tpu.vector_store %arg14[%c1_107, %c0_108], %230 {strides = array<i32>} : memref<2x64xf32, #tpu.memory_space<vmem>>, vector<1x64xf32>,
    return
  }
}

module attributes {stable_mosaic.version = 11 : i64} {
  func.func @_context_deep_kernel(%arg0: memref<16x32xf32, #tpu.memory_space<vmem>>, %arg1: memref<32x64xf32, #tpu.memory_space<vmem>>, %arg2: memref<16x96xf32, #tpu.memory_space<vmem>>, %arg3: memref<16x128xf32, #tpu.memory_space<vmem>>, %arg4: memref<2x8xf32, #tpu.memory_space<vmem>>, %arg5: memref<1x16xf32, #tpu.memory_space<vmem>>, %arg6: memref<96x96xbf16, #tpu.memory_space<vmem>>, %arg7: memref<1x96xf32, #tpu.memory_space<vmem>>, %arg8: memref<192x64xbf16, #tpu.memory_space<vmem>>, %arg9: memref<1x64xf32, #tpu.memory_space<vmem>>, %arg10: memref<288x32xbf16, #tpu.memory_space<vmem>>, %arg11: memref<1x32xf32, #tpu.memory_space<vmem>>, %arg12: memref<128x64xbf16, #tpu.memory_space<vmem>>, %arg13: memref<1x64xf32, #tpu.memory_space<vmem>>, %arg14: memref<32x64xf32, #tpu.memory_space<vmem>>) attributes {dimension_semantics = [], scalar_prefetch = 0 : i64, scratch_operands = 0 : i64, tpu.core_type = #tpu.core_type<tc>} {
    %c0 = arith.constant 0 : index
    %c0_0 = arith.constant 0 : index
    %0 = vector.load %arg0[%c0, %c0_0] : memref<16x32xf32, #tpu.memory_space<vmem>>, vector<16x32xf32>
    %c0_1 = arith.constant 0 : index
    %c0_2 = arith.constant 0 : index
    %1 = vector.load %arg5[%c0_1, %c0_2] : memref<1x16xf32, #tpu.memory_space<vmem>>, vector<1x16xf32>
    %c0_3 = arith.constant 0 : index
    %c0_4 = arith.constant 0 : index
    %2 = vector.load %arg7[%c0_3, %c0_4] : memref<1x96xf32, #tpu.memory_space<vmem>>, vector<1x96xf32>
    %c0_5 = arith.constant 0 : index
    %c0_6 = arith.constant 0 : index
    %3 = vector.load %arg11[%c0_5, %c0_6] : memref<1x32xf32, #tpu.memory_space<vmem>>, vector<1x32xf32>
    %4 = tpu.iota {dimensions = array<i32: 0>} : vector<16x16xi32>
    %5 = tpu.iota {dimensions = array<i32: 1>} : vector<16x16xi32>
    %6 = arith.cmpi eq, %4, %5 : vector<16x16xi32>
    %c0_7 = arith.constant 0 : index
    %c0_8 = arith.constant 0 : index
    %7 = vector.load %arg2[%c0_7, %c0_8] : memref<16x96xf32, #tpu.memory_space<vmem>>, vector<16x96xf32>
    %c0_9 = arith.constant 0 : index
    %c0_10 = arith.constant 0 : index
    %8 = vector.load %arg6[%c0_9, %c0_10] : memref<96x96xbf16, #tpu.memory_space<vmem>>, vector<96x96xbf16>
    %9 = arith.truncf %7 : vector<16x96xf32> to vector<16x96xbf16>
    %cst = arith.constant dense<0.000000e+00> : vector<16x96xf32>
    %10 = tpu.matmul %9, %8, %cst {dimension_numbers = #tpu.dot_dimension_numbers<[1], [0], [0], [1], [0, 0, 1, 1], [], []>} : vector<16x96xbf16>, vector<96x96xbf16>, vector<16x96xf32> -> vector<16x96xf32>
    %cst_11 = arith.constant 0.000000e+00 : f32
    %11 = vector.broadcast %cst_11 : f32 to vector<16x96xf32>
    %12 = arith.maximumf %10, %11 : vector<16x96xf32>
    %c0_12 = arith.constant 0 : index
    %c0_13 = arith.constant 0 : index
    %13 = vector.load %arg3[%c0_12, %c0_13] : memref<16x128xf32, #tpu.memory_space<vmem>>, vector<16x128xf32>
    %c0_14 = arith.constant 0 : index
    %c0_15 = arith.constant 0 : index
    %14 = vector.load %arg1[%c0_14, %c0_15] : memref<32x64xf32, #tpu.memory_space<vmem>>, vector<16x64xf32>
    %15 = tpu.concatenate %0, %14 in 1 : vector<16x32xf32>, vector<16x64xf32> -> vector<16x96xf32>
    %c0_16 = arith.constant 0 : index
    %c0_17 = arith.constant 0 : index
    %16 = vector.load %arg4[%c0_16, %c0_17] : memref<2x8xf32, #tpu.memory_space<vmem>>, vector<1x8xf32>
    %17 = vector.extract_strided_slice %12 {offsets = [0, 0], sizes = [8, 96], strides = [1, 1]} : vector<16x96xf32> to vector<8x96xf32>
    %18 = vector.extract_strided_slice %13 {offsets = [0, 0], sizes = [8, 128], strides = [1, 1]} : vector<16x128xf32> to vector<8x128xf32>
    %c0_18 = arith.constant 0 : index
    %c0_19 = arith.constant 0 : index
    %19 = vector.load %arg6[%c0_18, %c0_19] : memref<96x96xbf16, #tpu.memory_space<vmem>>, vector<96x96xbf16>
    %20 = arith.truncf %15 : vector<16x96xf32> to vector<16x96xbf16>
    %cst_20 = arith.constant dense<0.000000e+00> : vector<16x96xf32>
    %21 = tpu.matmul %20, %19, %cst_20 {dimension_numbers = #tpu.dot_dimension_numbers<[1], [0], [0], [1], [0, 0, 1, 1], [], []>} : vector<16x96xbf16>, vector<96x96xbf16>, vector<16x96xf32> -> vector<16x96xf32>
    %cst_21 = arith.constant 0.000000e+00 : f32
    %22 = vector.broadcast %cst_21 : f32 to vector<16x96xf32>
    %23 = arith.maximumf %21, %22 : vector<16x96xf32>
    %24 = vector.broadcast %2 : vector<1x96xf32> to vector<16x96xf32>
    %25 = arith.mulf %23, %24 : vector<16x96xf32>
    %26 = vector.extract_strided_slice %25 {offsets = [0, 0], sizes = [16, 32], strides = [1, 1]} : vector<16x96xf32> to vector<16x32xf32>
    %27 = vector.extract_strided_slice %17 {offsets = [0, 0], sizes = [8, 32], strides = [1, 1]} : vector<8x96xf32> to vector<8x32xf32>
    %28 = arith.truncf %26 : vector<16x32xf32> to vector<16x32xbf16>
    %29 = arith.truncf %27 : vector<8x32xf32> to vector<8x32xbf16>
    %cst_22 = arith.constant dense<0.000000e+00> : vector<16x8xf32>
    %30 = tpu.matmul %28, %29, %cst_22 {dimension_numbers = #tpu.dot_dimension_numbers<[1], [1], [0], [0], [0, 0, 1, 0], [], []>} : vector<16x32xbf16>, vector<8x32xbf16>, vector<16x8xf32> -> vector<16x8xf32>
    %cst_23 = arith.constant 5.000000e-01 : f32
    %31 = vector.broadcast %cst_23 : f32 to vector<1x8xf32>
    %32 = arith.cmpf ogt, %16, %31 : vector<1x8xf32>
    %cst_24 = arith.constant -1.000000e+30 : f32
    %33 = vector.shape_cast %32 : vector<1x8xi1> to vector<1x8xi1>
    %34 = vector.broadcast %33 : vector<1x8xi1> to vector<16x8xi1>
    %35 = vector.broadcast %cst_24 : f32 to vector<16x8xf32>
    %36 = arith.select %34, %35, %30 : vector<16x8xi1>, vector<16x8xf32>
    %cst_25 = arith.constant dense<0xFF800000> : vector<16xf32>
    %37 = vector.multi_reduction <maximumf>, %36, %cst_25 [1] : vector<16x8xf32> to vector<16xf32>
    %38 = vector.shape_cast %37 : vector<16xf32> to vector<16x1xf32>
    %39 = vector.broadcast %38 : vector<16x1xf32> to vector<16x8xf32>
    %40 = arith.subf %36, %39 : vector<16x8xf32>
    %41 = math.exp %40 : vector<16x8xf32>
    %cst_26 = arith.constant dense<0.000000e+00> : vector<16xf32>
    %42 = vector.multi_reduction <add>, %41, %cst_26 [1] : vector<16x8xf32> to vector<16xf32>
    %43 = vector.shape_cast %42 : vector<16xf32> to vector<16x1xf32>
    %44 = tpu.reciprocal %43 {approx = true} : vector<16x1xf32> -> vector<16x1xf32>
    %45 = vector.broadcast %44 : vector<16x1xf32> to vector<16x8xf32>
    %46 = arith.mulf %41, %45 : vector<16x8xf32>
    %47 = vector.extract_strided_slice %18 {offsets = [0, 0], sizes = [8, 32], strides = [1, 1]} : vector<8x128xf32> to vector<8x32xf32>
    %48 = arith.truncf %46 : vector<16x8xf32> to vector<16x8xbf16>
    %49 = arith.truncf %47 : vector<8x32xf32> to vector<8x32xbf16>
    %cst_27 = arith.constant dense<0.000000e+00> : vector<16x32xf32>
    %50 = tpu.matmul %48, %49, %cst_27 {dimension_numbers = #tpu.dot_dimension_numbers<[1], [0], [0], [1], [0, 0, 1, 1], [], []>} : vector<16x8xbf16>, vector<8x32xbf16>, vector<16x32xf32> -> vector<16x32xf32>
    %51 = vector.extract_strided_slice %25 {offsets = [0, 32], sizes = [16, 32], strides = [1, 1]} : vector<16x96xf32> to vector<16x32xf32>
    %52 = vector.extract_strided_slice %17 {offsets = [0, 32], sizes = [8, 32], strides = [1, 1]} : vector<8x96xf32> to vector<8x32xf32>
    %53 = arith.truncf %51 : vector<16x32xf32> to vector<16x32xbf16>
    %54 = arith.truncf %52 : vector<8x32xf32> to vector<8x32xbf16>
    %cst_28 = arith.constant dense<0.000000e+00> : vector<16x8xf32>
    %55 = tpu.matmul %53, %54, %cst_28 {dimension_numbers = #tpu.dot_dimension_numbers<[1], [1], [0], [0], [0, 0, 1, 0], [], []>} : vector<16x32xbf16>, vector<8x32xbf16>, vector<16x8xf32> -> vector<16x8xf32>
    %cst_29 = arith.constant 5.000000e-01 : f32
    %56 = vector.broadcast %cst_29 : f32 to vector<1x8xf32>
    %57 = arith.cmpf ogt, %16, %56 : vector<1x8xf32>
    %cst_30 = arith.constant -1.000000e+30 : f32
    %58 = vector.shape_cast %57 : vector<1x8xi1> to vector<1x8xi1>
    %59 = vector.broadcast %58 : vector<1x8xi1> to vector<16x8xi1>
    %60 = vector.broadcast %cst_30 : f32 to vector<16x8xf32>
    %61 = arith.select %59, %60, %55 : vector<16x8xi1>, vector<16x8xf32>
    %cst_31 = arith.constant dense<0xFF800000> : vector<16xf32>
    %62 = vector.multi_reduction <maximumf>, %61, %cst_31 [1] : vector<16x8xf32> to vector<16xf32>
    %63 = vector.shape_cast %62 : vector<16xf32> to vector<16x1xf32>
    %64 = vector.broadcast %63 : vector<16x1xf32> to vector<16x8xf32>
    %65 = arith.subf %61, %64 : vector<16x8xf32>
    %66 = math.exp %65 : vector<16x8xf32>
    %cst_32 = arith.constant dense<0.000000e+00> : vector<16xf32>
    %67 = vector.multi_reduction <add>, %66, %cst_32 [1] : vector<16x8xf32> to vector<16xf32>
    %68 = vector.shape_cast %67 : vector<16xf32> to vector<16x1xf32>
    %69 = tpu.reciprocal %68 {approx = true} : vector<16x1xf32> -> vector<16x1xf32>
    %70 = vector.broadcast %69 : vector<16x1xf32> to vector<16x8xf32>
    %71 = arith.mulf %66, %70 : vector<16x8xf32>
    %72 = vector.extract_strided_slice %18 {offsets = [0, 32], sizes = [8, 32], strides = [1, 1]} : vector<8x128xf32> to vector<8x32xf32>
    %73 = arith.truncf %71 : vector<16x8xf32> to vector<16x8xbf16>
    %74 = arith.truncf %72 : vector<8x32xf32> to vector<8x32xbf16>
    %cst_33 = arith.constant dense<0.000000e+00> : vector<16x32xf32>
    %75 = tpu.matmul %73, %74, %cst_33 {dimension_numbers = #tpu.dot_dimension_numbers<[1], [0], [0], [1], [0, 0, 1, 1], [], []>} : vector<16x8xbf16>, vector<8x32xbf16>, vector<16x32xf32> -> vector<16x32xf32>
    %76 = vector.extract_strided_slice %25 {offsets = [0, 64], sizes = [16, 32], strides = [1, 1]} : vector<16x96xf32> to vector<16x32xf32>
    %77 = vector.extract_strided_slice %17 {offsets = [0, 64], sizes = [8, 32], strides = [1, 1]} : vector<8x96xf32> to vector<8x32xf32>
    %78 = arith.truncf %76 : vector<16x32xf32> to vector<16x32xbf16>
    %79 = arith.truncf %77 : vector<8x32xf32> to vector<8x32xbf16>
    %cst_34 = arith.constant dense<0.000000e+00> : vector<16x8xf32>
    %80 = tpu.matmul %78, %79, %cst_34 {dimension_numbers = #tpu.dot_dimension_numbers<[1], [1], [0], [0], [0, 0, 1, 0], [], []>} : vector<16x32xbf16>, vector<8x32xbf16>, vector<16x8xf32> -> vector<16x8xf32>
    %cst_35 = arith.constant 5.000000e-01 : f32
    %81 = vector.broadcast %cst_35 : f32 to vector<1x8xf32>
    %82 = arith.cmpf ogt, %16, %81 : vector<1x8xf32>
    %cst_36 = arith.constant -1.000000e+30 : f32
    %83 = vector.shape_cast %82 : vector<1x8xi1> to vector<1x8xi1>
    %84 = vector.broadcast %83 : vector<1x8xi1> to vector<16x8xi1>
    %85 = vector.broadcast %cst_36 : f32 to vector<16x8xf32>
    %86 = arith.select %84, %85, %80 : vector<16x8xi1>, vector<16x8xf32>
    %cst_37 = arith.constant dense<0xFF800000> : vector<16xf32>
    %87 = vector.multi_reduction <maximumf>, %86, %cst_37 [1] : vector<16x8xf32> to vector<16xf32>
    %88 = vector.shape_cast %87 : vector<16xf32> to vector<16x1xf32>
    %89 = vector.broadcast %88 : vector<16x1xf32> to vector<16x8xf32>
    %90 = arith.subf %86, %89 : vector<16x8xf32>
    %91 = math.exp %90 : vector<16x8xf32>
    %cst_38 = arith.constant dense<0.000000e+00> : vector<16xf32>
    %92 = vector.multi_reduction <add>, %91, %cst_38 [1] : vector<16x8xf32> to vector<16xf32>
    %93 = vector.shape_cast %92 : vector<16xf32> to vector<16x1xf32>
    %94 = tpu.reciprocal %93 {approx = true} : vector<16x1xf32> -> vector<16x1xf32>
    %95 = vector.broadcast %94 : vector<16x1xf32> to vector<16x8xf32>
    %96 = arith.mulf %91, %95 : vector<16x8xf32>
    %97 = vector.extract_strided_slice %18 {offsets = [0, 64], sizes = [8, 64], strides = [1, 1]} : vector<8x128xf32> to vector<8x64xf32>
    %98 = arith.truncf %96 : vector<16x8xf32> to vector<16x8xbf16>
    %99 = arith.truncf %97 : vector<8x64xf32> to vector<8x64xbf16>
    %cst_39 = arith.constant dense<0.000000e+00> : vector<16x64xf32>
    %100 = tpu.matmul %98, %99, %cst_39 {dimension_numbers = #tpu.dot_dimension_numbers<[1], [0], [0], [1], [0, 0, 1, 1], [], []>} : vector<16x8xbf16>, vector<8x64xbf16>, vector<16x64xf32> -> vector<16x64xf32>
    %101 = tpu.concatenate %14, %50, %75, %100 in 1 : vector<16x64xf32>, vector<16x32xf32>, vector<16x32xf32>, vector<16x64xf32> -> vector<16x192xf32>
    %c0_40 = arith.constant 0 : index
    %c0_41 = arith.constant 0 : index
    %102 = vector.load %arg8[%c0_40, %c0_41] : memref<192x64xbf16, #tpu.memory_space<vmem>>, vector<192x64xbf16>
    %103 = arith.truncf %101 : vector<16x192xf32> to vector<16x192xbf16>
    %cst_42 = arith.constant dense<0.000000e+00> : vector<16x64xf32>
    %104 = tpu.matmul %103, %102, %cst_42 {dimension_numbers = #tpu.dot_dimension_numbers<[1], [0], [0], [1], [0, 0, 1, 1], [], []>} : vector<16x192xbf16>, vector<192x64xbf16>, vector<16x64xf32> -> vector<16x64xf32>
    %c0_43 = arith.constant 0 : index
    %c0_44 = arith.constant 0 : index
    %105 = vector.load %arg9[%c0_43, %c0_44] : memref<1x64xf32, #tpu.memory_space<vmem>>, vector<1x64xf32>
    %106 = vector.broadcast %105 : vector<1x64xf32> to vector<16x64xf32>
    %107 = arith.addf %104, %106 : vector<16x64xf32>
    %cst_45 = arith.constant 0.000000e+00 : f32
    %108 = vector.broadcast %cst_45 : f32 to vector<16x64xf32>
    %109 = arith.maximumf %107, %108 : vector<16x64xf32>
    %110 = tpu.concatenate %109, %101, %0 in 1 : vector<16x64xf32>, vector<16x192xf32>, vector<16x32xf32> -> vector<16x288xf32>
    %c0_46 = arith.constant 0 : index
    %c0_47 = arith.constant 0 : index
    %111 = vector.load %arg10[%c0_46, %c0_47] : memref<288x32xbf16, #tpu.memory_space<vmem>>, vector<288x32xbf16>
    %112 = arith.truncf %110 : vector<16x288xf32> to vector<16x288xbf16>
    %cst_48 = arith.constant dense<0.000000e+00> : vector<16x32xf32>
    %113 = tpu.matmul %112, %111, %cst_48 {dimension_numbers = #tpu.dot_dimension_numbers<[1], [0], [0], [1], [0, 0, 1, 1], [], []>} : vector<16x288xbf16>, vector<288x32xbf16>, vector<16x32xf32> -> vector<16x32xf32>
    %cst_49 = arith.constant 0.000000e+00 : f32
    %114 = vector.broadcast %cst_49 : f32 to vector<16x32xf32>
    %115 = arith.maximumf %113, %114 : vector<16x32xf32>
    %116 = vector.broadcast %3 : vector<1x32xf32> to vector<16x32xf32>
    %117 = arith.mulf %115, %116 : vector<16x32xf32>
    %118 = arith.truncf %117 : vector<16x32xf32> to vector<16x32xbf16>
    %119 = arith.truncf %115 : vector<16x32xf32> to vector<16x32xbf16>
    %cst_50 = arith.constant dense<0.000000e+00> : vector<16x16xf32>
    %120 = tpu.matmul %118, %119, %cst_50 {dimension_numbers = #tpu.dot_dimension_numbers<[1], [1], [0], [0], [0, 0, 1, 0], [], []>} : vector<16x32xbf16>, vector<16x32xbf16>, vector<16x16xf32> -> vector<16x16xf32>
    %cst_51 = arith.constant 5.000000e-01 : f32
    %121 = vector.broadcast %cst_51 : f32 to vector<1x16xf32>
    %122 = arith.cmpf ogt, %1, %121 : vector<1x16xf32>
    %cst_52 = arith.constant -1.000000e+30 : f32
    %123 = vector.shape_cast %122 : vector<1x16xi1> to vector<1x16xi1>
    %124 = vector.broadcast %123 : vector<1x16xi1> to vector<16x16xi1>
    %125 = vector.broadcast %cst_52 : f32 to vector<16x16xf32>
    %126 = arith.select %124, %125, %120 : vector<16x16xi1>, vector<16x16xf32>
    %cst_53 = arith.constant -1.000000e+30 : f32
    %127 = vector.broadcast %cst_53 : f32 to vector<16x16xf32>
    %128 = arith.select %6, %127, %126 : vector<16x16xi1>, vector<16x16xf32>
    %cst_54 = arith.constant dense<0xFF800000> : vector<16xf32>
    %129 = vector.multi_reduction <maximumf>, %128, %cst_54 [1] : vector<16x16xf32> to vector<16xf32>
    %130 = vector.shape_cast %129 : vector<16xf32> to vector<16x1xf32>
    %131 = vector.broadcast %130 : vector<16x1xf32> to vector<16x16xf32>
    %132 = arith.subf %128, %131 : vector<16x16xf32>
    %133 = math.exp %132 : vector<16x16xf32>
    %cst_55 = arith.constant dense<0.000000e+00> : vector<16xf32>
    %134 = vector.multi_reduction <add>, %133, %cst_55 [1] : vector<16x16xf32> to vector<16xf32>
    %135 = vector.shape_cast %134 : vector<16xf32> to vector<16x1xf32>
    %136 = tpu.reciprocal %135 {approx = true} : vector<16x1xf32> -> vector<16x1xf32>
    %137 = vector.broadcast %136 : vector<16x1xf32> to vector<16x16xf32>
    %138 = arith.mulf %133, %137 : vector<16x16xf32>
    %139 = arith.truncf %138 : vector<16x16xf32> to vector<16x16xbf16>
    %140 = arith.truncf %109 : vector<16x64xf32> to vector<16x64xbf16>
    %cst_56 = arith.constant dense<0.000000e+00> : vector<16x64xf32>
    %141 = tpu.matmul %139, %140, %cst_56 {dimension_numbers = #tpu.dot_dimension_numbers<[1], [0], [0], [1], [0, 0, 1, 1], [], []>} : vector<16x16xbf16>, vector<16x64xbf16>, vector<16x64xf32> -> vector<16x64xf32>
    %142 = tpu.concatenate %109, %141 in 1 : vector<16x64xf32>, vector<16x64xf32> -> vector<16x128xf32>
    %c0_57 = arith.constant 0 : index
    %c0_58 = arith.constant 0 : index
    %143 = vector.load %arg12[%c0_57, %c0_58] : memref<128x64xbf16, #tpu.memory_space<vmem>>, vector<128x64xbf16>
    %144 = arith.truncf %142 : vector<16x128xf32> to vector<16x128xbf16>
    %cst_59 = arith.constant dense<0.000000e+00> : vector<16x64xf32>
    %145 = tpu.matmul %144, %143, %cst_59 {dimension_numbers = #tpu.dot_dimension_numbers<[1], [0], [0], [1], [0, 0, 1, 1], [], []>} : vector<16x128xbf16>, vector<128x64xbf16>, vector<16x64xf32> -> vector<16x64xf32>
    %c0_60 = arith.constant 0 : index
    %c0_61 = arith.constant 0 : index
    %146 = vector.load %arg13[%c0_60, %c0_61] : memref<1x64xf32, #tpu.memory_space<vmem>>, vector<1x64xf32>
    %147 = vector.broadcast %146 : vector<1x64xf32> to vector<16x64xf32>
    %148 = arith.addf %145, %147 : vector<16x64xf32>
    %cst_62 = arith.constant 0.000000e+00 : f32
    %149 = vector.broadcast %cst_62 : f32 to vector<16x64xf32>
    %150 = arith.maximumf %148, %149 : vector<16x64xf32>
    %c0_63 = arith.constant 0 : index
    %c0_64 = arith.constant 0 : index
    %151 = vector.load %arg14[%c0_63, %c0_64] : memref<32x64xf32, #tpu.memory_space<vmem>>, vector<16x64xf32>
    tpu.vector_store %arg14[%c0_63, %c0_64], %150 {strides = array<i32>} : memref<32x64xf32, #tpu.memory_space<vmem>>, vector<16x64xf32>,
    %c16 = arith.constant 16 : index
    %c0_65 = arith.constant 0 : index
    %152 = vector.load %arg1[%c16, %c0_65] : memref<32x64xf32, #tpu.memory_space<vmem>>, vector<16x64xf32>
    %153 = tpu.concatenate %0, %152 in 1 : vector<16x32xf32>, vector<16x64xf32> -> vector<16x96xf32>
    %c1 = arith.constant 1 : index
    %c0_66 = arith.constant 0 : index
    %154 = vector.load %arg4[%c1, %c0_66] : memref<2x8xf32, #tpu.memory_space<vmem>>, vector<1x8xf32>
    %155 = vector.extract_strided_slice %12 {offsets = [8, 0], sizes = [8, 96], strides = [1, 1]} : vector<16x96xf32> to vector<8x96xf32>
    %156 = vector.extract_strided_slice %13 {offsets = [8, 0], sizes = [8, 128], strides = [1, 1]} : vector<16x128xf32> to vector<8x128xf32>
    %c0_67 = arith.constant 0 : index
    %c0_68 = arith.constant 0 : index
    %157 = vector.load %arg6[%c0_67, %c0_68] : memref<96x96xbf16, #tpu.memory_space<vmem>>, vector<96x96xbf16>
    %158 = arith.truncf %153 : vector<16x96xf32> to vector<16x96xbf16>
    %cst_69 = arith.constant dense<0.000000e+00> : vector<16x96xf32>
    %159 = tpu.matmul %158, %157, %cst_69 {dimension_numbers = #tpu.dot_dimension_numbers<[1], [0], [0], [1], [0, 0, 1, 1], [], []>} : vector<16x96xbf16>, vector<96x96xbf16>, vector<16x96xf32> -> vector<16x96xf32>
    %cst_70 = arith.constant 0.000000e+00 : f32
    %160 = vector.broadcast %cst_70 : f32 to vector<16x96xf32>
    %161 = arith.maximumf %159, %160 : vector<16x96xf32>
    %162 = vector.broadcast %2 : vector<1x96xf32> to vector<16x96xf32>
    %163 = arith.mulf %161, %162 : vector<16x96xf32>
    %164 = vector.extract_strided_slice %163 {offsets = [0, 0], sizes = [16, 32], strides = [1, 1]} : vector<16x96xf32> to vector<16x32xf32>
    %165 = vector.extract_strided_slice %155 {offsets = [0, 0], sizes = [8, 32], strides = [1, 1]} : vector<8x96xf32> to vector<8x32xf32>
    %166 = arith.truncf %164 : vector<16x32xf32> to vector<16x32xbf16>
    %167 = arith.truncf %165 : vector<8x32xf32> to vector<8x32xbf16>
    %cst_71 = arith.constant dense<0.000000e+00> : vector<16x8xf32>
    %168 = tpu.matmul %166, %167, %cst_71 {dimension_numbers = #tpu.dot_dimension_numbers<[1], [1], [0], [0], [0, 0, 1, 0], [], []>} : vector<16x32xbf16>, vector<8x32xbf16>, vector<16x8xf32> -> vector<16x8xf32>
    %cst_72 = arith.constant 5.000000e-01 : f32
    %169 = vector.broadcast %cst_72 : f32 to vector<1x8xf32>
    %170 = arith.cmpf ogt, %154, %169 : vector<1x8xf32>
    %cst_73 = arith.constant -1.000000e+30 : f32
    %171 = vector.shape_cast %170 : vector<1x8xi1> to vector<1x8xi1>
    %172 = vector.broadcast %171 : vector<1x8xi1> to vector<16x8xi1>
    %173 = vector.broadcast %cst_73 : f32 to vector<16x8xf32>
    %174 = arith.select %172, %173, %168 : vector<16x8xi1>, vector<16x8xf32>
    %cst_74 = arith.constant dense<0xFF800000> : vector<16xf32>
    %175 = vector.multi_reduction <maximumf>, %174, %cst_74 [1] : vector<16x8xf32> to vector<16xf32>
    %176 = vector.shape_cast %175 : vector<16xf32> to vector<16x1xf32>
    %177 = vector.broadcast %176 : vector<16x1xf32> to vector<16x8xf32>
    %178 = arith.subf %174, %177 : vector<16x8xf32>
    %179 = math.exp %178 : vector<16x8xf32>
    %cst_75 = arith.constant dense<0.000000e+00> : vector<16xf32>
    %180 = vector.multi_reduction <add>, %179, %cst_75 [1] : vector<16x8xf32> to vector<16xf32>
    %181 = vector.shape_cast %180 : vector<16xf32> to vector<16x1xf32>
    %182 = tpu.reciprocal %181 {approx = true} : vector<16x1xf32> -> vector<16x1xf32>
    %183 = vector.broadcast %182 : vector<16x1xf32> to vector<16x8xf32>
    %184 = arith.mulf %179, %183 : vector<16x8xf32>
    %185 = vector.extract_strided_slice %156 {offsets = [0, 0], sizes = [8, 32], strides = [1, 1]} : vector<8x128xf32> to vector<8x32xf32>
    %186 = arith.truncf %184 : vector<16x8xf32> to vector<16x8xbf16>
    %187 = arith.truncf %185 : vector<8x32xf32> to vector<8x32xbf16>
    %cst_76 = arith.constant dense<0.000000e+00> : vector<16x32xf32>
    %188 = tpu.matmul %186, %187, %cst_76 {dimension_numbers = #tpu.dot_dimension_numbers<[1], [0], [0], [1], [0, 0, 1, 1], [], []>} : vector<16x8xbf16>, vector<8x32xbf16>, vector<16x32xf32> -> vector<16x32xf32>
    %189 = vector.extract_strided_slice %163 {offsets = [0, 32], sizes = [16, 32], strides = [1, 1]} : vector<16x96xf32> to vector<16x32xf32>
    %190 = vector.extract_strided_slice %155 {offsets = [0, 32], sizes = [8, 32], strides = [1, 1]} : vector<8x96xf32> to vector<8x32xf32>
    %191 = arith.truncf %189 : vector<16x32xf32> to vector<16x32xbf16>
    %192 = arith.truncf %190 : vector<8x32xf32> to vector<8x32xbf16>
    %cst_77 = arith.constant dense<0.000000e+00> : vector<16x8xf32>
    %193 = tpu.matmul %191, %192, %cst_77 {dimension_numbers = #tpu.dot_dimension_numbers<[1], [1], [0], [0], [0, 0, 1, 0], [], []>} : vector<16x32xbf16>, vector<8x32xbf16>, vector<16x8xf32> -> vector<16x8xf32>
    %cst_78 = arith.constant 5.000000e-01 : f32
    %194 = vector.broadcast %cst_78 : f32 to vector<1x8xf32>
    %195 = arith.cmpf ogt, %154, %194 : vector<1x8xf32>
    %cst_79 = arith.constant -1.000000e+30 : f32
    %196 = vector.shape_cast %195 : vector<1x8xi1> to vector<1x8xi1>
    %197 = vector.broadcast %196 : vector<1x8xi1> to vector<16x8xi1>
    %198 = vector.broadcast %cst_79 : f32 to vector<16x8xf32>
    %199 = arith.select %197, %198, %193 : vector<16x8xi1>, vector<16x8xf32>
    %cst_80 = arith.constant dense<0xFF800000> : vector<16xf32>
    %200 = vector.multi_reduction <maximumf>, %199, %cst_80 [1] : vector<16x8xf32> to vector<16xf32>
    %201 = vector.shape_cast %200 : vector<16xf32> to vector<16x1xf32>
    %202 = vector.broadcast %201 : vector<16x1xf32> to vector<16x8xf32>
    %203 = arith.subf %199, %202 : vector<16x8xf32>
    %204 = math.exp %203 : vector<16x8xf32>
    %cst_81 = arith.constant dense<0.000000e+00> : vector<16xf32>
    %205 = vector.multi_reduction <add>, %204, %cst_81 [1] : vector<16x8xf32> to vector<16xf32>
    %206 = vector.shape_cast %205 : vector<16xf32> to vector<16x1xf32>
    %207 = tpu.reciprocal %206 {approx = true} : vector<16x1xf32> -> vector<16x1xf32>
    %208 = vector.broadcast %207 : vector<16x1xf32> to vector<16x8xf32>
    %209 = arith.mulf %204, %208 : vector<16x8xf32>
    %210 = vector.extract_strided_slice %156 {offsets = [0, 32], sizes = [8, 32], strides = [1, 1]} : vector<8x128xf32> to vector<8x32xf32>
    %211 = arith.truncf %209 : vector<16x8xf32> to vector<16x8xbf16>
    %212 = arith.truncf %210 : vector<8x32xf32> to vector<8x32xbf16>
    %cst_82 = arith.constant dense<0.000000e+00> : vector<16x32xf32>
    %213 = tpu.matmul %211, %212, %cst_82 {dimension_numbers = #tpu.dot_dimension_numbers<[1], [0], [0], [1], [0, 0, 1, 1], [], []>} : vector<16x8xbf16>, vector<8x32xbf16>, vector<16x32xf32> -> vector<16x32xf32>
    %214 = vector.extract_strided_slice %163 {offsets = [0, 64], sizes = [16, 32], strides = [1, 1]} : vector<16x96xf32> to vector<16x32xf32>
    %215 = vector.extract_strided_slice %155 {offsets = [0, 64], sizes = [8, 32], strides = [1, 1]} : vector<8x96xf32> to vector<8x32xf32>
    %216 = arith.truncf %214 : vector<16x32xf32> to vector<16x32xbf16>
    %217 = arith.truncf %215 : vector<8x32xf32> to vector<8x32xbf16>
    %cst_83 = arith.constant dense<0.000000e+00> : vector<16x8xf32>
    %218 = tpu.matmul %216, %217, %cst_83 {dimension_numbers = #tpu.dot_dimension_numbers<[1], [1], [0], [0], [0, 0, 1, 0], [], []>} : vector<16x32xbf16>, vector<8x32xbf16>, vector<16x8xf32> -> vector<16x8xf32>
    %cst_84 = arith.constant 5.000000e-01 : f32
    %219 = vector.broadcast %cst_84 : f32 to vector<1x8xf32>
    %220 = arith.cmpf ogt, %154, %219 : vector<1x8xf32>
    %cst_85 = arith.constant -1.000000e+30 : f32
    %221 = vector.shape_cast %220 : vector<1x8xi1> to vector<1x8xi1>
    %222 = vector.broadcast %221 : vector<1x8xi1> to vector<16x8xi1>
    %223 = vector.broadcast %cst_85 : f32 to vector<16x8xf32>
    %224 = arith.select %222, %223, %218 : vector<16x8xi1>, vector<16x8xf32>
    %cst_86 = arith.constant dense<0xFF800000> : vector<16xf32>
    %225 = vector.multi_reduction <maximumf>, %224, %cst_86 [1] : vector<16x8xf32> to vector<16xf32>
    %226 = vector.shape_cast %225 : vector<16xf32> to vector<16x1xf32>
    %227 = vector.broadcast %226 : vector<16x1xf32> to vector<16x8xf32>
    %228 = arith.subf %224, %227 : vector<16x8xf32>
    %229 = math.exp %228 : vector<16x8xf32>
    %cst_87 = arith.constant dense<0.000000e+00> : vector<16xf32>
    %230 = vector.multi_reduction <add>, %229, %cst_87 [1] : vector<16x8xf32> to vector<16xf32>
    %231 = vector.shape_cast %230 : vector<16xf32> to vector<16x1xf32>
    %232 = tpu.reciprocal %231 {approx = true} : vector<16x1xf32> -> vector<16x1xf32>
    %233 = vector.broadcast %232 : vector<16x1xf32> to vector<16x8xf32>
    %234 = arith.mulf %229, %233 : vector<16x8xf32>
    %235 = vector.extract_strided_slice %156 {offsets = [0, 64], sizes = [8, 64], strides = [1, 1]} : vector<8x128xf32> to vector<8x64xf32>
    %236 = arith.truncf %234 : vector<16x8xf32> to vector<16x8xbf16>
    %237 = arith.truncf %235 : vector<8x64xf32> to vector<8x64xbf16>
    %cst_88 = arith.constant dense<0.000000e+00> : vector<16x64xf32>
    %238 = tpu.matmul %236, %237, %cst_88 {dimension_numbers = #tpu.dot_dimension_numbers<[1], [0], [0], [1], [0, 0, 1, 1], [], []>} : vector<16x8xbf16>, vector<8x64xbf16>, vector<16x64xf32> -> vector<16x64xf32>
    %239 = tpu.concatenate %152, %188, %213, %238 in 1 : vector<16x64xf32>, vector<16x32xf32>, vector<16x32xf32>, vector<16x64xf32> -> vector<16x192xf32>
    %c0_89 = arith.constant 0 : index
    %c0_90 = arith.constant 0 : index
    %240 = vector.load %arg8[%c0_89, %c0_90] : memref<192x64xbf16, #tpu.memory_space<vmem>>, vector<192x64xbf16>
    %241 = arith.truncf %239 : vector<16x192xf32> to vector<16x192xbf16>
    %cst_91 = arith.constant dense<0.000000e+00> : vector<16x64xf32>
    %242 = tpu.matmul %241, %240, %cst_91 {dimension_numbers = #tpu.dot_dimension_numbers<[1], [0], [0], [1], [0, 0, 1, 1], [], []>} : vector<16x192xbf16>, vector<192x64xbf16>, vector<16x64xf32> -> vector<16x64xf32>
    %c0_92 = arith.constant 0 : index
    %c0_93 = arith.constant 0 : index
    %243 = vector.load %arg9[%c0_92, %c0_93] : memref<1x64xf32, #tpu.memory_space<vmem>>, vector<1x64xf32>
    %244 = vector.broadcast %243 : vector<1x64xf32> to vector<16x64xf32>
    %245 = arith.addf %242, %244 : vector<16x64xf32>
    %cst_94 = arith.constant 0.000000e+00 : f32
    %246 = vector.broadcast %cst_94 : f32 to vector<16x64xf32>
    %247 = arith.maximumf %245, %246 : vector<16x64xf32>
    %248 = tpu.concatenate %247, %239, %0 in 1 : vector<16x64xf32>, vector<16x192xf32>, vector<16x32xf32> -> vector<16x288xf32>
    %c0_95 = arith.constant 0 : index
    %c0_96 = arith.constant 0 : index
    %249 = vector.load %arg10[%c0_95, %c0_96] : memref<288x32xbf16, #tpu.memory_space<vmem>>, vector<288x32xbf16>
    %250 = arith.truncf %248 : vector<16x288xf32> to vector<16x288xbf16>
    %cst_97 = arith.constant dense<0.000000e+00> : vector<16x32xf32>
    %251 = tpu.matmul %250, %249, %cst_97 {dimension_numbers = #tpu.dot_dimension_numbers<[1], [0], [0], [1], [0, 0, 1, 1], [], []>} : vector<16x288xbf16>, vector<288x32xbf16>, vector<16x32xf32> -> vector<16x32xf32>
    %cst_98 = arith.constant 0.000000e+00 : f32
    %252 = vector.broadcast %cst_98 : f32 to vector<16x32xf32>
    %253 = arith.maximumf %251, %252 : vector<16x32xf32>
    %254 = vector.broadcast %3 : vector<1x32xf32> to vector<16x32xf32>
    %255 = arith.mulf %253, %254 : vector<16x32xf32>
    %256 = arith.truncf %255 : vector<16x32xf32> to vector<16x32xbf16>
    %257 = arith.truncf %253 : vector<16x32xf32> to vector<16x32xbf16>
    %cst_99 = arith.constant dense<0.000000e+00> : vector<16x16xf32>
    %258 = tpu.matmul %256, %257, %cst_99 {dimension_numbers = #tpu.dot_dimension_numbers<[1], [1], [0], [0], [0, 0, 1, 0], [], []>} : vector<16x32xbf16>, vector<16x32xbf16>, vector<16x16xf32> -> vector<16x16xf32>
    %cst_100 = arith.constant 5.000000e-01 : f32
    %259 = vector.broadcast %cst_100 : f32 to vector<1x16xf32>
    %260 = arith.cmpf ogt, %1, %259 : vector<1x16xf32>
    %cst_101 = arith.constant -1.000000e+30 : f32
    %261 = vector.shape_cast %260 : vector<1x16xi1> to vector<1x16xi1>
    %262 = vector.broadcast %261 : vector<1x16xi1> to vector<16x16xi1>
    %263 = vector.broadcast %cst_101 : f32 to vector<16x16xf32>
    %264 = arith.select %262, %263, %258 : vector<16x16xi1>, vector<16x16xf32>
    %cst_102 = arith.constant -1.000000e+30 : f32
    %265 = vector.broadcast %cst_102 : f32 to vector<16x16xf32>
    %266 = arith.select %6, %265, %264 : vector<16x16xi1>, vector<16x16xf32>
    %cst_103 = arith.constant dense<0xFF800000> : vector<16xf32>
    %267 = vector.multi_reduction <maximumf>, %266, %cst_103 [1] : vector<16x16xf32> to vector<16xf32>
    %268 = vector.shape_cast %267 : vector<16xf32> to vector<16x1xf32>
    %269 = vector.broadcast %268 : vector<16x1xf32> to vector<16x16xf32>
    %270 = arith.subf %266, %269 : vector<16x16xf32>
    %271 = math.exp %270 : vector<16x16xf32>
    %cst_104 = arith.constant dense<0.000000e+00> : vector<16xf32>
    %272 = vector.multi_reduction <add>, %271, %cst_104 [1] : vector<16x16xf32> to vector<16xf32>
    %273 = vector.shape_cast %272 : vector<16xf32> to vector<16x1xf32>
    %274 = tpu.reciprocal %273 {approx = true} : vector<16x1xf32> -> vector<16x1xf32>
    %275 = vector.broadcast %274 : vector<16x1xf32> to vector<16x16xf32>
    %276 = arith.mulf %271, %275 : vector<16x16xf32>
    %277 = arith.truncf %276 : vector<16x16xf32> to vector<16x16xbf16>
    %278 = arith.truncf %247 : vector<16x64xf32> to vector<16x64xbf16>
    %cst_105 = arith.constant dense<0.000000e+00> : vector<16x64xf32>
    %279 = tpu.matmul %277, %278, %cst_105 {dimension_numbers = #tpu.dot_dimension_numbers<[1], [0], [0], [1], [0, 0, 1, 1], [], []>} : vector<16x16xbf16>, vector<16x64xbf16>, vector<16x64xf32> -> vector<16x64xf32>
    %280 = tpu.concatenate %247, %279 in 1 : vector<16x64xf32>, vector<16x64xf32> -> vector<16x128xf32>
    %c0_106 = arith.constant 0 : index
    %c0_107 = arith.constant 0 : index
    %281 = vector.load %arg12[%c0_106, %c0_107] : memref<128x64xbf16, #tpu.memory_space<vmem>>, vector<128x64xbf16>
    %282 = arith.truncf %280 : vector<16x128xf32> to vector<16x128xbf16>
    %cst_108 = arith.constant dense<0.000000e+00> : vector<16x64xf32>
    %283 = tpu.matmul %282, %281, %cst_108 {dimension_numbers = #tpu.dot_dimension_numbers<[1], [0], [0], [1], [0, 0, 1, 1], [], []>} : vector<16x128xbf16>, vector<128x64xbf16>, vector<16x64xf32> -> vector<16x64xf32>
    %c0_109 = arith.constant 0 : index
    %c0_110 = arith.constant 0 : index
    %284 = vector.load %arg13[%c0_109, %c0_110] : memref<1x64xf32, #tpu.memory_space<vmem>>, vector<1x64xf32>
    %285 = vector.broadcast %284 : vector<1x64xf32> to vector<16x64xf32>
    %286 = arith.addf %283, %285 : vector<16x64xf32>
    %cst_111 = arith.constant 0.000000e+00 : f32
    %287 = vector.broadcast %cst_111 : f32 to vector<16x64xf32>
    %288 = arith.maximumf %286, %287 : vector<16x64xf32>
    %c16_112 = arith.constant 16 : index
    %c0_113 = arith.constant 0 : index
    %289 = vector.load %arg14[%c16_112, %c0_113] : memref<32x64xf32, #tpu.memory_space<vmem>>, vector<16x64xf32>
    tpu.vector_store %arg14[%c16_112, %c0_113], %288 {strides = array<i32>} : memref<32x64xf32, #tpu.memory_space<vmem>>, vector<16x64xf32>,
    return
  }
}

module attributes {stable_mosaic.version = 11 : i64} {
  func.func @_final_scores_kernel(%arg0: memref<32x64xf32, #tpu.memory_space<vmem>>, %arg1: memref<2x64xf32, #tpu.memory_space<vmem>>, %arg2: memref<1x16xf32, #tpu.memory_space<vmem>>, %arg3: memref<4x64x64xbf16, #tpu.memory_space<vmem>>, %arg4: memref<4x64xf32, #tpu.memory_space<vmem>>, %arg5: memref<64x192xbf16, #tpu.memory_space<vmem>>, %arg6: memref<1x192xf32, #tpu.memory_space<vmem>>, %arg7: memref<64x192xbf16, #tpu.memory_space<vmem>>, %arg8: memref<1x192xf32, #tpu.memory_space<vmem>>, %arg9: memref<64x64xbf16, #tpu.memory_space<vmem>>, %arg10: memref<1x64xf32, #tpu.memory_space<vmem>>, %arg11: memref<3x64xf32, #tpu.memory_space<vmem>>, %arg12: memref<1x3xf32, #tpu.memory_space<vmem>>, %arg13: memref<2x2x16xf32, #tpu.memory_space<vmem>>, %arg14: memref<2x3xf32, #tpu.memory_space<vmem>>) attributes {dimension_semantics = [], scalar_prefetch = 0 : i64, scratch_operands = 0 : i64, tpu.core_type = #tpu.core_type<tc>} {
    %c0 = arith.constant 0 : index
    %c0_0 = arith.constant 0 : index
    %0 = vector.load %arg2[%c0, %c0_0] : memref<1x16xf32, #tpu.memory_space<vmem>>, vector<1x16xf32>
    %c0_1 = arith.constant 0 : index
    %c0_2 = arith.constant 0 : index
    %1 = vector.load %arg4[%c0_1, %c0_2] : memref<4x64xf32, #tpu.memory_space<vmem>>, vector<4x64xf32>
    %c0_3 = arith.constant 0 : index
    %c0_4 = arith.constant 0 : index
    %2 = vector.load %arg11[%c0_3, %c0_4] : memref<3x64xf32, #tpu.memory_space<vmem>>, vector<3x64xf32>
    %c0_5 = arith.constant 0 : index
    %c0_6 = arith.constant 0 : index
    %3 = vector.load %arg12[%c0_5, %c0_6] : memref<1x3xf32, #tpu.memory_space<vmem>>, vector<1x3xf32>
    %c0_7 = arith.constant 0 : index
    %c0_8 = arith.constant 0 : index
    %4 = vector.load %arg0[%c0_7, %c0_8] : memref<32x64xf32, #tpu.memory_space<vmem>>, vector<16x64xf32>
    %c0_9 = arith.constant 0 : index
    %c0_10 = arith.constant 0 : index
    %5 = vector.load %arg1[%c0_9, %c0_10] : memref<2x64xf32, #tpu.memory_space<vmem>>, vector<1x64xf32>
    %c0_11 = arith.constant 0 : index
    %c0_12 = arith.constant 0 : index
    %c0_13 = arith.constant 0 : index
    %6 = vector.load %arg3[%c0_11, %c0_12, %c0_13] : memref<4x64x64xbf16, #tpu.memory_space<vmem>>, vector<1x64x64xbf16>
    %7 = vector.shape_cast %6 : vector<1x64x64xbf16> to vector<64x64xbf16>
    %8 = arith.truncf %5 : vector<1x64xf32> to vector<1x64xbf16>
    %cst = arith.constant dense<0.000000e+00> : vector<1x64xf32>
    %9 = tpu.matmul %8, %7, %cst {dimension_numbers = #tpu.dot_dimension_numbers<[1], [0], [0], [1], [0, 0, 1, 1], [], []>} : vector<1x64xbf16>, vector<64x64xbf16>, vector<1x64xf32> -> vector<1x64xf32>
    %10 = vector.extract_strided_slice %1 {offsets = [0, 0], sizes = [1, 64], strides = [1, 1]} : vector<4x64xf32> to vector<1x64xf32>
    %11 = arith.addf %9, %10 : vector<1x64xf32>
    %c1 = arith.constant 1 : index
    %c0_14 = arith.constant 0 : index
    %c0_15 = arith.constant 0 : index
    %12 = vector.load %arg3[%c1, %c0_14, %c0_15] : memref<4x64x64xbf16, #tpu.memory_space<vmem>>, vector<1x64x64xbf16>
    %13 = vector.shape_cast %12 : vector<1x64x64xbf16> to vector<64x64xbf16>
    %14 = arith.truncf %5 : vector<1x64xf32> to vector<1x64xbf16>
    %cst_16 = arith.constant dense<0.000000e+00> : vector<1x64xf32>
    %15 = tpu.matmul %14, %13, %cst_16 {dimension_numbers = #tpu.dot_dimension_numbers<[1], [0], [0], [1], [0, 0, 1, 1], [], []>} : vector<1x64xbf16>, vector<64x64xbf16>, vector<1x64xf32> -> vector<1x64xf32>
    %16 = vector.extract_strided_slice %1 {offsets = [1, 0], sizes = [1, 64], strides = [1, 1]} : vector<4x64xf32> to vector<1x64xf32>
    %17 = arith.addf %15, %16 : vector<1x64xf32>
    %c2 = arith.constant 2 : index
    %c0_17 = arith.constant 0 : index
    %c0_18 = arith.constant 0 : index
    %18 = vector.load %arg3[%c2, %c0_17, %c0_18] : memref<4x64x64xbf16, #tpu.memory_space<vmem>>, vector<1x64x64xbf16>
    %19 = vector.shape_cast %18 : vector<1x64x64xbf16> to vector<64x64xbf16>
    %20 = arith.truncf %5 : vector<1x64xf32> to vector<1x64xbf16>
    %cst_19 = arith.constant dense<0.000000e+00> : vector<1x64xf32>
    %21 = tpu.matmul %20, %19, %cst_19 {dimension_numbers = #tpu.dot_dimension_numbers<[1], [0], [0], [1], [0, 0, 1, 1], [], []>} : vector<1x64xbf16>, vector<64x64xbf16>, vector<1x64xf32> -> vector<1x64xf32>
    %22 = vector.extract_strided_slice %1 {offsets = [2, 0], sizes = [1, 64], strides = [1, 1]} : vector<4x64xf32> to vector<1x64xf32>
    %23 = arith.addf %21, %22 : vector<1x64xf32>
    %c3 = arith.constant 3 : index
    %c0_20 = arith.constant 0 : index
    %c0_21 = arith.constant 0 : index
    %24 = vector.load %arg3[%c3, %c0_20, %c0_21] : memref<4x64x64xbf16, #tpu.memory_space<vmem>>, vector<1x64x64xbf16>
    %25 = vector.shape_cast %24 : vector<1x64x64xbf16> to vector<64x64xbf16>
    %26 = arith.truncf %5 : vector<1x64xf32> to vector<1x64xbf16>
    %cst_22 = arith.constant dense<0.000000e+00> : vector<1x64xf32>
    %27 = tpu.matmul %26, %25, %cst_22 {dimension_numbers = #tpu.dot_dimension_numbers<[1], [0], [0], [1], [0, 0, 1, 1], [], []>} : vector<1x64xbf16>, vector<64x64xbf16>, vector<1x64xf32> -> vector<1x64xf32>
    %28 = vector.extract_strided_slice %1 {offsets = [3, 0], sizes = [1, 64], strides = [1, 1]} : vector<4x64xf32> to vector<1x64xf32>
    %29 = arith.addf %27, %28 : vector<1x64xf32>
    %30 = tpu.concatenate %11, %17, %23, %29 in 0 : vector<1x64xf32>, vector<1x64xf32>, vector<1x64xf32>, vector<1x64xf32> -> vector<4x64xf32>
    %31 = arith.truncf %30 : vector<4x64xf32> to vector<4x64xbf16>
    %32 = arith.truncf %4 : vector<16x64xf32> to vector<16x64xbf16>
    %cst_23 = arith.constant dense<0.000000e+00> : vector<4x16xf32>
    %33 = tpu.matmul %31, %32, %cst_23 {dimension_numbers = #tpu.dot_dimension_numbers<[1], [1], [0], [0], [0, 0, 1, 0], [], []>} : vector<4x64xbf16>, vector<16x64xbf16>, vector<4x16xf32> -> vector<4x16xf32>
    %cst_24 = arith.constant 5.000000e-01 : f32
    %34 = vector.broadcast %cst_24 : f32 to vector<1x16xf32>
    %35 = arith.cmpf ogt, %0, %34 : vector<1x16xf32>
    %cst_25 = arith.constant -1.000000e+30 : f32
    %36 = vector.shape_cast %35 : vector<1x16xi1> to vector<1x16xi1>
    %37 = vector.broadcast %36 : vector<1x16xi1> to vector<4x16xi1>
    %38 = vector.broadcast %cst_25 : f32 to vector<4x16xf32>
    %39 = arith.select %37, %38, %33 : vector<4x16xi1>, vector<4x16xf32>
    %cst_26 = arith.constant dense<0xFF800000> : vector<4xf32>
    %40 = vector.multi_reduction <maximumf>, %39, %cst_26 [1] : vector<4x16xf32> to vector<4xf32>
    %41 = vector.shape_cast %40 : vector<4xf32> to vector<4x1xf32>
    %42 = vector.broadcast %41 : vector<4x1xf32> to vector<4x16xf32>
    %43 = arith.subf %39, %42 : vector<4x16xf32>
    %44 = math.exp %43 : vector<4x16xf32>
    %cst_27 = arith.constant dense<0.000000e+00> : vector<4xf32>
    %45 = vector.multi_reduction <add>, %44, %cst_27 [1] : vector<4x16xf32> to vector<4xf32>
    %46 = vector.shape_cast %45 : vector<4xf32> to vector<4x1xf32>
    %47 = tpu.reciprocal %46 {approx = true} : vector<4x1xf32> -> vector<4x1xf32>
    %48 = vector.broadcast %47 : vector<4x1xf32> to vector<4x16xf32>
    %49 = arith.mulf %44, %48 : vector<4x16xf32>
    %50 = arith.truncf %49 : vector<4x16xf32> to vector<4x16xbf16>
    %51 = arith.truncf %4 : vector<16x64xf32> to vector<16x64xbf16>
    %cst_28 = arith.constant dense<0.000000e+00> : vector<4x64xf32>
    %52 = tpu.matmul %50, %51, %cst_28 {dimension_numbers = #tpu.dot_dimension_numbers<[1], [0], [0], [1], [0, 0, 1, 1], [], []>} : vector<4x16xbf16>, vector<16x64xbf16>, vector<4x64xf32> -> vector<4x64xf32>
    %53 = vector.extract_strided_slice %52 {offsets = [0, 0], sizes = [1, 64], strides = [1, 1]} : vector<4x64xf32> to vector<1x64xf32>
    %c0_29 = arith.constant 0 : index
    %c0_30 = arith.constant 0 : index
    %54 = vector.load %arg5[%c0_29, %c0_30] : memref<64x192xbf16, #tpu.memory_space<vmem>>, vector<64x192xbf16>
    %55 = arith.truncf %53 : vector<1x64xf32> to vector<1x64xbf16>
    %cst_31 = arith.constant dense<0.000000e+00> : vector<1x192xf32>
    %56 = tpu.matmul %55, %54, %cst_31 {dimension_numbers = #tpu.dot_dimension_numbers<[1], [0], [0], [1], [0, 0, 1, 1], [], []>} : vector<1x64xbf16>, vector<64x192xbf16>, vector<1x192xf32> -> vector<1x192xf32>
    %c0_32 = arith.constant 0 : index
    %c0_33 = arith.constant 0 : index
    %57 = vector.load %arg6[%c0_32, %c0_33] : memref<1x192xf32, #tpu.memory_space<vmem>>, vector<1x192xf32>
    %58 = arith.addf %56, %57 : vector<1x192xf32>
    %c0_34 = arith.constant 0 : index
    %c0_35 = arith.constant 0 : index
    %59 = vector.load %arg7[%c0_34, %c0_35] : memref<64x192xbf16, #tpu.memory_space<vmem>>, vector<64x192xbf16>
    %60 = arith.truncf %5 : vector<1x64xf32> to vector<1x64xbf16>
    %cst_36 = arith.constant dense<0.000000e+00> : vector<1x192xf32>
    %61 = tpu.matmul %60, %59, %cst_36 {dimension_numbers = #tpu.dot_dimension_numbers<[1], [0], [0], [1], [0, 0, 1, 1], [], []>} : vector<1x64xbf16>, vector<64x192xbf16>, vector<1x192xf32> -> vector<1x192xf32>
    %c0_37 = arith.constant 0 : index
    %c0_38 = arith.constant 0 : index
    %62 = vector.load %arg8[%c0_37, %c0_38] : memref<1x192xf32, #tpu.memory_space<vmem>>, vector<1x192xf32>
    %63 = arith.addf %61, %62 : vector<1x192xf32>
    %64 = vector.extract_strided_slice %58 {offsets = [0, 0], sizes = [1, 64], strides = [1, 1]} : vector<1x192xf32> to vector<1x64xf32>
    %65 = vector.extract_strided_slice %63 {offsets = [0, 0], sizes = [1, 64], strides = [1, 1]} : vector<1x192xf32> to vector<1x64xf32>
    %66 = arith.addf %64, %65 : vector<1x64xf32>
    %67 = arith.negf %66 : vector<1x64xf32>
    %68 = math.exp %67 : vector<1x64xf32>
    %cst_39 = arith.constant 1.000000e+00 : f32
    %69 = vector.broadcast %cst_39 : f32 to vector<1x64xf32>
    %70 = arith.addf %69, %68 : vector<1x64xf32>
    %71 = arith.divf %69, %70 : vector<1x64xf32>
    %72 = vector.extract_strided_slice %58 {offsets = [0, 64], sizes = [1, 64], strides = [1, 1]} : vector<1x192xf32> to vector<1x64xf32>
    %73 = vector.extract_strided_slice %63 {offsets = [0, 64], sizes = [1, 64], strides = [1, 1]} : vector<1x192xf32> to vector<1x64xf32>
    %74 = arith.addf %72, %73 : vector<1x64xf32>
    %75 = arith.negf %74 : vector<1x64xf32>
    %76 = math.exp %75 : vector<1x64xf32>
    %cst_40 = arith.constant 1.000000e+00 : f32
    %77 = vector.broadcast %cst_40 : f32 to vector<1x64xf32>
    %78 = arith.addf %77, %76 : vector<1x64xf32>
    %79 = arith.divf %77, %78 : vector<1x64xf32>
    %80 = vector.extract_strided_slice %58 {offsets = [0, 128], sizes = [1, 64], strides = [1, 1]} : vector<1x192xf32> to vector<1x64xf32>
    %81 = vector.extract_strided_slice %63 {offsets = [0, 128], sizes = [1, 64], strides = [1, 1]} : vector<1x192xf32> to vector<1x64xf32>
    %82 = arith.mulf %71, %81 : vector<1x64xf32>
    %83 = arith.addf %80, %82 : vector<1x64xf32>
    %84 = math.tanh %83 : vector<1x64xf32>
    %cst_41 = arith.constant 1.000000e+00 : f32
    %85 = vector.broadcast %cst_41 : f32 to vector<1x64xf32>
    %86 = arith.subf %85, %79 : vector<1x64xf32>
    %87 = arith.mulf %86, %84 : vector<1x64xf32>
    %88 = arith.mulf %79, %5 : vector<1x64xf32>
    %89 = arith.addf %87, %88 : vector<1x64xf32>
    %c0_42 = arith.constant 0 : index
    %c0_43 = arith.constant 0 : index
    %90 = vector.load %arg9[%c0_42, %c0_43] : memref<64x64xbf16, #tpu.memory_space<vmem>>, vector<64x64xbf16>
    %91 = arith.truncf %89 : vector<1x64xf32> to vector<1x64xbf16>
    %cst_44 = arith.constant dense<0.000000e+00> : vector<1x64xf32>
    %92 = tpu.matmul %91, %90, %cst_44 {dimension_numbers = #tpu.dot_dimension_numbers<[1], [0], [0], [1], [0, 0, 1, 1], [], []>} : vector<1x64xbf16>, vector<64x64xbf16>, vector<1x64xf32> -> vector<1x64xf32>
    %c0_45 = arith.constant 0 : index
    %c0_46 = arith.constant 0 : index
    %93 = vector.load %arg10[%c0_45, %c0_46] : memref<1x64xf32, #tpu.memory_space<vmem>>, vector<1x64xf32>
    %94 = arith.addf %92, %93 : vector<1x64xf32>
    %95 = arith.truncf %94 : vector<1x64xf32> to vector<1x64xbf16>
    %96 = arith.truncf %4 : vector<16x64xf32> to vector<16x64xbf16>
    %cst_47 = arith.constant dense<0.000000e+00> : vector<1x16xf32>
    %97 = tpu.matmul %95, %96, %cst_47 {dimension_numbers = #tpu.dot_dimension_numbers<[1], [1], [0], [0], [0, 0, 1, 0], [], []>} : vector<1x64xbf16>, vector<16x64xbf16>, vector<1x16xf32> -> vector<1x16xf32>
    %cst_48 = arith.constant 5.000000e-01 : f32
    %98 = vector.broadcast %cst_48 : f32 to vector<1x16xf32>
    %99 = arith.cmpf ogt, %0, %98 : vector<1x16xf32>
    %cst_49 = arith.constant -1.000000e+30 : f32
    %100 = vector.broadcast %cst_49 : f32 to vector<1x16xf32>
    %101 = arith.select %99, %100, %97 : vector<1x16xi1>, vector<1x16xf32>
    %cst_50 = arith.constant dense<0xFF800000> : vector<1xf32>
    %102 = vector.multi_reduction <maximumf>, %101, %cst_50 [1] : vector<1x16xf32> to vector<1xf32>
    %103 = vector.shape_cast %102 : vector<1xf32> to vector<1x1xf32>
    %104 = vector.broadcast %103 : vector<1x1xf32> to vector<1x16xf32>
    %105 = arith.subf %101, %104 : vector<1x16xf32>
    %106 = math.exp %105 : vector<1x16xf32>
    %cst_51 = arith.constant dense<0.000000e+00> : vector<1xf32>
    %107 = vector.multi_reduction <add>, %106, %cst_51 [1] : vector<1x16xf32> to vector<1xf32>
    %108 = vector.shape_cast %107 : vector<1xf32> to vector<1x1xf32>
    %109 = tpu.reciprocal %108 {approx = true} : vector<1x1xf32> -> vector<1x1xf32>
    %110 = vector.broadcast %109 : vector<1x1xf32> to vector<1x16xf32>
    %111 = arith.mulf %106, %110 : vector<1x16xf32>
    %112 = vector.extract_strided_slice %49 {offsets = [0, 0], sizes = [1, 16], strides = [1, 1]} : vector<4x16xf32> to vector<1x16xf32>
    %113 = tpu.concatenate %112, %111 in 0 : vector<1x16xf32>, vector<1x16xf32> -> vector<2x16xf32>
    %c0_52 = arith.constant 0 : index
    %c0_53 = arith.constant 0 : index
    %c0_54 = arith.constant 0 : index
    %114 = vector.load %arg13[%c0_52, %c0_53, %c0_54] : memref<2x2x16xf32, #tpu.memory_space<vmem>>, vector<1x2x16xf32>
    %115 = vector.shape_cast %114 : vector<1x2x16xf32> to vector<2x16xf32>
    %116 = vector.shape_cast %113 : vector<2x16xf32> to vector<1x2x16xf32>
    tpu.vector_store %arg13[%c0_52, %c0_53, %c0_54], %116 {strides = array<i32>} : memref<2x2x16xf32, #tpu.memory_space<vmem>>, vector<1x2x16xf32>,
    %117 = vector.extract_strided_slice %52 {offsets = [1, 0], sizes = [1, 64], strides = [1, 1]} : vector<4x64xf32> to vector<1x64xf32>
    %118 = vector.extract_strided_slice %2 {offsets = [0, 0], sizes = [1, 64], strides = [1, 1]} : vector<3x64xf32> to vector<1x64xf32>
    %cst_55 = arith.constant dense<0.000000e+00> : vector<1x1xf32>
    %119 = tpu.matmul %117, %118, %cst_55 {dimension_numbers = #tpu.dot_dimension_numbers<[1], [1], [0], [0], [0, 0, 1, 0], [], []>} : vector<1x64xf32>, vector<1x64xf32>, vector<1x1xf32> -> vector<1x1xf32>
    %120 = vector.extract_strided_slice %52 {offsets = [2, 0], sizes = [1, 64], strides = [1, 1]} : vector<4x64xf32> to vector<1x64xf32>
    %121 = vector.extract_strided_slice %2 {offsets = [1, 0], sizes = [1, 64], strides = [1, 1]} : vector<3x64xf32> to vector<1x64xf32>
    %cst_56 = arith.constant dense<0.000000e+00> : vector<1x1xf32>
    %122 = tpu.matmul %120, %121, %cst_56 {dimension_numbers = #tpu.dot_dimension_numbers<[1], [1], [0], [0], [0, 0, 1, 0], [], []>} : vector<1x64xf32>, vector<1x64xf32>, vector<1x1xf32> -> vector<1x1xf32>
    %123 = vector.extract_strided_slice %52 {offsets = [3, 0], sizes = [1, 64], strides = [1, 1]} : vector<4x64xf32> to vector<1x64xf32>
    %124 = vector.extract_strided_slice %2 {offsets = [2, 0], sizes = [1, 64], strides = [1, 1]} : vector<3x64xf32> to vector<1x64xf32>
    %cst_57 = arith.constant dense<0.000000e+00> : vector<1x1xf32>
    %125 = tpu.matmul %123, %124, %cst_57 {dimension_numbers = #tpu.dot_dimension_numbers<[1], [1], [0], [0], [0, 0, 1, 0], [], []>} : vector<1x64xf32>, vector<1x64xf32>, vector<1x1xf32> -> vector<1x1xf32>
    %126 = tpu.concatenate %119, %122, %125 in 1 : vector<1x1xf32>, vector<1x1xf32>, vector<1x1xf32> -> vector<1x3xf32>
    %127 = arith.addf %126, %3 : vector<1x3xf32>
    %c0_58 = arith.constant 0 : index
    %c0_59 = arith.constant 0 : index
    %128 = vector.load %arg14[%c0_58, %c0_59] : memref<2x3xf32, #tpu.memory_space<vmem>>, vector<1x3xf32>
    tpu.vector_store %arg14[%c0_58, %c0_59], %127 {strides = array<i32>} : memref<2x3xf32, #tpu.memory_space<vmem>>, vector<1x3xf32>,
    %c16 = arith.constant 16 : index
    %c0_60 = arith.constant 0 : index
    %129 = vector.load %arg0[%c16, %c0_60] : memref<32x64xf32, #tpu.memory_space<vmem>>, vector<16x64xf32>
    %c1_61 = arith.constant 1 : index
    %c0_62 = arith.constant 0 : index
    %130 = vector.load %arg1[%c1_61, %c0_62] : memref<2x64xf32, #tpu.memory_space<vmem>>, vector<1x64xf32>
    %c0_63 = arith.constant 0 : index
    %c0_64 = arith.constant 0 : index
    %c0_65 = arith.constant 0 : index
    %131 = vector.load %arg3[%c0_63, %c0_64, %c0_65] : memref<4x64x64xbf16, #tpu.memory_space<vmem>>, vector<1x64x64xbf16>
    %132 = vector.shape_cast %131 : vector<1x64x64xbf16> to vector<64x64xbf16>
    %133 = arith.truncf %130 : vector<1x64xf32> to vector<1x64xbf16>
    %cst_66 = arith.constant dense<0.000000e+00> : vector<1x64xf32>
    %134 = tpu.matmul %133, %132, %cst_66 {dimension_numbers = #tpu.dot_dimension_numbers<[1], [0], [0], [1], [0, 0, 1, 1], [], []>} : vector<1x64xbf16>, vector<64x64xbf16>, vector<1x64xf32> -> vector<1x64xf32>
    %135 = vector.extract_strided_slice %1 {offsets = [0, 0], sizes = [1, 64], strides = [1, 1]} : vector<4x64xf32> to vector<1x64xf32>
    %136 = arith.addf %134, %135 : vector<1x64xf32>
    %c1_67 = arith.constant 1 : index
    %c0_68 = arith.constant 0 : index
    %c0_69 = arith.constant 0 : index
    %137 = vector.load %arg3[%c1_67, %c0_68, %c0_69] : memref<4x64x64xbf16, #tpu.memory_space<vmem>>, vector<1x64x64xbf16>
    %138 = vector.shape_cast %137 : vector<1x64x64xbf16> to vector<64x64xbf16>
    %139 = arith.truncf %130 : vector<1x64xf32> to vector<1x64xbf16>
    %cst_70 = arith.constant dense<0.000000e+00> : vector<1x64xf32>
    %140 = tpu.matmul %139, %138, %cst_70 {dimension_numbers = #tpu.dot_dimension_numbers<[1], [0], [0], [1], [0, 0, 1, 1], [], []>} : vector<1x64xbf16>, vector<64x64xbf16>, vector<1x64xf32> -> vector<1x64xf32>
    %141 = vector.extract_strided_slice %1 {offsets = [1, 0], sizes = [1, 64], strides = [1, 1]} : vector<4x64xf32> to vector<1x64xf32>
    %142 = arith.addf %140, %141 : vector<1x64xf32>
    %c2_71 = arith.constant 2 : index
    %c0_72 = arith.constant 0 : index
    %c0_73 = arith.constant 0 : index
    %143 = vector.load %arg3[%c2_71, %c0_72, %c0_73] : memref<4x64x64xbf16, #tpu.memory_space<vmem>>, vector<1x64x64xbf16>
    %144 = vector.shape_cast %143 : vector<1x64x64xbf16> to vector<64x64xbf16>
    %145 = arith.truncf %130 : vector<1x64xf32> to vector<1x64xbf16>
    %cst_74 = arith.constant dense<0.000000e+00> : vector<1x64xf32>
    %146 = tpu.matmul %145, %144, %cst_74 {dimension_numbers = #tpu.dot_dimension_numbers<[1], [0], [0], [1], [0, 0, 1, 1], [], []>} : vector<1x64xbf16>, vector<64x64xbf16>, vector<1x64xf32> -> vector<1x64xf32>
    %147 = vector.extract_strided_slice %1 {offsets = [2, 0], sizes = [1, 64], strides = [1, 1]} : vector<4x64xf32> to vector<1x64xf32>
    %148 = arith.addf %146, %147 : vector<1x64xf32>
    %c3_75 = arith.constant 3 : index
    %c0_76 = arith.constant 0 : index
    %c0_77 = arith.constant 0 : index
    %149 = vector.load %arg3[%c3_75, %c0_76, %c0_77] : memref<4x64x64xbf16, #tpu.memory_space<vmem>>, vector<1x64x64xbf16>
    %150 = vector.shape_cast %149 : vector<1x64x64xbf16> to vector<64x64xbf16>
    %151 = arith.truncf %130 : vector<1x64xf32> to vector<1x64xbf16>
    %cst_78 = arith.constant dense<0.000000e+00> : vector<1x64xf32>
    %152 = tpu.matmul %151, %150, %cst_78 {dimension_numbers = #tpu.dot_dimension_numbers<[1], [0], [0], [1], [0, 0, 1, 1], [], []>} : vector<1x64xbf16>, vector<64x64xbf16>, vector<1x64xf32> -> vector<1x64xf32>
    %153 = vector.extract_strided_slice %1 {offsets = [3, 0], sizes = [1, 64], strides = [1, 1]} : vector<4x64xf32> to vector<1x64xf32>
    %154 = arith.addf %152, %153 : vector<1x64xf32>
    %155 = tpu.concatenate %136, %142, %148, %154 in 0 : vector<1x64xf32>, vector<1x64xf32>, vector<1x64xf32>, vector<1x64xf32> -> vector<4x64xf32>
    %156 = arith.truncf %155 : vector<4x64xf32> to vector<4x64xbf16>
    %157 = arith.truncf %129 : vector<16x64xf32> to vector<16x64xbf16>
    %cst_79 = arith.constant dense<0.000000e+00> : vector<4x16xf32>
    %158 = tpu.matmul %156, %157, %cst_79 {dimension_numbers = #tpu.dot_dimension_numbers<[1], [1], [0], [0], [0, 0, 1, 0], [], []>} : vector<4x64xbf16>, vector<16x64xbf16>, vector<4x16xf32> -> vector<4x16xf32>
    %cst_80 = arith.constant 5.000000e-01 : f32
    %159 = vector.broadcast %cst_80 : f32 to vector<1x16xf32>
    %160 = arith.cmpf ogt, %0, %159 : vector<1x16xf32>
    %cst_81 = arith.constant -1.000000e+30 : f32
    %161 = vector.shape_cast %160 : vector<1x16xi1> to vector<1x16xi1>
    %162 = vector.broadcast %161 : vector<1x16xi1> to vector<4x16xi1>
    %163 = vector.broadcast %cst_81 : f32 to vector<4x16xf32>
    %164 = arith.select %162, %163, %158 : vector<4x16xi1>, vector<4x16xf32>
    %cst_82 = arith.constant dense<0xFF800000> : vector<4xf32>
    %165 = vector.multi_reduction <maximumf>, %164, %cst_82 [1] : vector<4x16xf32> to vector<4xf32>
    %166 = vector.shape_cast %165 : vector<4xf32> to vector<4x1xf32>
    %167 = vector.broadcast %166 : vector<4x1xf32> to vector<4x16xf32>
    %168 = arith.subf %164, %167 : vector<4x16xf32>
    %169 = math.exp %168 : vector<4x16xf32>
    %cst_83 = arith.constant dense<0.000000e+00> : vector<4xf32>
    %170 = vector.multi_reduction <add>, %169, %cst_83 [1] : vector<4x16xf32> to vector<4xf32>
    %171 = vector.shape_cast %170 : vector<4xf32> to vector<4x1xf32>
    %172 = tpu.reciprocal %171 {approx = true} : vector<4x1xf32> -> vector<4x1xf32>
    %173 = vector.broadcast %172 : vector<4x1xf32> to vector<4x16xf32>
    %174 = arith.mulf %169, %173 : vector<4x16xf32>
    %175 = arith.truncf %174 : vector<4x16xf32> to vector<4x16xbf16>
    %176 = arith.truncf %129 : vector<16x64xf32> to vector<16x64xbf16>
    %cst_84 = arith.constant dense<0.000000e+00> : vector<4x64xf32>
    %177 = tpu.matmul %175, %176, %cst_84 {dimension_numbers = #tpu.dot_dimension_numbers<[1], [0], [0], [1], [0, 0, 1, 1], [], []>} : vector<4x16xbf16>, vector<16x64xbf16>, vector<4x64xf32> -> vector<4x64xf32>
    %178 = vector.extract_strided_slice %177 {offsets = [0, 0], sizes = [1, 64], strides = [1, 1]} : vector<4x64xf32> to vector<1x64xf32>
    %c0_85 = arith.constant 0 : index
    %c0_86 = arith.constant 0 : index
    %179 = vector.load %arg5[%c0_85, %c0_86] : memref<64x192xbf16, #tpu.memory_space<vmem>>, vector<64x192xbf16>
    %180 = arith.truncf %178 : vector<1x64xf32> to vector<1x64xbf16>
    %cst_87 = arith.constant dense<0.000000e+00> : vector<1x192xf32>
    %181 = tpu.matmul %180, %179, %cst_87 {dimension_numbers = #tpu.dot_dimension_numbers<[1], [0], [0], [1], [0, 0, 1, 1], [], []>} : vector<1x64xbf16>, vector<64x192xbf16>, vector<1x192xf32> -> vector<1x192xf32>
    %c0_88 = arith.constant 0 : index
    %c0_89 = arith.constant 0 : index
    %182 = vector.load %arg6[%c0_88, %c0_89] : memref<1x192xf32, #tpu.memory_space<vmem>>, vector<1x192xf32>
    %183 = arith.addf %181, %182 : vector<1x192xf32>
    %c0_90 = arith.constant 0 : index
    %c0_91 = arith.constant 0 : index
    %184 = vector.load %arg7[%c0_90, %c0_91] : memref<64x192xbf16, #tpu.memory_space<vmem>>, vector<64x192xbf16>
    %185 = arith.truncf %130 : vector<1x64xf32> to vector<1x64xbf16>
    %cst_92 = arith.constant dense<0.000000e+00> : vector<1x192xf32>
    %186 = tpu.matmul %185, %184, %cst_92 {dimension_numbers = #tpu.dot_dimension_numbers<[1], [0], [0], [1], [0, 0, 1, 1], [], []>} : vector<1x64xbf16>, vector<64x192xbf16>, vector<1x192xf32> -> vector<1x192xf32>
    %c0_93 = arith.constant 0 : index
    %c0_94 = arith.constant 0 : index
    %187 = vector.load %arg8[%c0_93, %c0_94] : memref<1x192xf32, #tpu.memory_space<vmem>>, vector<1x192xf32>
    %188 = arith.addf %186, %187 : vector<1x192xf32>
    %189 = vector.extract_strided_slice %183 {offsets = [0, 0], sizes = [1, 64], strides = [1, 1]} : vector<1x192xf32> to vector<1x64xf32>
    %190 = vector.extract_strided_slice %188 {offsets = [0, 0], sizes = [1, 64], strides = [1, 1]} : vector<1x192xf32> to vector<1x64xf32>
    %191 = arith.addf %189, %190 : vector<1x64xf32>
    %192 = arith.negf %191 : vector<1x64xf32>
    %193 = math.exp %192 : vector<1x64xf32>
    %cst_95 = arith.constant 1.000000e+00 : f32
    %194 = vector.broadcast %cst_95 : f32 to vector<1x64xf32>
    %195 = arith.addf %194, %193 : vector<1x64xf32>
    %196 = arith.divf %194, %195 : vector<1x64xf32>
    %197 = vector.extract_strided_slice %183 {offsets = [0, 64], sizes = [1, 64], strides = [1, 1]} : vector<1x192xf32> to vector<1x64xf32>
    %198 = vector.extract_strided_slice %188 {offsets = [0, 64], sizes = [1, 64], strides = [1, 1]} : vector<1x192xf32> to vector<1x64xf32>
    %199 = arith.addf %197, %198 : vector<1x64xf32>
    %200 = arith.negf %199 : vector<1x64xf32>
    %201 = math.exp %200 : vector<1x64xf32>
    %cst_96 = arith.constant 1.000000e+00 : f32
    %202 = vector.broadcast %cst_96 : f32 to vector<1x64xf32>
    %203 = arith.addf %202, %201 : vector<1x64xf32>
    %204 = arith.divf %202, %203 : vector<1x64xf32>
    %205 = vector.extract_strided_slice %183 {offsets = [0, 128], sizes = [1, 64], strides = [1, 1]} : vector<1x192xf32> to vector<1x64xf32>
    %206 = vector.extract_strided_slice %188 {offsets = [0, 128], sizes = [1, 64], strides = [1, 1]} : vector<1x192xf32> to vector<1x64xf32>
    %207 = arith.mulf %196, %206 : vector<1x64xf32>
    %208 = arith.addf %205, %207 : vector<1x64xf32>
    %209 = math.tanh %208 : vector<1x64xf32>
    %cst_97 = arith.constant 1.000000e+00 : f32
    %210 = vector.broadcast %cst_97 : f32 to vector<1x64xf32>
    %211 = arith.subf %210, %204 : vector<1x64xf32>
    %212 = arith.mulf %211, %209 : vector<1x64xf32>
    %213 = arith.mulf %204, %130 : vector<1x64xf32>
    %214 = arith.addf %212, %213 : vector<1x64xf32>
    %c0_98 = arith.constant 0 : index
    %c0_99 = arith.constant 0 : index
    %215 = vector.load %arg9[%c0_98, %c0_99] : memref<64x64xbf16, #tpu.memory_space<vmem>>, vector<64x64xbf16>
    %216 = arith.truncf %214 : vector<1x64xf32> to vector<1x64xbf16>
    %cst_100 = arith.constant dense<0.000000e+00> : vector<1x64xf32>
    %217 = tpu.matmul %216, %215, %cst_100 {dimension_numbers = #tpu.dot_dimension_numbers<[1], [0], [0], [1], [0, 0, 1, 1], [], []>} : vector<1x64xbf16>, vector<64x64xbf16>, vector<1x64xf32> -> vector<1x64xf32>
    %c0_101 = arith.constant 0 : index
    %c0_102 = arith.constant 0 : index
    %218 = vector.load %arg10[%c0_101, %c0_102] : memref<1x64xf32, #tpu.memory_space<vmem>>, vector<1x64xf32>
    %219 = arith.addf %217, %218 : vector<1x64xf32>
    %220 = arith.truncf %219 : vector<1x64xf32> to vector<1x64xbf16>
    %221 = arith.truncf %129 : vector<16x64xf32> to vector<16x64xbf16>
    %cst_103 = arith.constant dense<0.000000e+00> : vector<1x16xf32>
    %222 = tpu.matmul %220, %221, %cst_103 {dimension_numbers = #tpu.dot_dimension_numbers<[1], [1], [0], [0], [0, 0, 1, 0], [], []>} : vector<1x64xbf16>, vector<16x64xbf16>, vector<1x16xf32> -> vector<1x16xf32>
    %cst_104 = arith.constant 5.000000e-01 : f32
    %223 = vector.broadcast %cst_104 : f32 to vector<1x16xf32>
    %224 = arith.cmpf ogt, %0, %223 : vector<1x16xf32>
    %cst_105 = arith.constant -1.000000e+30 : f32
    %225 = vector.broadcast %cst_105 : f32 to vector<1x16xf32>
    %226 = arith.select %224, %225, %222 : vector<1x16xi1>, vector<1x16xf32>
    %cst_106 = arith.constant dense<0xFF800000> : vector<1xf32>
    %227 = vector.multi_reduction <maximumf>, %226, %cst_106 [1] : vector<1x16xf32> to vector<1xf32>
    %228 = vector.shape_cast %227 : vector<1xf32> to vector<1x1xf32>
    %229 = vector.broadcast %228 : vector<1x1xf32> to vector<1x16xf32>
    %230 = arith.subf %226, %229 : vector<1x16xf32>
    %231 = math.exp %230 : vector<1x16xf32>
    %cst_107 = arith.constant dense<0.000000e+00> : vector<1xf32>
    %232 = vector.multi_reduction <add>, %231, %cst_107 [1] : vector<1x16xf32> to vector<1xf32>
    %233 = vector.shape_cast %232 : vector<1xf32> to vector<1x1xf32>
    %234 = tpu.reciprocal %233 {approx = true} : vector<1x1xf32> -> vector<1x1xf32>
    %235 = vector.broadcast %234 : vector<1x1xf32> to vector<1x16xf32>
    %236 = arith.mulf %231, %235 : vector<1x16xf32>
    %237 = vector.extract_strided_slice %174 {offsets = [0, 0], sizes = [1, 16], strides = [1, 1]} : vector<4x16xf32> to vector<1x16xf32>
    %238 = tpu.concatenate %237, %236 in 0 : vector<1x16xf32>, vector<1x16xf32> -> vector<2x16xf32>
    %c1_108 = arith.constant 1 : index
    %c0_109 = arith.constant 0 : index
    %c0_110 = arith.constant 0 : index
    %239 = vector.load %arg13[%c1_108, %c0_109, %c0_110] : memref<2x2x16xf32, #tpu.memory_space<vmem>>, vector<1x2x16xf32>
    %240 = vector.shape_cast %239 : vector<1x2x16xf32> to vector<2x16xf32>
    %241 = vector.shape_cast %238 : vector<2x16xf32> to vector<1x2x16xf32>
    tpu.vector_store %arg13[%c1_108, %c0_109, %c0_110], %241 {strides = array<i32>} : memref<2x2x16xf32, #tpu.memory_space<vmem>>, vector<1x2x16xf32>,
    %242 = vector.extract_strided_slice %177 {offsets = [1, 0], sizes = [1, 64], strides = [1, 1]} : vector<4x64xf32> to vector<1x64xf32>
    %243 = vector.extract_strided_slice %2 {offsets = [0, 0], sizes = [1, 64], strides = [1, 1]} : vector<3x64xf32> to vector<1x64xf32>
    %cst_111 = arith.constant dense<0.000000e+00> : vector<1x1xf32>
    %244 = tpu.matmul %242, %243, %cst_111 {dimension_numbers = #tpu.dot_dimension_numbers<[1], [1], [0], [0], [0, 0, 1, 0], [], []>} : vector<1x64xf32>, vector<1x64xf32>, vector<1x1xf32> -> vector<1x1xf32>
    %245 = vector.extract_strided_slice %177 {offsets = [2, 0], sizes = [1, 64], strides = [1, 1]} : vector<4x64xf32> to vector<1x64xf32>
    %246 = vector.extract_strided_slice %2 {offsets = [1, 0], sizes = [1, 64], strides = [1, 1]} : vector<3x64xf32> to vector<1x64xf32>
    %cst_112 = arith.constant dense<0.000000e+00> : vector<1x1xf32>
    %247 = tpu.matmul %245, %246, %cst_112 {dimension_numbers = #tpu.dot_dimension_numbers<[1], [1], [0], [0], [0, 0, 1, 0], [], []>} : vector<1x64xf32>, vector<1x64xf32>, vector<1x1xf32> -> vector<1x1xf32>
    %248 = vector.extract_strided_slice %177 {offsets = [3, 0], sizes = [1, 64], strides = [1, 1]} : vector<4x64xf32> to vector<1x64xf32>
    %249 = vector.extract_strided_slice %2 {offsets = [2, 0], sizes = [1, 64], strides = [1, 1]} : vector<3x64xf32> to vector<1x64xf32>
    %cst_113 = arith.constant dense<0.000000e+00> : vector<1x1xf32>
    %250 = tpu.matmul %248, %249, %cst_113 {dimension_numbers = #tpu.dot_dimension_numbers<[1], [1], [0], [0], [0, 0, 1, 0], [], []>} : vector<1x64xf32>, vector<1x64xf32>, vector<1x1xf32> -> vector<1x1xf32>
    %251 = tpu.concatenate %244, %247, %250 in 1 : vector<1x1xf32>, vector<1x1xf32>, vector<1x1xf32> -> vector<1x3xf32>
    %252 = arith.addf %251, %3 : vector<1x3xf32>
    %c1_114 = arith.constant 1 : index
    %c0_115 = arith.constant 0 : index
    %253 = vector.load %arg14[%c1_114, %c0_115] : memref<2x3xf32, #tpu.memory_space<vmem>>, vector<1x3xf32>
    tpu.vector_store %arg14[%c1_114, %c0_115], %252 {strides = array<i32>} : memref<2x3xf32, #tpu.memory_space<vmem>>, vector<1x3xf32>,
    return
  }
}

</mosaic_0001>

<bundles_post_ra>
// kernel: sdnet_forward.4
= control target key start
LH: loop header
LB: loop body
LE: loop exit
PB: predicated region body
PF: predicated region fallthrough
CT: control target
= control target key end

     0   :  { %v1566_v0 = vmov 0.0   ;;  %vm1567_vm0 = vmmov 0   ;;  %vm65_vm1 = vcmask 261120   ;;  %v222_v29 = vlaneseq  ;;  %s1569_s20 = smov 64   ;;  %s1570_s25 = smov 72   ;;  %s1986_s6 = inlined_call_operand.vmem [shape: bf16[32,32], index: 6, kind: input, shape index: {}]   ;;  %s1987_s4 = inlined_call_operand.vmem [shape: f32[16,32], index: 4, kind: input, shape index: {}]   ;;  %s1988_s0 = inlined_call_operand.vmem [shape: f32[16,32], index: 0, kind: input, shape index: {}]   ;;  %s1989_s7 = inlined_call_operand.vmem [shape: f32[1,32], index: 7, kind: input, shape index: {}]   ;;  %s1990_s5 = inlined_call_operand.vmem [shape: f32[2,8], index: 5, kind: input, shape index: {}]   ;;  %s1991_s1 = inlined_call_operand.vmem [shape: f32[16,8], index: 1, kind: input, shape index: {}]   ;;  %s1992_s2 = inlined_call_operand.vmem [shape: f32[16,8], index: 2, kind: input, shape index: {}]   ;;  %s1993_s8 = inlined_call_operand.vmem [shape: bf16[3,84,32], index: 8, kind: input, shape index: {}]   ;;  %s1994_s3 = inlined_call_operand.vmem [shape: f32[32,4], index: 3, kind: input, shape index: {}]   ;;  %s1995_s10 = inlined_call_operand.vmem [shape: bf16[3,32,32], index: 10, kind: input, shape index: {}]   ;;  %s1996_s9 = inlined_call_operand.vmem [shape: f32[1,32], index: 9, kind: input, shape index: {}]   ;;  %s1997_s11 = inlined_call_operand.vmem [shape: f32[1,32], index: 11, kind: input, shape index: {}]   ;;  %s1998_s12 = inlined_call_operand.vmem [shape: f32[32,64], index: 12, kind: output, shape index: {}]  }
   0x1   :  { %1364 = vmatprep.subr.bf16.mxu1 %v1566_v0  ;;  %v1524_v1 = vld [vmem:[%s1986_s6] sm:$0xff]   ;;  %1356 = vmatprep.subr.bf16.mxu0 %v1566_v0  ;;  %v1525_v2 = vld [vmem:[%s1986_s6 + $0x8] sm:$0xff]   ;;  %v1568_v33 = vmov 0   ;;  %vm229_vm5 = vcmask 64512   ;;  %vm257_vm7 = vcmask 1043456   ;;  %vm669_vm8 = vcmask 1041408  }
   0x2   :  { %1368 = vmatprep.mubr.msk.bf16.mxu1 %vm1567_vm0, %v1566_v0  ;;  %1360 = vmatprep.mubr.msk.bf16.mxu0 %vm1567_vm0, %v1566_v0  ;;  %v1653_v3 = vld [vmem:[%s1987_s4] sm:$0xff]  ;;  %v1658_v4 = vld [vmem:[%s1987_s4 + $0x8] sm:$0xff]  ;;  %v1697_v31 = vshrl.u32 %v222_v29, 7  ;;  %vm338_vm9 = vcmask 523264   ;;  %vm341_vm10 = vcmask 588800   ;;  %vm344_vm11 = vcmask 654336  }
   0x3   :  { %1365 = vmatpush3.bf16.msra.mxu1 %v1524_v1  ;;  %1357 = vmatpush3.bf16.msra.mxu0 %v1524_v1  ;;  %v1663_v5 = vld [vmem:[%s1988_s0] sm:$0xff]  ;;  %v1670_v6 = vld [vmem:[%s1988_s0 + $0x8] sm:$0xff]  ;;  %v123_v7 = vpack.c.bf16 %v1658_v4, %v1653_v3  ;;  %vm662_vm15 = vcmask 687104  }
   0x4   :  { %1366 = vmatprep.subr.bf16.mxu1 %v1566_v0  ;;  %1358 = vmatprep.subr.bf16.mxu0 %v1566_v0  ;;  %v52_v8 = vpack.c.bf16 %v1670_v6, %v1663_v5  ;;  %v1232_v11 = vld [vmem:[%s1989_s7] ss:$0 sm:$0xff]  ;;  %v224_v32 = vsub.s32 0, %v1697_v31  ;;  %v347_v35 = vld [vmem:[%s1990_s5 + $0x1] sm:$0x1]  ;;  %vm560_vm12 = vcmp.lt.s32.totalorder %v1697_v31, 1 }
   0x5   :  { %v170_v30 = vld [vmem:[%s1990_s5] sm:$0x1]  ;;  %vm393_vm3 = vcmp.gt.f32.partialorder %v347_v35, 0.5  ;;  %vm585_vm13 = vcmp.lt.s32.totalorder %v1697_v31, 7 }
   0x6   :  { %vm220_vm2 = vcmp.gt.f32.partialorder %v170_v30, 0.5  ;;  %v394_v37 = vsel %vm393_vm3, 1, %v1568_v33 }
   0x7   :  { %1367 = vmatpush3.bf16.msra.mxu1 %v1525_v2  ;;  %1359 = vmatpush3.bf16.msra.mxu0 %v1525_v2  ;;  %v221_v34 = vsel %vm220_vm2, 1, %v1568_v33  ;;  %v398_v43 = vrot.slane %v394_v37, %v224_v32 }
   0x8   :  { %1372 = vmatprep.subr.bf16.mxu0 %v1566_v0  ;;  %1378 = vmatprep.subr.bf16.mxu1 %v1566_v0  ;;  %v225_v36 = vrot.slane %v221_v34, %v224_v32  ;;  %v45_v34 = vld [vmem:[%s1991_s1 + $0x8] sm:$0xff] }
   0x9   :  { %vm399_vm6 = vcmp.eq.s32.totalorder %v398_v43, 1  ;;  %v1531_v43 = vld [vmem:[%s1993_s8 + $0x10] sm:$0xff]  }
   0xa   :  { %1369 = vmatmul.mubr.msk.bf16.vlgmr.msra.gmra.mrb[0].mxu1 %vm65_vm1, %v123_v7  ;;  %1361 = vmatmul.mubr.msk.bf16.vlgmr.msra.gmra.mrb[0].mxu0 %vm65_vm1, %v52_v8  ;;  %vm226_vm4 = vcmp.eq.s32.totalorder %v225_v36, 1  ;;  %v47_v36 = vld [vmem:[%s1992_s2 + $0x8] sm:$0xff] }
   0xb   :  { %1374 = vmatprep.mubr.msk.bf16.mxu0 %vm1567_vm0, %v1566_v0  ;;  %1380 = vmatprep.mubr.msk.bf16.mxu1 %vm1567_vm0, %v1566_v0 }
  0xdd   :  { %v161_v9 = vpop.f32.mrb[0].mxu1  ;;  %v103_v10 = vpop.f32.mrb[0].mxu0 }
  0xde   :  { %v168_v12 = vmax.f32 %v161_v9, 0.0  ;;  %v1370_v13 = vpop.f32.mrb[1].mxu1  ;;  %v110_v14 = vmax.f32 %v103_v10, 0.0  ;;  %v1362_v15 = vpop.f32.mrb[1].mxu0 }
  0xdf   :  { %v164_v16 = vpop.f32.mrb[2].mxu1  ;;  %v106_v17 = vpop.f32.mrb[2].mxu0 }
  0xe0   :  { %v172_v18 = vpack.c.bf16 %v168_v12, %v168_v12  ;;  %v119_v19 = vmul.f32 %v1232_v11, %v110_v14  ;;  %v1371_v20 = vpop.f32.mrb[3].mxu1  ;;  %v111_v21 = vmax.f32 %v106_v17, 0.0  ;;  %v1363_v22 = vpop.f32.mrb[3].mxu0  ;;  %v169_v24 = vmax.f32 %v164_v16, 0.0 }
  0xe1   :  { %v253_v16 = vpack.c.bf16 %v1653_v3, %v1653_v3 }
  0xe2   :  { %v177_v23 = vsel %vm65_vm1, %v172_v18, 0  ;;  %v120_v25 = vmul.f32 %v1232_v11, %v111_v21  ;;  %v348_v27 = vpack.c.bf16 %v169_v24, %v169_v24 }
  0xe3   :  { %1373 = vmatpush3.bf16.xpose.msra.mxu0 %v177_v23  ;;  %v259_v17 = vsel %vm257_vm7, %v253_v16, 0  ;;  %v425_v23 = vpack.c.bf16 %v1658_v4, %v1658_v4  ;;  %v44_v4 = vld [vmem:[%s1991_s1] sm:$0xff] }
  0xe4   :  { %v171_v26 = vpack.c.bf16 %v120_v25, %v119_v19  ;;  %1384 = vmatprep.subr.bf16.mxu0 %v1566_v0  ;;  %v350_v28 = vsel %vm65_vm1, %v348_v27, 0  ;;  %1379 = vmatpush3.bf16.msra.mxu1 %v259_v17  ;;  %v1494_v35 = vpack.i.bf16 %v45_v34, %v44_v4 }
  0xe5   :  { %1390 = vmatprep.subr.bf16.mxu1 %v1566_v0  ;;  %v430_v27 = vsel %vm257_vm7, %v425_v23, 0 }
  0xea   :  { %1375 = vmatmul.mubr.msk.bf16.vlgmr.msra.gmra.mrb[4].mxu0 %vm65_vm1, %v171_v26 }
  0xeb   :  { %1385 = vmatpush3.bf16.xpose.msra.mxu0 %v350_v28  ;;  %1386 = vmatprep.mubr.msk.bf16.mxu0 %vm1567_vm0, %v1566_v0 }
  0xf2   :  { %1387 = vmatmul.mubr.msk.bf16.vlgmr.msra.gmra.mrb[8].mxu0 %vm65_vm1, %v171_v26 }
 0x1bd   :  { %v213_v38 = vpop.f32.mrb[4].mxu0 }
 0x1be   :  { %v227_v39 = vsel %vm226_vm4, -1e+30, %v213_v38  ;;  %v1376_v40 = vpop.f32.mrb[5].mxu0  ;;  %v1526_v38 = vld [vmem:[%s1993_s8 + $0x2c] sm:$0xff]  }
 0x1bf   :  { %v216_v41 = vpop.f32.mrb[6].mxu0  ;;  %v230_v42 = vsel %vm229_vm5, %v227_v39, -inf  ;;  %v1528_v40 = vld [vmem:[%s1993_s8 + $0x34] sm:$0xff]  }
 0x1c0   :  { %v228_v44 = vsel %vm226_vm4, -1e+30, %v216_v41  ;;  %231 = vmax.xlane.f32.xlu0 %v230_v42  ;;  %v1377_v45 = vpop.f32.mrb[7].mxu0  ;;  %v1529_v41 = vld [vmem:[%s1993_s8 + $0x8] sm:$0xff]   ;;  %v1530_v42 = vld [vmem:[%s1993_s8 + $0x3c] sm:$0xff]  }
 0x1c1   :  { %v233_v46 = vsel %vm229_vm5, %v228_v44, -inf  ;;  %v1533_v45 = vld [vmem:[%s1993_s8 + $0x18] sm:$0xff]  }
 0x1c4   :  { %234 = vmax.xlane.f32.xlu0 %v233_v46 }
 0x1c5   :  { %v386_v47 = vpop.f32.mrb[8].mxu0 }
 0x1c6   :  { %v400_v48 = vsel %vm399_vm6, -1e+30, %v386_v47  ;;  %v1388_v49 = vpop.f32.mrb[9].mxu0 }
 0x1c7   :  { %v389_v50 = vpop.f32.mrb[10].mxu0  ;;  %v402_v51 = vsel %vm229_vm5, %v400_v48, -inf }
 0x1c8   :  { %v401_v52 = vsel %vm399_vm6, -1e+30, %v389_v50  ;;  %403 = vmax.xlane.f32.xlu1 %v402_v51  ;;  %v1389_v53 = vpop.f32.mrb[11].mxu0  ;;  %v1535_v51 = vld [vmem:[%s1993_s8 + $0x20] sm:$0xff]  }
 0x1c9   :  { %v405_v54 = vsel %vm229_vm5, %v401_v52, -inf }
 0x1cc   :  { %406 = vmax.xlane.f32.xlu1 %v405_v54  ;;  %v303_v54 = vld [vmem:[%s1994_s3 + $0x8] sm:$0xff] }
 0x24d   :  { %v232_v55 = vpop.xlane.xlu0 %231 }
 0x24e   :  { %v236_v56 = vsub.f32 %v227_v39, %v232_v55  ;;  %v1527_v39 = vld [vmem:[%s1993_s8] sm:$0xff]   ;;  %v473_v55 = vld [vmem:[%s1994_s3 + $0x10] sm:$0xff] }
 0x24f   :  { %1412 = vmatprep.subr.bf16.mxu0 %v1527_v39 }
 0x250   :  { %v238_v57 = vmul.f32 1.442695, %v236_v56  ;;  %1413 = vmatpush3.bf16.msra.mxu0 %v1527_v39 }
 0x251   :  { %v235_v58 = vpop.xlane.xlu0 %234  ;;  %1414 = vmatprep.subr.bf16.mxu0 %v1529_v41 }
 0x252   :  { %1550 = vpow2.f32 %v238_v57  ;;  %v237_v59 = vsub.f32 %v228_v44, %v235_v58  ;;  %v1532_v44 = vld [vmem:[%s1993_s8 + $0x44] sm:$0xff]  }
 0x254   :  { %v240_v60 = vmul.f32 1.442695, %v237_v59  ;;  %1415 = vmatpush3.bf16.msra.mxu0 %v1529_v41  ;;  %v1537_v59 = vld [vmem:[%s1993_s8 + $0x28] ss:$0 sps:$4 sm:$0x33]  }
 0x255   :  { %v404_v61 = vpop.xlane.xlu1 %403  ;;  %1416 = vmatprep.subr.bf16.mxu0 %v1531_v43 }
 0x256   :  { %1552 = vpow2.f32 %v240_v60  ;;  %v408_v62 = vsub.f32 %v400_v48, %v404_v61  ;;  %v1534_v48 = vld [vmem:[%s1993_s8 + $0x4c] sm:$0xff]   ;;  %v302_v61 = vld [vmem:[%s1994_s3] sm:$0xff] }
 0x258   :  { %v410_v63 = vmul.f32 1.442695, %v408_v62  ;;  %1417 = vmatpush3.bf16.msra.mxu0 %v1531_v43  ;;  %v474_v62 = vld [vmem:[%s1994_s3 + $0x18] sm:$0xff]  ;;  %s1572_s3 = smov 80  }
 0x259   :  { %v407_v1 = vpop.xlane.xlu1 %406  ;;  %1418 = vmatprep.subr.bf16.mxu0 %v1533_v45 }
 0x25a   :  { %1554 = vpow2.f32 %v410_v63  ;;  %v409_v2 = vsub.f32 %v401_v52, %v407_v1  ;;  %v1536_v52 = vld [vmem:[%s1993_s8 + $0x54] ss:$0 sps:$4 sm:$0x33]  }
 0x25b   :  { %v671_v56 = vsel %vm669_vm8, %v1536_v52, 0 }
 0x25c   :  { %v1551_v7 = vpop.eup %1550  ;;  %v412_v8 = vmul.f32 1.442695, %v409_v2  ;;  %1419 = vmatpush3.bf16.msra.mxu0 %v1533_v45  ;;  %v1519_v2 = vpack.i.bf16 %v473_v55, %v303_v54 }
 0x25d   :  { %v242_v9 = vsel %vm229_vm5, %v1551_v7, 0.0  ;;  %1420 = vmatprep.subr.bf16.mxu0 %v1535_v51 }
 0x25e   :  { %1556 = vpow2.f32 %v412_v8  ;;  %243 = vadd.xlane.f32.xlu0 %v242_v9  ;;  %v1514_v8 = vpack.i.bf16 %v474_v62, %v302_v61  ;;  %v1791_v9 = vld [vmem:[%s1993_s8 + $0x58] sm:$0xff]  }
 0x260   :  { %v1553_v10 = vpop.eup %1552  ;;  %1421 = vmatpush3.bf16.msra.mxu0 %v1535_v51 }
 0x261   :  { %v245_v11 = vsel %vm229_vm5, %v1553_v10, 0.0  ;;  %1485 = vmatprep.subr.msk.bf16.mxu0 %vm669_vm8, %v1537_v59 }
 0x262   :  { %246 = vadd.xlane.f32.xlu1 %v245_v11 }
 0x264   :  { %v1555_v12 = vpop.eup %1554 }
 0x265   :  { %v414_v13 = vsel %vm229_vm5, %v1555_v12, 0.0 }
 0x266   :  { %415 = vadd.xlane.f32.xlu0 %v414_v13  ;;  %v501_v13 = vadd.s32 8, %v1697_v31 }
 0x268   :  { %v1557_v14 = vpop.eup %1556  ;;  %v515_v23 = vand.u32 15, %v501_v13  ;;  %v1541_v13 = vld [vmem:[%s1993_s8 + $0x70] sm:$0xff]  }
 0x269   :  { %v417_v15 = vsel %vm229_vm5, %v1557_v14, 0.0 }
 0x26a   :  { %418 = vadd.xlane.f32.xlu1 %v417_v15 }
 0x27b   :  { %1495 = vrot.lane.b32.xlu1 %v1494_v35, %s1569_s20 }
 0x2eb   :  { %v244_v18 = vpop.xlane.xlu0 %243 }
 0x2ec   :  { %1558 = vrcp.f32 %v244_v18 }
 0x2ef   :  { %v247_v19 = vpop.xlane.xlu1 %246 }
 0x2f0   :  { %1560 = vrcp.f32 %v247_v19 }
 0x2f3   :  { %v416_v20 = vpop.xlane.xlu0 %415 }
 0x2f4   :  { %1562 = vrcp.f32 %v416_v20 }
 0x2f6   :  { %v1559_v22 = vpop.eup %1558 }
 0x2f7   :  { %v419_v21 = vpop.xlane.xlu1 %418  ;;  %v250_v3 = vmul.f32 %v1559_v22, %v1551_v7  ;;  %v762_v7 = vsel %vm669_vm8, %v1537_v59, 0 }
 0x2f8   :  { %1564 = vrcp.f32 %v419_v21  ;;  %1423 = vmatpush3.bf16.msra.mxu0 %v762_v7 }
 0x2f9   :  { %1428 = vmatprep.subr.bf16.mxu0 %v1791_v9 }
 0x2fa   :  { %v1561_v24 = vpop.eup %1560 }
 0x2fb   :  { %v251_v25 = vmul.f32 %v1561_v24, %v1553_v10  ;;  %v1496_v10 = vpop.permute.xlu1 %1495 }
 0x2fc   :  { %v1497_v15 = vunpack.i.l.bf16 %v1496_v10 }
 0x2fd   :  { %v252_v26 = vpack.c.bf16 %v251_v25, %v250_v3 }
 0x2fe   :  { %v1563_v28 = vpop.eup %1562 }
 0x2ff   :  { %1381 = vmatmul.mubr.msk.bf16.vlgmr.msra.gmra.mrb[4].mxu1 %vm229_vm5, %v252_v26  ;;  %v422_v30 = vmul.f32 %v1563_v28, %v1555_v12  ;;  %v502_v12 = vadd.s32 16, %v1697_v31 }
 0x300   :  { %1391 = vmatpush3.bf16.msra.mxu1 %v430_v27  ;;  %1392 = vmatprep.mubr.msk.bf16.mxu1 %vm1567_vm0, %v1566_v0  ;;  %v46_v0 = vld [vmem:[%s1992_s2] sm:$0xff]  ;;  %s1571_s2 = smov 32   ;;  %vm1821_vm0 = vcmp.eq.s32.totalorder %v515_v23, 15 }
 0x301   :  { %v1499_v37 = vpack.i.bf16 %v47_v36, %v46_v0  ;;  %1396 = vmatprep.subr.bf16.mxu1 %v1526_v38  ;;  %v522_v18 = vand.u32 15, %v502_v12  ;;  %v1540_v12 = vld [vmem:[%s1993_s8 + $0x68] sm:$0xff]  }
 0x302   :  { %v1565_v29 = vpop.eup %1564 }
 0x303   :  { %v423_v32 = vmul.f32 %v1565_v29, %v1557_v14  ;;  %1500 = vrot.lane.b32.xlu1 %v1499_v37, %s1570_s25  ;;  %v1498_v14 = vunpack.i.h.bf16 %v1496_v10  ;;  %vm1805_vm14 = vcmp.eq.s32.totalorder %v522_v18, 0  ;;  %v1539_v10 = vld [vmem:[%s1993_s8 + $0x60] sm:$0xff]  }
 0x305   :  { %v424_v33 = vpack.c.bf16 %v423_v32, %v422_v30  ;;  %v508_v30 = vand.u32 15, %v1697_v31 }
 0x307   :  { %1393 = vmatmul.mubr.msk.bf16.vlgmr.msra.gmra.mrb[8].mxu1 %vm229_vm5, %v424_v33  ;;  %vm1829_vm2 = vcmp.eq.s32.totalorder %v508_v30, 0 }
 0x308   :  { %1397 = vmatpush3.bf16.msra.mxu1 %v1526_v38 }
 0x309   :  { %1398 = vmatprep.subr.bf16.mxu1 %v1528_v40 }
 0x30c   :  { %1399 = vmatpush3.bf16.msra.mxu1 %v1528_v40 }
 0x30d   :  { %1400 = vmatprep.subr.bf16.mxu1 %v1530_v42 }
 0x310   :  { %1401 = vmatpush3.bf16.msra.mxu1 %v1530_v42 }
 0x311   :  { %1402 = vmatprep.subr.bf16.mxu1 %v1532_v44 }
 0x314   :  { %1403 = vmatpush3.bf16.msra.mxu1 %v1532_v44 }
 0x315   :  { %1404 = vmatprep.subr.bf16.mxu1 %v1534_v48 }
 0x318   :  { %1405 = vmatpush3.bf16.msra.mxu1 %v1534_v48 }
 0x319   :  { %1484 = vmatprep.subr.msk.bf16.mxu1 %vm669_vm8, %v1536_v52 }
 0x31c   :  { %1407 = vmatpush3.bf16.msra.mxu1 %v671_v56 }
 0x375   :  { %v1501_v11 = vpop.permute.xlu1 %1500 }
 0x376   :  { %v1503_v16 = vunpack.i.h.bf16 %v1501_v11  ;;  %v1502_v19 = vunpack.i.l.bf16 %v1501_v11 }
 0x3d2   :  { %v295_v46 = vpop.f32.mrb[4].mxu1 }
 0x3d3   :  { %v1382_v47 = vpop.f32.mrb[5].mxu1 }
 0x3d4   :  { %v298_v49 = vpop.f32.mrb[6].mxu1 }
 0x3d5   :  { %v1383_v50 = vpop.f32.mrb[7].mxu1 }
 0x3da   :  { %v466_v53 = vpop.f32.mrb[8].mxu1 }
 0x3db   :  { %v1504_v57 = vpack.i.bf16 %v466_v53, %v298_v49  ;;  %v1394_v58 = vpop.f32.mrb[9].mxu1 }
 0x3dc   :  { %v469_v60 = vpop.f32.mrb[10].mxu1 }
 0x3dd   :  { %v1509_v63 = vpack.i.bf16 %v469_v60, %v295_v46  ;;  %1505 = vrot.lane.b32.xlu1 %v1504_v57, %s1571_s2  ;;  %v1395_v1 = vpop.f32.mrb[11].mxu1 }
 0x3df   :  { %1510 = vrot.lane.b32.xlu0 %v1509_v63, %s1571_s2 }
 0x3e1   :  { %1520 = vrot.lane.b32.xlu1 %v1519_v2, %s1572_s3 }
 0x3e3   :  { %1515 = vrot.lane.b32.xlu0 %v1514_v8, %s1572_s3 }
 0x44f   :  { %v1506_v17 = vpop.permute.xlu1 %1505 }
 0x450   :  { %v1508_v20 = vunpack.i.h.bf16 %v1506_v17  ;;  %v1507_v21 = vunpack.i.l.bf16 %v1506_v17  ;;  %v1543_v17 = vld [vmem:[%s1993_s8 + $0x80] ss:$0 sps:$4 sm:$0x33]  }
 0x451   :  { %v1511_v22 = vpop.permute.xlu0 %1510 }
 0x452   :  { %v491_v24 = vsel %vm65_vm1, %v1663_v5, %v1508_v20  ;;  %v337_v3 = vsel %vm65_vm1, %v1670_v6, %v1507_v21  ;;  %v1513_v25 = vunpack.i.h.bf16 %v1511_v22  ;;  %v1512_v26 = vunpack.i.l.bf16 %v1511_v22 }
 0x453   :  { %v340_v27 = vsel %vm338_vm9, %v337_v3, %v1498_v14  ;;  %v493_v28 = vsel %vm338_vm9, %v491_v24, %v1497_v15  ;;  %v1521_v29 = vpop.permute.xlu1 %1520  ;;  %v867_v20 = vsel %vm669_vm8, %v1543_v17, 0  ;;  %v1544_v24 = vld [vmem:[%s1995_s10 + $0x10] sm:$0xff]   ;;  %v1545_v3 = vld [vmem:[%s1995_s10 + $0x18] sm:$0xff]  }
 0x454   :  { %v492_v33 = vsel %vm65_vm1, %v1670_v6, %v1513_v25  ;;  %v336_v4 = vsel %vm65_vm1, %v1663_v5, %v1512_v26  ;;  %v1523_v34 = vunpack.i.h.bf16 %v1521_v29  ;;  %v1522_v35 = vunpack.i.l.bf16 %v1521_v29  ;;  %1444 = vmatprep.subr.bf16.mxu1 %v1544_v24  ;;  %v1546_v25 = vld [vmem:[%s1995_s10] sm:$0xff]  }
 0x455   :  { %v339_v0 = vsel %vm338_vm9, %v336_v4, %v1497_v15  ;;  %v494_v36 = vsel %vm338_vm9, %v492_v33, %v1498_v14  ;;  %v343_v37 = vsel %vm341_vm10, %v340_v27, %v1503_v16  ;;  %v495_v38 = vsel %vm341_vm10, %v493_v28, %v1502_v19  ;;  %v1516_v39 = vpop.permute.xlu0 %1515  ;;  %v1284_v4 = vld [vmem:[%s1996_s9] ss:$0 sm:$0xff] }
 0x456   :  { %v346_v40 = vsel %vm344_vm11, %v343_v37, %v1522_v35  ;;  %v497_v41 = vsel %vm344_vm11, %v495_v38, %v1523_v34  ;;  %v1518_v42 = vunpack.i.h.bf16 %v1516_v39  ;;  %v1517_v6 = vunpack.i.l.bf16 %v1516_v39 }
 0x457   :  { %v557_v43 = vrot.slane %v346_v40, 7  ;;  %v558_v44 = vrot.slane %v497_v41, 7  ;;  %v582_v5 = vrot.slane %v346_v40, 1  ;;  %v583_v45 = vrot.slane %v497_v41, 1 }
 0x458   :  { %v342_v46 = vsel %vm341_vm10, %v339_v0, %v1502_v19  ;;  %v496_v47 = vsel %vm341_vm10, %v494_v36, %v1503_v16  ;;  %v503_v14 = vadd.s32 24, %v1697_v31 }
 0x459   :  { %v562_v49 = vsel %vm560_vm12, %v557_v43, %v558_v44  ;;  %v345_v50 = vsel %vm344_vm11, %v342_v46, %v1517_v6  ;;  %v498_v51 = vsel %vm344_vm11, %v496_v47, %v1518_v42  ;;  %v587_v56 = vsel %vm585_vm13, %v582_v5, %v583_v45 }
 0x45a   :  { %v556_v53 = vrot.slane %v345_v50, 7  ;;  %v559_v54 = vrot.slane %v498_v51, 7  ;;  %v581_v55 = vrot.slane %v345_v50, 1  ;;  %v628_v57 = vpack.c.bf16 %v498_v51, %v497_v41 }
 0x45b   :  { %v627_v58 = vpack.c.bf16 %v346_v40, %v345_v50  ;;  %v575_v62 = vsel %vm1805_vm14, 0.0, %v562_v49  ;;  %v599_v2 = vsel %vm1821_vm0, 0.0, %v587_v56  ;;  %v584_v15 = vrot.slane %v498_v51, 1 }
 0x45c   :  { %v563_v59 = vsel %vm560_vm12, %v556_v53, %v557_v43  ;;  %v564_v60 = vsel %vm560_vm12, %v559_v54, %v556_v53  ;;  %v561_v61 = vsel %vm560_vm12, %v558_v44, %v559_v54  ;;  %v588_v1 = vsel %vm585_vm13, %v581_v55, %v582_v5  ;;  %v1547_v53 = vld [vmem:[%s1995_s10 + $0x8] sm:$0xff]  }
 0x45d   :  { %1408 = vmatprep.mubr.msk.bf16.mxu1 %vm662_vm15, %v627_v58  ;;  %v573_v63 = vsel %vm1829_vm2, 0.0, %v564_v60  ;;  %v614_v8 = vpack.c.bf16 %v561_v61, %v575_v62  ;;  %v825_v11 = vpack.c.bf16 %v599_v2, %v588_v1  ;;  %v529_v16 = vand.u32 15, %v503_v14 }
 0x45e   :  { %1409 = vmatmul.mubr.msk.bf16.vlgmr.msra.gmra.mrb[12].mxu1 %vm662_vm15, %v628_v57  ;;  %v613_v7 = vpack.c.bf16 %v563_v59, %v573_v63  ;;  %v589_v18 = vsel %vm585_vm13, %v584_v15, %v581_v55  ;;  %v586_v21 = vsel %vm585_vm13, %v583_v45, %v584_v15  ;;  %v1548_v59 = vld [vmem:[%s1995_s10 + $0x20] sm:$0xff]  }
 0x45f   :  { %vm1873_vm3 = vcmp.eq.s32.totalorder %v529_v16, 15  ;;  %1445 = vmatpush3.bf16.msra.mxu1 %v1544_v24 }
 0x460   :  { %1424 = vmatprep.mubr.msk.bf16.mxu0 %vm662_vm15, %v613_v7  ;;  %v601_v22 = vsel %vm1873_vm3, 0.0, %v589_v18  ;;  %1446 = vmatprep.subr.bf16.mxu1 %v1545_v3 }
 0x461   :  { %1425 = vmatmul.mubr.msk.bf16.vlgmr.msra.gmra.mrb[12].mxu0 %vm662_vm15, %v614_v8  ;;  %v826_v23 = vpack.c.bf16 %v601_v22, %v586_v21 }
 0x462   :  { %1429 = vmatpush3.bf16.msra.mxu0 %v1791_v9  ;;  %1440 = vmatprep.mubr.msk.bf16.mxu0 %vm662_vm15, %v825_v11  ;;  %v1542_v9 = vld [vmem:[%s1993_s8 + $0x78] sm:$0xff]  }
 0x463   :  { %1430 = vmatprep.subr.bf16.mxu0 %v1539_v10  ;;  %1447 = vmatpush3.bf16.msra.mxu1 %v1545_v3 }
 0x464   :  { %1452 = vmatprep.subr.bf16.mxu1 %v1546_v25 }
 0x466   :  { %1431 = vmatpush3.bf16.msra.mxu0 %v1539_v10  ;;  %v1549_v10 = vld [vmem:[%s1995_s10 + $0x28] sm:$0xff]  }
 0x467   :  { %1432 = vmatprep.subr.bf16.mxu0 %v1540_v12 }
 0x46a   :  { %1433 = vmatpush3.bf16.msra.mxu0 %v1540_v12 }
 0x46b   :  { %1434 = vmatprep.subr.bf16.mxu0 %v1541_v13 }
 0x46e   :  { %1435 = vmatpush3.bf16.msra.mxu0 %v1541_v13 }
 0x46f   :  { %1436 = vmatprep.subr.bf16.mxu0 %v1542_v9 }
 0x472   :  { %1437 = vmatpush3.bf16.msra.mxu0 %v1542_v9  ;;  %v1305_v9 = vld [vmem:[%s1997_s11] ss:$0 sm:$0xff] }
 0x473   :  { %1486 = vmatprep.subr.msk.bf16.mxu0 %vm669_vm8, %v1543_v17 }
 0x476   :  { %1439 = vmatpush3.bf16.msra.mxu0 %v867_v20 }
 0x479   :  { %1441 = vmatmul.mubr.msk.bf16.vlgmr.msra.gmra.mrb[12].mxu0 %vm662_vm15, %v826_v23 }
 0x531   :  { %v1410_v26 = vpop.f32.mrb[12].mxu1 }
 0x532   :  { %v707_v27 = vpop.f32.mrb[13].mxu1 }
 0x533   :  { %v1411_v28 = vpop.f32.mrb[14].mxu1 }
 0x534   :  { %v710_v29 = vpop.f32.mrb[15].mxu1 }
 0x54c   :  { %v1442_v30 = vpop.f32.mrb[12].mxu0 }
 0x54d   :  { %v1468_v33 = vadd.f32 %v1442_v30, %v1410_v26  ;;  %v903_v34 = vpop.f32.mrb[13].mxu0 }
 0x54e   :  { %v1469_v35 = vadd.f32 %v903_v34, %v707_v27  ;;  %v1443_v0 = vpop.f32.mrb[14].mxu0 }
 0x54f   :  { %v1470_v36 = vadd.f32 %v1443_v0, %v1411_v28  ;;  %v906_v37 = vpop.f32.mrb[15].mxu0  ;;  %v931_v40 = vadd.f32 %v1468_v33, %v1284_v4 }
 0x550   :  { %v929_v38 = vadd.f32 %v1469_v35, %v1284_v4  ;;  %v1471_v39 = vadd.f32 %v906_v37, %v710_v29 }
 0x551   :  { %v932_v41 = vadd.f32 %v1470_v36, %v1284_v4  ;;  %v1903_v45 = vmax.f32 %v931_v40, 0.0 }
 0x552   :  { %v1896_v42 = vmax.f32 %v929_v38, 0.0  ;;  %v930_v6 = vadd.f32 %v1471_v39, %v1284_v4 }
 0x553   :  { %v1898_v43 = vmax.f32 %v932_v41, 0.0  ;;  %v939_v58 = vrot.slane %v1903_v45, 7  ;;  %v951_v60 = vrot.slane %v1903_v45, 1 }
 0x554   :  { %v937_v44 = vrot.slane %v1896_v42, 7  ;;  %v1901_v5 = vmax.f32 %v930_v6, 0.0  ;;  %v949_v62 = vrot.slane %v1896_v42, 1 }
 0x555   :  { %v940_v46 = vrot.slane %v1898_v43, 7  ;;  %v973_v50 = vpack.c.bf16 %v1898_v43, %v1903_v45  ;;  %v952_v12 = vrot.slane %v1898_v43, 1 }
 0x556   :  { %v938_v47 = vrot.slane %v1901_v5, 7  ;;  %v972_v49 = vpack.c.bf16 %v1901_v5, %v1896_v42  ;;  %v950_v57 = vrot.slane %v1901_v5, 1 }
 0x557   :  { %v944_v51 = vsel %vm560_vm12, %v940_v46, %v937_v44  ;;  %v941_v7 = vsel %vm560_vm12, %v939_v58, %v940_v46  ;;  %v956_v32 = vsel %vm585_vm13, %v952_v12, %v949_v62  ;;  %v953_v48 = vsel %vm585_vm13, %v951_v60, %v952_v12 }
 0x558   :  { %1448 = vmatprep.mubr.msk.bf16.mxu1 %vm65_vm1, %v972_v49  ;;  %v943_v54 = vsel %vm560_vm12, %v937_v44, %v938_v47  ;;  %v945_v55 = vsel %vm1829_vm2, 0.0, %v944_v51  ;;  %v942_v52 = vsel %vm560_vm12, %v938_v47, %v939_v58  ;;  %v954_v61 = vsel %vm585_vm13, %v950_v57, %v951_v60 }
 0x559   :  { %1449 = vmatmul.mubr.msk.bf16.vlgmr.msra.gmra.mrb[16].mxu1 %vm65_vm1, %v973_v50  ;;  %v965_v56 = vpack.c.bf16 %v943_v54, %v945_v55  ;;  %v947_v63 = vsel %vm1805_vm14, 0.0, %v942_v52  ;;  %v955_v1 = vsel %vm585_vm13, %v949_v62, %v950_v57  ;;  %v958_v2 = vsel %vm1821_vm0, 0.0, %v954_v61 }
 0x55a   :  { %1453 = vmatpush3.bf16.msra.mxu1 %v1546_v25  ;;  %v966_v8 = vpack.c.bf16 %v941_v7, %v947_v63  ;;  %v1113_v11 = vpack.c.bf16 %v958_v2, %v955_v1  ;;  %v960_v13 = vsel %vm1873_vm3, 0.0, %v956_v32 }
 0x55b   :  { %1456 = vmatprep.mubr.msk.bf16.mxu1 %vm65_vm1, %v965_v56  ;;  %1454 = vmatprep.subr.bf16.mxu1 %v1547_v53  ;;  %v1114_v14 = vpack.c.bf16 %v960_v13, %v953_v48 }
 0x55e   :  { %1455 = vmatpush3.bf16.msra.mxu1 %v1547_v53 }
 0x55f   :  { %1460 = vmatprep.subr.bf16.mxu1 %v1548_v59 }
 0x565   :  { %1457 = vmatmul.mubr.msk.bf16.vlgmr.msra.gmra.mrb[16].mxu1 %vm65_vm1, %v966_v8 }
 0x566   :  { %1461 = vmatpush3.bf16.msra.mxu1 %v1548_v59  ;;  %1464 = vmatprep.mubr.msk.bf16.mxu1 %vm65_vm1, %v1113_v11 }
 0x567   :  { %1462 = vmatprep.subr.bf16.mxu1 %v1549_v10 }
 0x56a   :  { %1463 = vmatpush3.bf16.msra.mxu1 %v1549_v10 }
 0x571   :  { %1465 = vmatmul.mubr.msk.bf16.vlgmr.msra.gmra.mrb[16].mxu1 %vm65_vm1, %v1114_v14 }
 0x644   :  { %v1466_v15 = vpop.f32.mrb[16].mxu1 }
 0x645   :  { %v1167_v16 = vpop.f32.mrb[17].mxu1  ;;  %v1195_v21 = vadd.f32 %v1466_v15, %v1305_v9 }
 0x646   :  { %v1193_v17 = vadd.f32 %v1305_v9, %v1167_v16  ;;  %v1467_v18 = vpop.f32.mrb[18].mxu1 }
 0x647   :  { %v1170_v20 = vpop.f32.mrb[19].mxu1  ;;  %v1196_v31 = vadd.f32 %v1467_v18, %v1305_v9  ;;  %v1199_v19 = vmax.f32 %v1195_v21, 0.0 }
 0x648   :  { %v1197_v22 = vmax.f32 %v1193_v17, 0.0  ;;  %v1194_v23 = vadd.f32 %v1305_v9, %v1170_v20 }
 0x649   :  { %v1200_v3 = vmax.f32 %v1196_v31, 0.0 }
 0x64a   :  { %v1198_v24 = vmax.f32 %v1194_v23, 0.0  ;;  %1205 = vrot.lane.b32.xlu0 %v1197_v22, %s1571_s2 }
 0x64c   :  { %1207 = vrot.lane.b32.xlu1 %v1198_v24, %s1571_s2 }
 0x64e   :  { %1209 = vrot.lane.b32.xlu0 %v1199_v19, %s1571_s2 }
 0x650   :  { %1211 = vrot.lane.b32.xlu1 %v1200_v3, %s1571_s2 }
 0x6bc   :  { %v1206_v25 = vpop.permute.xlu0 %1205 }
 0x6bd   :  { %v1217_v26 = vsel %vm65_vm1, %v1896_v42, %v1206_v25 }
 0x6be   :  { %1221 = vst.msk [vmem:[%s1998_s12] sm:$0xff] %vm338_vm9, %v1217_v26  ;;  %v1208_v27 = vpop.permute.xlu1 %1207 }
 0x6bf   :  { %v1218_v28 = vsel %vm65_vm1, %v1901_v5, %v1208_v27 }
 0x6c0   :  { %1222 = vst.msk [vmem:[%s1998_s12 + $0x8] sm:$0xff] %vm338_vm9, %v1218_v28  ;;  %v1210_v29 = vpop.permute.xlu0 %1209 }
 0x6c1   :  { %v1219_v30 = vsel %vm65_vm1, %v1903_v45, %v1210_v29 }
 0x6c2   :  { %1223 = vst.msk [vmem:[%s1998_s12 + $0x10] sm:$0xff] %vm338_vm9, %v1219_v30  ;;  %v1212_v33 = vpop.permute.xlu1 %1211 }
 0x6c3   :  { %v1220_v4 = vsel %vm65_vm1, %v1898_v43, %v1212_v33 }
 0x6c4   :  { %1224 = vst.msk [vmem:[%s1998_s12 + $0x18] sm:$0xff] %vm338_vm9, %v1220_v4 }

// kernel: sdnet_forward.5
= control target key start
LH: loop header
LB: loop body
LE: loop exit
PB: predicated region body
PF: predicated region fallthrough
CT: control target
= control target key end

     0   :  { %v49_v0 = vlaneseq  ;;  %v1686_v1 = vmov 0.0   ;;  %vm1687_vm0 = vmmov 0   ;;  %vm125_vm1 = vcmask 261120   ;;  %s2176_s2 = inlined_call_operand.vmem [shape: bf16[3,32,32], index: 2, kind: input, shape index: {}]   ;;  %s2177_s0 = inlined_call_operand.vmem [shape: f32[16,32], index: 0, kind: input, shape index: {}]   ;;  %s2178_s4 = inlined_call_operand.vmem [shape: bf16[3,32,32], index: 4, kind: input, shape index: {}]   ;;  %s2179_s3 = inlined_call_operand.vmem [shape: f32[1,32], index: 3, kind: input, shape index: {}]   ;;  %s2180_s6 = inlined_call_operand.vmem [shape: bf16[64,64], index: 6, kind: input, shape index: {}]   ;;  %s2181_s5 = inlined_call_operand.vmem [shape: f32[1,32], index: 5, kind: input, shape index: {}]   ;;  %s2182_s8 = inlined_call_operand.vmem [shape: bf16[64,32], index: 8, kind: input, shape index: {}]   ;;  %s2183_s7 = inlined_call_operand.vmem [shape: f32[1,64], index: 7, kind: input, shape index: {}]   ;;  %s2184_s9 = inlined_call_operand.vmem [shape: f32[1,32], index: 9, kind: input, shape index: {}]   ;;  %s2185_s1 = inlined_call_operand.vmem [shape: f32[2,8], index: 1, kind: input, shape index: {}]   ;;  %s2186_s10 = inlined_call_operand.vmem [shape: bf16[64,1], index: 10, kind: input, shape index: {}]   ;;  %s2187_s11 = inlined_call_operand.<no memory space> [shape: f32[1,1], index: 11, kind: input, shape index: {}]   ;;  %s2188_s14 = inlined_call_operand.vmem [shape: f32[2,64], index: 14, kind: output, shape index: {2}]   ;;  %s2189_s13 = inlined_call_operand.vmem [shape: f32[16,128], index: 13, kind: output, shape index: {1}]   ;;  %s2190_s12 = inlined_call_operand.vmem [shape: f32[16,96], index: 12, kind: output, shape index: {0}]  }
   0x1   :  { %1499 = vmatprep.subr.bf16.mxu0 %v1686_v1  ;;  %v1638_v2 = vld [vmem:[%s2176_s2 + $0x10] sm:$0xff]   ;;  %1507 = vmatprep.subr.bf16.mxu1 %v1686_v1  ;;  %v1639_v3 = vld [vmem:[%s2176_s2] sm:$0xff]   ;;  %v1640_v5 = vld [vmem:[%s2176_s2 + $0x18] sm:$0xff]   ;;  %vm561_vm8 = vcmask 523264   ;;  %vm803_vm9 = vcmask 1043456   ;;  %vm787_vm13 = vcmask 64512  }
   0x2   :  { %1503 = vmatprep.mubr.msk.bf16.mxu0 %vm1687_vm0, %v1686_v1  ;;  %1511 = vmatprep.mubr.msk.bf16.mxu1 %vm1687_vm0, %v1686_v1  ;;  %v1779_v4 = vshrl.u32 %v49_v0, 7  ;;  %v1641_v6 = vld [vmem:[%s2176_s2 + $0x8] sm:$0xff]   ;;  %v1793_v8 = vld [vmem:[%s2177_s0] sm:$0xff]  ;;  %v1644_v33 = vld [vmem:[%s2178_s4 + $0x10] sm:$0xff]   ;;  %vm952_vm14 = vcmask 57344  }
   0x3   :  { %1500 = vmatpush3.bf16.msra.mxu0 %v1638_v2  ;;  %1508 = vmatpush3.bf16.msra.mxu1 %v1639_v3  ;;  %v1798_v9 = vld [vmem:[%s2177_s0 + $0x8] sm:$0xff]  ;;  %v91_v11 = vrot.slane %v1793_v8, 1  ;;  %v78_v16 = vrot.slane %v1793_v8, 7  ;;  %v1642_v18 = vld [vmem:[%s2176_s2 + $0x20] sm:$0xff]   ;;  %v1645_v34 = vld [vmem:[%s2178_s4 + $0x18] sm:$0xff]  }
   0x4   :  { %1501 = vmatprep.subr.bf16.mxu0 %v1686_v1  ;;  %v51_v7 = vadd.s32 8, %v1779_v4  ;;  %1509 = vmatprep.subr.bf16.mxu1 %v1686_v1  ;;  %v56_v10 = vand.u32 7, %v1779_v4  ;;  %vm80_vm2 = vcmp.lt.s32.totalorder %v1779_v4, 1  ;;  %v92_v12 = vrot.slane %v1798_v9, 1  ;;  %v1643_v29 = vld [vmem:[%s2176_s2 + $0x28] sm:$0xff]   ;;  %v1646_v35 = vld [vmem:[%s2178_s4] sm:$0xff]  }
   0x5   :  { %v112_v13 = vpack.c.bf16 %v1798_v9, %v1793_v8  ;;  %v79_v17 = vrot.slane %v1798_v9, 7  ;;  %vm93_vm7 = vcmp.lt.s32.totalorder %v1779_v4, 7  ;;  %v1647_v36 = vld [vmem:[%s2178_s4 + $0x8] sm:$0xff]   ;;  %v1398_v48 = vld [vmem:[%s2179_s3] ss:$0 sm:$0xff]  ;;  %v1652_v20 = vld [vmem:[%s2180_s6 + $0x10] sm:$0xff]  }
   0x6   :  { %v63_v14 = vand.u32 7, %v51_v7  ;;  %vm1806_vm3 = vcmp.eq.s32.totalorder %v56_v10, 0  ;;  %vm1820_vm5 = vcmp.eq.s32.totalorder %v56_v10, 7  ;;  %v94_v24 = vsel %vm93_vm7, %v91_v11, %v92_v12  ;;  %v1648_v59 = vld [vmem:[%s2178_s4 + $0x20] sm:$0xff]  }
   0x7   :  { %1502 = vmatpush3.bf16.msra.mxu0 %v1640_v5  ;;  %1510 = vmatpush3.bf16.msra.mxu1 %v1641_v6  ;;  %v81_v22 = vsel %vm80_vm2, %v78_v16, %v79_v17  ;;  %v82_v23 = vsel %vm80_vm2, %v79_v17, %v78_v16  ;;  %v95_v25 = vsel %vm93_vm7, %v92_v12, %v91_v11  ;;  %v100_v30 = vsel %vm1820_vm5, 0.0, %v94_v24  ;;  %v1649_v11 = vld [vmem:[%s2178_s4 + $0x28] sm:$0xff]   ;;  %v1650_v16 = vld [vmem:[%s2180_s6] sm:$0xff]  }
   0x8   :  { %1515 = vmatprep.subr.bf16.mxu0 %v1686_v1  ;;  %vm1816_vm4 = vcmp.eq.s32.totalorder %v63_v14, 0  ;;  %vm1824_vm6 = vcmp.eq.s32.totalorder %v63_v14, 7  ;;  %1523 = vmatprep.subr.bf16.mxu1 %v1686_v1  ;;  %v87_v26 = vsel %vm1806_vm3, 0.0, %v82_v23  ;;  %v1651_v17 = vld [vmem:[%s2180_s6 + $0x8] sm:$0xff]  }
   0x9   :  { %v88_v27 = vsel %vm1816_vm4, 0.0, %v81_v22  ;;  %v101_v31 = vsel %vm1824_vm6, 0.0, %v95_v25 }
   0xa   :  { %1504 = vmatmul.mubr.msk.bf16.vlgmr.msra.gmra.mrb[0].mxu0 %vm125_vm1, %v112_v13  ;;  %v106_v28 = vpack.c.bf16 %v88_v27, %v87_v26  ;;  %v231_v32 = vpack.c.bf16 %v101_v31, %v100_v30  ;;  %v1653_v26 = vld [vmem:[%s2180_s6 + $0x18] sm:$0xff]   ;;  %v1416_v31 = vld [vmem:[%s2181_s5] ss:$0 sm:$0xff]  ;;  %s1688_s5 = smov 32  }
   0xb   :  { %1516 = vmatpush3.bf16.msra.mxu0 %v1642_v18  ;;  %1519 = vmatprep.mubr.msk.bf16.mxu0 %vm1687_vm0, %v1686_v1 }
   0xc   :  { %1517 = vmatprep.subr.bf16.mxu0 %v1686_v1  ;;  %1512 = vmatmul.mubr.msk.bf16.vlgmr.msra.gmra.mrb[0].mxu1 %vm125_vm1, %v106_v28 }
   0xd   :  { %1527 = vmatprep.mubr.msk.bf16.mxu1 %vm1687_vm0, %v1686_v1  ;;  %1524 = vmatpush3.bf16.msra.mxu1 %v1644_v33 }
   0xe   :  { %1525 = vmatprep.subr.bf16.mxu1 %v1686_v1 }
   0xf   :  { %1518 = vmatpush3.bf16.msra.mxu0 %v1643_v29 }
  0x10   :  { %1531 = vmatprep.subr.bf16.mxu0 %v1686_v1 }
  0x11   :  { %1526 = vmatpush3.bf16.msra.mxu1 %v1645_v34 }
  0x12   :  { %1520 = vmatmul.mubr.msk.bf16.vlgmr.msra.gmra.mrb[4].mxu0 %vm125_vm1, %v231_v32  ;;  %1539 = vmatprep.subr.bf16.mxu1 %v1686_v1 }
  0x13   :  { %1535 = vmatprep.mubr.msk.bf16.mxu0 %vm1687_vm0, %v1686_v1  ;;  %1532 = vmatpush3.bf16.msra.mxu0 %v1646_v35  ;;  %v1654_v35 = vld [vmem:[%s2182_s8] sm:$0xff]  }
  0x14   :  { %1533 = vmatprep.subr.bf16.mxu0 %v1686_v1 }
  0x17   :  { %1534 = vmatpush3.bf16.msra.mxu0 %v1647_v36 }
  0x18   :  { %1547 = vmatprep.subr.bf16.mxu0 %v1686_v1 }
  0xdd   :  { %v163_v37 = vpop.f32.mrb[0].mxu0 }
  0xde   :  { %v1505_v38 = vpop.f32.mrb[1].mxu0 }
  0xdf   :  { %v166_v39 = vpop.f32.mrb[2].mxu0  ;;  %v219_v40 = vpop.f32.mrb[0].mxu1 }
  0xe0   :  { %v1506_v41 = vpop.f32.mrb[3].mxu0  ;;  %v220_v42 = vadd.f32 %v219_v40, %v163_v37  ;;  %v1513_v43 = vpop.f32.mrb[1].mxu1 }
  0xe1   :  { %v222_v44 = vpop.f32.mrb[2].mxu1 }
  0xe2   :  { %v223_v45 = vadd.f32 %v222_v44, %v166_v39  ;;  %v1514_v46 = vpop.f32.mrb[3].mxu1  ;;  %v1655_v39 = vld [vmem:[%s2182_s8 + $0x8] sm:$0xff]  }
  0xe5   :  { %v281_v47 = vpop.f32.mrb[4].mxu0 }
  0xe6   :  { %v288_v49 = vadd.f32 %v281_v47, %v220_v42  ;;  %v1521_v50 = vpop.f32.mrb[5].mxu0 }
  0xe7   :  { %v284_v51 = vpop.f32.mrb[6].mxu0  ;;  %v1417_v50 = vld [vmem:[%s2183_s7] ss:$0 sm:$0xff] }
  0xe8   :  { %v297_v52 = vadd.f32 %v1398_v48, %v288_v49  ;;  %v289_v53 = vadd.f32 %v284_v51, %v223_v45  ;;  %v1522_v54 = vpop.f32.mrb[7].mxu0  ;;  %v1657_v49 = vld [vmem:[%s2182_s8 + $0x18] sm:$0xff]  }
  0xea   :  { %v1879_v55 = vmax.f32 %v297_v52, 0.0  ;;  %v298_v56 = vadd.f32 %v1398_v48, %v289_v53  ;;  %v1656_v48 = vld [vmem:[%s2182_s8 + $0x10] sm:$0xff]  }
  0xec   :  { %v1881_v57 = vmax.f32 %v298_v56, 0.0  ;;  %v301_v58 = vrot.slane %v1879_v55, 7  ;;  %v307_v60 = vrot.slane %v1879_v55, 1 }
  0xee   :  { %v302_v61 = vrot.slane %v1881_v57, 7  ;;  %v308_v62 = vrot.slane %v1881_v57, 1  ;;  %v323_v63 = vpack.c.bf16 %v1881_v57, %v1879_v55 }
  0xf0   :  { %1528 = vmatmul.mubr.msk.bf16.vlgmr.msra.gmra.mrb[4].mxu1 %vm125_vm1, %v323_v63  ;;  %v303_v2 = vsel %vm80_vm2, %v301_v58, %v302_v61  ;;  %v304_v3 = vsel %vm80_vm2, %v302_v61, %v301_v58  ;;  %v309_v5 = vsel %vm93_vm7, %v307_v60, %v308_v62  ;;  %v310_v6 = vsel %vm93_vm7, %v308_v62, %v307_v60 }
  0xf1   :  { %1540 = vmatpush3.bf16.msra.mxu1 %v1648_v59  ;;  %v305_v7 = vsel %vm1806_vm3, 0.0, %v304_v3  ;;  %v306_v10 = vsel %vm1816_vm4, 0.0, %v303_v2  ;;  %1543 = vmatprep.mubr.msk.bf16.mxu1 %vm1687_vm0, %v1686_v1  ;;  %v311_v13 = vsel %vm1820_vm5, 0.0, %v309_v5  ;;  %v312_v14 = vsel %vm1824_vm6, 0.0, %v310_v6 }
  0xf2   :  { %v317_v12 = vpack.c.bf16 %v306_v10, %v305_v7  ;;  %1541 = vmatprep.subr.bf16.mxu1 %v1686_v1  ;;  %v441_v15 = vpack.c.bf16 %v312_v14, %v311_v13  ;;  %v1999_v7 = vld [vmem:[%s2184_s9] ss:$0 sm:$0xff]  ;;  %v1689_v13 = vmov 0   ;;  %vm1010_vm2 = vcmask 516096  }
  0xf3   :  { %1636 = vset.pattern.permute.xlu1 %v1689_v13  ;;  %v2011_v14 = vld [vmem:[%s2185_s1] sm:$0x1] }
  0xf4   :  { %1536 = vmatmul.mubr.msk.bf16.vlgmr.msra.gmra.mrb[8].mxu0 %vm125_vm1, %v317_v12  ;;  %vm778_vm10 = vcmp.gt.f32.partialorder %v2011_v14, 0.5 }
  0xf5   :  { %1542 = vmatpush3.bf16.msra.mxu1 %v1649_v11  ;;  %1555 = vmatprep.mubr.msk.bf16.mxu0 %vm1687_vm0, %v1686_v1 }
  0xf6   :  { %1559 = vmatprep.subr.bf16.mxu1 %v1686_v1  ;;  %1548 = vmatpush3.bf16.msra.mxu0 %v1650_v16  ;;  %v779_v16 = vsel %vm778_vm10, 1, %v1689_v13 }
  0xf7   :  { %1549 = vmatprep.subr.bf16.mxu0 %v1686_v1 }
  0xf8   :  { %1544 = vmatmul.mubr.msk.bf16.vlgmr.msra.gmra.mrb[8].mxu1 %vm125_vm1, %v441_v15  ;;  %v2015_v15 = vsub.s32 0, %v1779_v4 }
  0xf9   :  { %1567 = vmatprep.mubr.msk.bf16.mxu1 %vm1687_vm0, %v1686_v1  ;;  %1560 = vmatpush3.bf16.msra.mxu1 %v1654_v35 }
  0xfa   :  { %1550 = vmatpush3.bf16.msra.mxu0 %v1651_v17  ;;  %1561 = vmatprep.subr.bf16.mxu1 %v1686_v1  ;;  %v783_v17 = vrot.slane %v779_v16, %v2015_v15 }
  0xfb   :  { %1551 = vmatprep.subr.bf16.mxu0 %v1686_v1 }
  0xfc   :  { %vm784_vm11 = vcmp.eq.s32.totalorder %v783_v17, 1 }
  0xfd   :  { %1562 = vmatpush3.bf16.msra.mxu1 %v1655_v39  ;;  %v20_v39 = vstv %s2187_s11 }
  0xfe   :  { %1552 = vmatpush3.bf16.msra.mxu0 %v1652_v20  ;;  %1563 = vmatprep.subr.bf16.mxu1 %v1686_v1  ;;  %21 = vst [vmem:[#allocation2] sm:$0x1] %v20_v39 }
  0xff   :  { %1553 = vmatprep.subr.bf16.mxu0 %v1686_v1 }
 0x101   :  { %1564 = vmatpush3.bf16.msra.mxu1 %v1656_v48 }
 0x102   :  { %1554 = vmatpush3.bf16.msra.mxu0 %v1653_v26  ;;  %1565 = vmatprep.subr.bf16.mxu1 %v1686_v1 }
 0x103   :  { %1571 = vmatprep.subr.bf16.mxu0 %v1686_v1 }
 0x105   :  { %1566 = vmatpush3.bf16.msra.mxu1 %v1657_v49 }
 0x106   :  { %1577 = vmatprep.subr.bf16.mxu1 %v1686_v1 }
 0x1c3   :  { %v373_v18 = vpop.f32.mrb[4].mxu1 }
 0x1c4   :  { %v1529_v19 = vpop.f32.mrb[5].mxu1 }
 0x1c5   :  { %v376_v21 = vpop.f32.mrb[6].mxu1 }
 0x1c6   :  { %v1530_v22 = vpop.f32.mrb[7].mxu1 }
 0x1c7   :  { %v429_v23 = vpop.f32.mrb[8].mxu0 }
 0x1c8   :  { %v430_v24 = vadd.f32 %v429_v23, %v373_v18  ;;  %v1537_v25 = vpop.f32.mrb[9].mxu0  ;;  %v2022_v18 = vand.u32 127, %v49_v0 }
 0x1c9   :  { %v432_v27 = vpop.f32.mrb[10].mxu0 }
 0x1ca   :  { %v433_v28 = vadd.f32 %v432_v27, %v376_v21  ;;  %v1538_v29 = vpop.f32.mrb[11].mxu0  ;;  %vm644_vm12 = vcmp.eq.s32.totalorder %v1779_v4, %v2022_v18  ;;  %v1667_v4 = vld [vmem:[%s2186_s10 + $0x8] sm:$0xff]   ;;  %v1668_v18 = vld [vmem:[%s2186_s10 + $0x10] sm:$0xff]  }
 0x1cb   :  { %v491_v30 = vpop.f32.mrb[8].mxu1 }
 0x1cc   :  { %v498_v32 = vadd.f32 %v491_v30, %v430_v24  ;;  %v1545_v33 = vpop.f32.mrb[9].mxu1  ;;  %v1658_v30 = vld [vmem:[%s2186_s10] sm:$0xff]  }
 0x1cd   :  { %v494_v34 = vpop.f32.mrb[10].mxu1  ;;  %v1661_v33 = vld [vmem:[%s2186_s10 + $0x18] sm:$0xff]  }
 0x1ce   :  { %v499_v36 = vadd.f32 %v494_v34, %v433_v28  ;;  %v1546_v37 = vpop.f32.mrb[11].mxu1  ;;  %v1944_v38 = vadd.f32 %v1416_v31, %v498_v32  ;;  %v1660_v32 = vld [vmem:[%s2186_s10 + $0x10] sm:$0xff]  }
 0x1d0   :  { %v1949_v40 = vadd.f32 %v1416_v31, %v499_v36  ;;  %v509_v41 = vmax.f32 %v1944_v38, 0.0  ;;  %v1659_v31 = vld [vmem:[%s2186_s10 + $0x8] sm:$0xff]  }
 0x1d2   :  { %513 = vrot.lane.b32.xlu0 %v509_v41, %s1688_s5  ;;  %v510_v42 = vmax.f32 %v1949_v40, 0.0 }
 0x1d6   :  { %515 = vrot.lane.b32.xlu0 %v510_v42, %s1688_s5 }
 0x1f4   :  { %889 = vxpose.xlu0.c.b16.start [1/4] (short) (narrow) %v1658_v30, 16 }
 0x1f8   :  { %890 = vxpose.xlu0.c.b16.cont [2/4] (short) (narrow) %v1659_v31, 16 }
 0x1fc   :  { %891 = vxpose.xlu0.c.b16.cont [3/4] (short) (narrow) %v1660_v32, 16 }
 0x200   :  { %892 = vxpose.xlu0.c.b16.end [4/4] (short) (narrow) %v1661_v33, 16 }
 0x209   :  { %1637 = vset.pattern.permute.xlu0 %v1689_v13 }
 0x244   :  { %v514_v43 = vpop.permute.xlu0 %513 }
 0x245   :  { %v1963_v45 = vsel %vm125_vm1, %v1879_v55, %v514_v43  ;;  %v855_v43 = vld [vmem:[#allocation2] sm:$0x1] }
 0x248   :  { %v516_v44 = vpop.permute.xlu0 %515 }
 0x249   :  { %v1967_v46 = vsel %vm125_vm1, %v1881_v57, %v516_v44 }
 0x24a   :  { %v529_v47 = vpack.c.bf16 %v1967_v46, %v1963_v45 }
 0x24c   :  { %1556 = vmatmul.mubr.msk.bf16.vlgmr.msra.gmra.mrb[12].mxu0 %vm561_vm8, %v529_v47 }
 0x24d   :  { %1573 = vmatprep.mubr.msk.bf16.mxu0 %vm1687_vm0, %v1686_v1 }
 0x31f   :  { %v599_v51 = vpop.f32.mrb[12].mxu0 }
 0x320   :  { %v600_v52 = vadd.f32 %v1417_v50, %v599_v51  ;;  %v1557_v53 = vpop.f32.mrb[13].mxu0 }
 0x321   :  { %v602_v54 = vpop.f32.mrb[14].mxu0  ;;  %v897_v53 = vpop.trf.xlu0 }
 0x322   :  { %v1985_v56 = vmax.f32 %v600_v52, 0.0  ;;  %v1987_v58 = vadd.f32 %v1417_v50, %v602_v54  ;;  %v1558_v59 = vpop.f32.mrb[15].mxu0  ;;  %v1662_v54 = vld [vmem:[%s2182_s8] sm:$0xff]  }
 0x323   :  { %v1663_v59 = vld [vmem:[%s2182_s8 + $0x8] sm:$0xff]  }
 0x324   :  { %v654_v60 = vpack.c.bf16 %v1985_v56, %v1985_v56 }
 0x326   :  { %1568 = vmatmul.mubr.msk.bf16.vlgmr.msra.gmra.mrb[12].mxu1 %vm561_vm8, %v654_v60  ;;  %v804_v61 = vsel %vm803_vm9, %v654_v60, 0  ;;  %v1664_v60 = vld [vmem:[%s2182_s8 + $0x10] sm:$0xff]  }
 0x327   :  { %1578 = vmatpush3.bf16.msra.mxu1 %v804_v61  ;;  %1579 = vmatprep.mubr.msk.bf16.mxu1 %vm1687_vm0, %v1686_v1  ;;  %v1665_v61 = vld [vmem:[%s2182_s8 + $0x18] sm:$0xff]  }
 0x328   :  { %1589 = vmatprep.subr.bf16.mxu1 %v1686_v1 }
 0x3f9   :  { %v716_v62 = vpop.f32.mrb[12].mxu1 }
 0x3fa   :  { %v722_v63 = vmax.f32 %v716_v62, 0.0  ;;  %v1569_v2 = vpop.f32.mrb[13].mxu1  ;;  %v2072_v62 = vmax.f32 %v1987_v58, 0.0 }
 0x3fb   :  { %v719_v3 = vpop.f32.mrb[14].mxu1 }
 0x3fc   :  { %v731_v5 = vpack.c.bf16 %v722_v63, %v722_v63  ;;  %v1570_v6 = vpop.f32.mrb[15].mxu1  ;;  %v729_v11 = vmul.f32 %v1999_v7, %v722_v63  ;;  %v1021_v63 = vpack.c.bf16 %v2072_v62, %v2072_v62 }
 0x3fe   :  { %v736_v10 = vsel %vm125_vm1, %v731_v5, 0  ;;  %v730_v12 = vpack.c.bf16 %v729_v11, %v729_v11 }
 0x3ff   :  { %1572 = vmatpush3.bf16.xpose.msra.mxu0 %v736_v10 }
 0x400   :  { %1583 = vmatprep.subr.bf16.mxu0 %v1686_v1 }
 0x406   :  { %1574 = vmatmul.mubr.msk.bf16.vlgmr.msra.gmra.mrb[16].mxu0 %vm125_vm1, %v730_v12 }
 0x407   :  { %1585 = vmatprep.mubr.msk.bf16.mxu0 %vm1687_vm0, %v1686_v1 }
 0x4d9   :  { %v772_v19 = vpop.f32.mrb[16].mxu0 }
 0x4da   :  { %v785_v20 = vsel %vm784_vm11, -1e+30, %v772_v19  ;;  %v1575_v21 = vpop.f32.mrb[17].mxu0 }
 0x4db   :  { %v775_v22 = vpop.f32.mrb[18].mxu0  ;;  %v786_v23 = vsel %vm644_vm12, -1e+30, %v785_v20 }
 0x4dc   :  { %v1576_v24 = vpop.f32.mrb[19].mxu0  ;;  %v788_v25 = vsel %vm787_vm13, %v786_v23, -inf }
 0x4dd   :  { %789 = vmax.xlane.f32.xlu1 %v788_v25 }
 0x56a   :  { %v790_v26 = vpop.xlane.xlu1 %789 }
 0x56b   :  { %v791_v0 = vsub.f32 %v786_v23, %v790_v26 }
 0x56d   :  { %v792_v27 = vmul.f32 1.442695, %v791_v0 }
 0x56f   :  { %1670 = vpow2.f32 %v792_v27 }
 0x579   :  { %v1671_v28 = vpop.eup %1670 }
 0x57a   :  { %v794_v29 = vsel %vm787_vm13, %v1671_v28, 0.0 }
 0x57b   :  { %795 = vadd.xlane.f32.xlu1 %v794_v29 }
 0x58c   :  { %858 = vperm.xlu1 %1636, %v855_v43  }
 0x608   :  { %v796_v34 = vpop.xlane.xlu1 %795 }
 0x609   :  { %1672 = vrcp.f32 %v796_v34  ;;  %v1163_v34 = vsel %vm803_vm9, %v1021_v63, 0 }
 0x60c   :  { %v859_v2 = vpop.permute.xlu1 %858 }
 0x60d   :  { %v864_v3 = vrot.slane %v859_v2, %v2015_v15  ;;  %v1669_v2 = vld [vmem:[%s2186_s10 + $0x18] sm:$0xff]  }
 0x613   :  { %v1673_v35 = vpop.eup %1672 }
 0x614   :  { %v798_v36 = vmul.f32 %v1673_v35, %v1671_v28  ;;  %v2100_v35 = vld [vmem:[%s2185_s1 + $0x1] sm:$0x1] }
 0x615   :  { %vm1139_vm15 = vcmp.gt.f32.partialorder %v2100_v35, 0.5 }
 0x616   :  { %v799_v37 = vpack.c.bf16 %v798_v36, %v798_v36 }
 0x618   :  { %1580 = vmatmul.mubr.msk.bf16.vlgmr.msra.gmra.mrb[16].mxu1 %vm787_vm13, %v799_v37 }
 0x619   :  { %1591 = vmatprep.mubr.msk.bf16.mxu1 %vm1687_vm0, %v1686_v1 }
 0x6eb   :  { %v840_v44 = vpop.f32.mrb[16].mxu1 }
 0x6ec   :  { %v854_v47 = vpack.c.bf16 %v840_v44, %v840_v44  ;;  %v1581_v48 = vpop.f32.mrb[17].mxu1 }
 0x6ed   :  { %v843_v49 = vpop.f32.mrb[18].mxu1 }
 0x6ee   :  { %v909_v50 = vsel %vm561_vm8, %v854_v47, 0  ;;  %v968_v51 = vsel %vm803_vm9, %v854_v47, 0  ;;  %v1582_v52 = vpop.f32.mrb[19].mxu1 }
 0x6ef   :  { %1584 = vmatpush3.bf16.xpose.msra.mxu0 %v909_v50  ;;  %1590 = vmatpush3.bf16.msra.mxu1 %v968_v51 }
 0x6f0   :  { %1595 = vmatprep.subr.bf16.mxu0 %v1686_v1  ;;  %1607 = vmatprep.subr.bf16.mxu1 %v1686_v1 }
 0x6f6   :  { %1586 = vmatmul.mubr.msk.bf16.vlgmr.msra.gmra.mrb[20].mxu0 %vm561_vm8, %v897_v53 }
 0x6f7   :  { %1596 = vmatpush3.bf16.msra.mxu0 %v1662_v54  ;;  %1603 = vmatprep.mubr.msk.bf16.mxu0 %vm1687_vm0, %v1686_v1 }
 0x6f8   :  { %1597 = vmatprep.subr.bf16.mxu0 %v1686_v1 }
 0x6fb   :  { %1598 = vmatpush3.bf16.msra.mxu0 %v1663_v59 }
 0x6fc   :  { %1599 = vmatprep.subr.bf16.mxu0 %v1686_v1 }
 0x6ff   :  { %1600 = vmatpush3.bf16.msra.mxu0 %v1664_v60 }
 0x700   :  { %1601 = vmatprep.subr.bf16.mxu0 %v1686_v1 }
 0x703   :  { %1602 = vmatpush3.bf16.msra.mxu0 %v1665_v61 }
 0x704   :  { %1619 = vmatprep.subr.bf16.mxu0 %v1686_v1 }
 0x706   :  { %1604 = vmatmul.mubr.msk.bf16.vlgmr.msra.gmra.mrb[24].mxu0 %vm561_vm8, %v1021_v63  ;;  %v1666_v63 = vld [vmem:[%s2186_s10] sm:$0xff]   ;;  %s1690_s10 = smov 64  }
 0x707   :  { %1621 = vmatprep.mubr.msk.bf16.mxu0 %vm1687_vm0, %v1686_v1 }
 0x7c9   :  { %v945_v5 = vpop.f32.mrb[20].mxu0 }
 0x7ca   :  { %v946_v6 = vadd.f32 %v945_v5, %v864_v3  ;;  %v1587_v58 = vpop.f32.mrb[21].mxu0 }
 0x7cb   :  { %v948_v10 = vpop.f32.mrb[22].mxu0 }
 0x7cc   :  { %v1588_v11 = vpop.f32.mrb[23].mxu0  ;;  %v951_v12 = vsel %vm778_vm10, -1e+30, %v946_v6  ;;  %v1214_v10 = vld [vmem:[#allocation2] sm:$0x1] }
 0x7cd   :  { %v953_v16 = vsel %vm952_vm14, %v951_v12, -inf }
 0x7ce   :  { %954 = vmax.xlane.f32.xlu1 %v953_v16 }
 0x7d9   :  { %v1083_v17 = vpop.f32.mrb[24].mxu0 }
 0x7da   :  { %v1605_v19 = vpop.f32.mrb[25].mxu0  ;;  %v1089_v27 = vmax.f32 %v1083_v17, 0.0 }
 0x7db   :  { %v1086_v20 = vpop.f32.mrb[26].mxu0 }
 0x7dc   :  { %v1606_v21 = vpop.f32.mrb[27].mxu0  ;;  %v1092_v28 = vpack.c.bf16 %v1089_v27, %v1089_v27  ;;  %v1090_v32 = vmul.f32 %v1999_v7, %v1089_v27  ;;  %v1140_v7 = vsel %vm1139_vm15, 1, %v1689_v13 }
 0x7dd   :  { %v1144_v43 = vrot.slane %v1140_v7, %v2015_v15 }
 0x7de   :  { %v1097_v31 = vsel %vm125_vm1, %v1092_v28, 0  ;;  %v1091_v33 = vpack.c.bf16 %v1090_v32, %v1090_v32 }
 0x7df   :  { %vm1145_vm3 = vcmp.eq.s32.totalorder %v1144_v43, 1 }
 0x85b   :  { %v955_v22 = vpop.xlane.xlu1 %954 }
 0x85c   :  { %v956_v23 = vsub.f32 %v951_v12, %v955_v22 }
 0x85e   :  { %v957_v24 = vmul.f32 1.442695, %v956_v23 }
 0x860   :  { %1674 = vpow2.f32 %v957_v24 }
 0x86a   :  { %v1675_v25 = vpop.eup %1674 }
 0x86b   :  { %v959_v26 = vsel %vm952_vm14, %v1675_v25, 0.0 }
 0x86c   :  { %960 = vadd.xlane.f32.xlu0 %v959_v26 }
 0x8f9   :  { %v961_v0 = vpop.xlane.xlu0 %960 }
 0x8fa   :  { %1676 = vrcp.f32 %v961_v0 }
 0x904   :  { %v1677_v14 = vpop.eup %1676 }
 0x905   :  { %v963_v29 = vmul.f32 %v1677_v14, %v1675_v25 }
 0x907   :  { %v964_v30 = vpack.c.bf16 %v963_v29, %v963_v29 }
 0x909   :  { %1592 = vmatmul.mubr.msk.bf16.vlgmr.msra.gmra.mrb[20].mxu1 %vm787_vm13, %v964_v30 }
 0x90a   :  { %1608 = vmatpush3.bf16.xpose.msra.mxu1 %v1097_v31  ;;  %1609 = vmatprep.mubr.msk.bf16.mxu1 %vm1687_vm0, %v1686_v1 }
 0x90b   :  { %1613 = vmatprep.subr.bf16.mxu1 %v1686_v1 }
 0x911   :  { %1610 = vmatmul.mubr.msk.bf16.vlgmr.msra.gmra.mrb[24].mxu1 %vm125_vm1, %v1091_v33 }
 0x912   :  { %1614 = vmatpush3.bf16.msra.mxu1 %v1163_v34  ;;  %1615 = vmatprep.mubr.msk.bf16.mxu1 %vm1687_vm0, %v1686_v1 }
 0x913   :  { %1625 = vmatprep.subr.bf16.mxu1 %v1686_v1 }
 0x9dc   :  { %v1004_v36 = vpop.f32.mrb[20].mxu1 }
 0x9dd   :  { %1011 = vst.msk [vmem:[%s2188_s14] sm:$0x1] %vm1010_vm2, %v1004_v36  ;;  %v1593_v37 = vpop.f32.mrb[21].mxu1 }
 0x9de   :  { %v1007_v39 = vpop.f32.mrb[22].mxu1 }
 0x9df   :  { %v1594_v44 = vpop.f32.mrb[23].mxu1 }
 0x9e4   :  { %v1133_v47 = vpop.f32.mrb[24].mxu1 }
 0x9e5   :  { %v1146_v48 = vsel %vm1145_vm3, -1e+30, %v1133_v47  ;;  %v1611_v49 = vpop.f32.mrb[25].mxu1 }
 0x9e6   :  { %v1136_v50 = vpop.f32.mrb[26].mxu1  ;;  %v1147_v13 = vsel %vm644_vm12, -1e+30, %v1146_v48 }
 0x9e7   :  { %v1612_v51 = vpop.f32.mrb[27].mxu1  ;;  %v1148_v52 = vsel %vm787_vm13, %v1147_v13, -inf }
 0x9e8   :  { %1149 = vmax.xlane.f32.xlu1 %v1148_v52 }
 0xa15   :  { %1248 = vxpose.xlu1.c.b16.start [1/4] (short) (narrow) %v1666_v63, 16 }
 0xa19   :  { %1249 = vxpose.xlu1.c.b16.cont [2/4] (short) (narrow) %v1667_v4, 16 }
 0xa1d   :  { %1250 = vxpose.xlu1.c.b16.cont [3/4] (short) (narrow) %v1668_v18, 16 }
 0xa21   :  { %1251 = vxpose.xlu1.c.b16.end [4/4] (short) (narrow) %v1669_v2, 16 }
 0xa75   :  { %v1150_v53 = vpop.xlane.xlu1 %1149 }
 0xa76   :  { %v1151_v54 = vsub.f32 %v1147_v13, %v1150_v53 }
 0xa78   :  { %v1152_v59 = vmul.f32 1.442695, %v1151_v54 }
 0xa7a   :  { %1678 = vpow2.f32 %v1152_v59 }
 0xa7b   :  { %v1256_v22 = vpop.trf.xlu1 }
 0xa84   :  { %v1679_v60 = vpop.eup %1678 }
 0xa85   :  { %v1154_v61 = vsel %vm787_vm13, %v1679_v60, 0.0 }
 0xa86   :  { %1155 = vadd.xlane.f32.xlu0 %v1154_v61 }
 0xa9c   :  { %1217 = vperm.xlu0 %1637, %v1214_v10  }
 0xb13   :  { %v1156_v3 = vpop.xlane.xlu0 %1155 }
 0xb14   :  { %1680 = vrcp.f32 %v1156_v3 }
 0xb1b   :  { %v1218_v23 = vpop.permute.xlu0 %1217 }
 0xb1c   :  { %v1223_v24 = vrot.slane %v1218_v23, %v2015_v15 }
 0xb1e   :  { %v1681_v5 = vpop.eup %1680 }
 0xb1f   :  { %v1158_v6 = vmul.f32 %v1681_v5, %v1679_v60 }
 0xb21   :  { %v1159_v58 = vpack.c.bf16 %v1158_v6, %v1158_v6 }
 0xb23   :  { %1616 = vmatmul.mubr.msk.bf16.vlgmr.msra.gmra.mrb[28].mxu1 %vm787_vm13, %v1159_v58 }
 0xb24   :  { %1627 = vmatprep.mubr.msk.bf16.mxu1 %vm1687_vm0, %v1686_v1  ;;  %vm626_vm0 = vcmask 785408  }
 0xbf6   :  { %v1199_v11 = vpop.f32.mrb[28].mxu1 }
 0xbf7   :  { %v1213_v12 = vpack.c.bf16 %v1199_v11, %v1199_v11  ;;  %v1617_v16 = vpop.f32.mrb[29].mxu1 }
 0xbf8   :  { %v1202_v17 = vpop.f32.mrb[30].mxu1 }
 0xbf9   :  { %v1268_v19 = vsel %vm561_vm8, %v1213_v12, 0  ;;  %v1326_v20 = vsel %vm803_vm9, %v1213_v12, 0  ;;  %v1618_v21 = vpop.f32.mrb[31].mxu1 }
 0xbfa   :  { %1620 = vmatpush3.bf16.xpose.msra.mxu0 %v1268_v19  ;;  %1626 = vmatpush3.bf16.msra.mxu1 %v1326_v20 }
 0xc01   :  { %1622 = vmatmul.mubr.msk.bf16.vlgmr.msra.gmra.mrb[28].mxu0 %vm561_vm8, %v1256_v22 }
 0xcd4   :  { %v1304_v1 = vpop.f32.mrb[28].mxu0 }
 0xcd5   :  { %v1305_v25 = vadd.f32 %v1304_v1, %v1223_v24  ;;  %v1623_v26 = vpop.f32.mrb[29].mxu0 }
 0xcd6   :  { %v1307_v0 = vpop.f32.mrb[30].mxu0 }
 0xcd7   :  { %v1624_v27 = vpop.f32.mrb[31].mxu0  ;;  %v1310_v14 = vsel %vm1139_vm15, -1e+30, %v1305_v25 }
 0xcd8   :  { %v1311_v28 = vsel %vm952_vm14, %v1310_v14, -inf }
 0xcd9   :  { %1312 = vmax.xlane.f32.xlu0 %v1311_v28 }
 0xcef   :  { %612 = vrot.lane.b32.xlu0 %v1881_v57, %s1688_s5 }
 0xcf3   :  { %633 = vrot.lane.b32.xlu0 %v2072_v62, %s1690_s10 }
 0xd66   :  { %v1313_v29 = vpop.xlane.xlu0 %1312 }
 0xd67   :  { %v1314_v30 = vsub.f32 %v1310_v14, %v1313_v29 }
 0xd69   :  { %v1315_v15 = vmul.f32 1.442695, %v1314_v30 }
 0xd6a   :  { %v613_v31 = vpop.permute.xlu0 %612 }
 0xd6b   :  { %1682 = vpow2.f32 %v1315_v15  ;;  %v623_v38 = vsel %vm125_vm1, %v1798_v9, %v613_v31 }
 0xd6e   :  { %v634_v32 = vpop.permute.xlu0 %633 }
 0xd6f   :  { %v638_v33 = vsel %vm561_vm8, %v1967_v46, %v634_v32 }
 0xd70   :  { %640 = vst [vmem:[%s2189_s13 + $0x8] sm:$0xff] %v638_v33 }
 0xd75   :  { %v1683_v34 = vpop.eup %1682 }
 0xd76   :  { %v1317_v35 = vsel %vm952_vm14, %v1683_v34, 0.0 }
 0xd77   :  { %1318 = vadd.xlane.f32.xlu1 %v1317_v35 }
 0xd88   :  { %610 = vrot.lane.b32.xlu1 %v1879_v55, %s1688_s5 }
 0xd8c   :  { %616 = vrot.lane.b32.xlu1 %v509_v41, %s1690_s10 }
 0xd90   :  { %618 = vrot.lane.b32.xlu1 %v510_v42, %s1690_s10 }
 0xd94   :  { %631 = vrot.lane.b32.xlu1 %v1985_v56, %s1690_s10 }
 0xe04   :  { %v1319_v57 = vpop.xlane.xlu1 %1318 }
 0xe05   :  { %1684 = vrcp.f32 %v1319_v57 }
 0xe08   :  { %v611_v46 = vpop.permute.xlu1 %610 }
 0xe09   :  { %v622_v62 = vsel %vm125_vm1, %v1793_v8, %v611_v46 }
 0xe0c   :  { %v617_v7 = vpop.permute.xlu1 %616 }
 0xe0d   :  { %v624_v36 = vsel %vm561_vm8, %v622_v62, %v617_v7 }
 0xe0e   :  { %627 = vst.msk [vmem:[%s2190_s12] sm:$0xff] %vm626_vm0, %v624_v36 }
 0xe0f   :  { %v1685_v55 = vpop.eup %1684 }
 0xe10   :  { %v1321_v40 = vmul.f32 %v1685_v55, %v1683_v34  ;;  %v619_v41 = vpop.permute.xlu1 %618 }
 0xe11   :  { %v625_v42 = vsel %vm561_vm8, %v623_v38, %v619_v41 }
 0xe12   :  { %628 = vst.msk [vmem:[%s2190_s12 + $0x8] sm:$0xff] %vm626_vm0, %v625_v42  ;;  %v1322_v8 = vpack.c.bf16 %v1321_v40, %v1321_v40 }
 0xe14   :  { %1628 = vmatmul.mubr.msk.bf16.vlgmr.msra.gmra.mrb[32].mxu1 %vm787_vm13, %v1322_v8  ;;  %v632_v56 = vpop.permute.xlu1 %631 }
 0xe15   :  { %v637_v37 = vsel %vm561_vm8, %v1963_v45, %v632_v56 }
 0xe16   :  { %639 = vst [vmem:[%s2189_s13] sm:$0xff] %v637_v37 }
 0xee7   :  { %v1362_v9 = vpop.f32.mrb[32].mxu1 }
 0xee8   :  { %1368 = vst.msk [vmem:[%s2188_s14 + $0x1] sm:$0x1] %vm1010_vm2, %v1362_v9  ;;  %v1629_v39 = vpop.f32.mrb[33].mxu1 }
 0xee9   :  { %v1365_v43 = vpop.f32.mrb[34].mxu1 }
 0xeea   :  { %v1630_v44 = vpop.f32.mrb[35].mxu1 }

// kernel: sdnet_forward.7
= control target key start
LH: loop header
LB: loop body
LE: loop exit
PB: predicated region body
PF: predicated region fallthrough
CT: control target
= control target key end

     0   :  { %v2164_v0 = vmov 0.0   ;;  %vm2165_vm0 = vmmov 0   ;;  %vm87_vm1 = vcmask 523264   ;;  %vm366_vm2 = vcmask 1040384   ;;  %s2786_s3 = inlined_call_operand.vmem [shape: bf16[4,64,64], index: 3, kind: input, shape index: {}]   ;;  %s2787_s1 = inlined_call_operand.vmem [shape: f32[2,64], index: 1, kind: input, shape index: {}]   ;;  %s2788_s0 = inlined_call_operand.vmem [shape: f32[32,64], index: 0, kind: input, shape index: {}]   ;;  %s2789_s4 = inlined_call_operand.vmem [shape: f32[4,64], index: 4, kind: input, shape index: {}]   ;;  %s2790_s2 = inlined_call_operand.vmem [shape: f32[1,16], index: 2, kind: input, shape index: {}]   ;;  %s2791_s7 = inlined_call_operand.vmem [shape: bf16[64,192], index: 7, kind: input, shape index: {}]   ;;  %s2792_s5 = inlined_call_operand.vmem [shape: bf16[64,192], index: 5, kind: input, shape index: {}]   ;;  %s2793_s8 = inlined_call_operand.vmem [shape: f32[1,192], index: 8, kind: input, shape index: {}]   ;;  %s2794_s6 = inlined_call_operand.vmem [shape: f32[1,192], index: 6, kind: input, shape index: {}]   ;;  %s2795_s9 = inlined_call_operand.vmem [shape: bf16[64,64], index: 9, kind: input, shape index: {}]   ;;  %s2796_s10 = inlined_call_operand.vmem [shape: f32[1,64], index: 10, kind: input, shape index: {}]   ;;  %s2797_s11 = inlined_call_operand.vmem [shape: f32[3,64], index: 11, kind: input, shape index: {}]   ;;  %s2798_s13 = inlined_call_operand.vmem [shape: f32[2,2,16], index: 13, kind: output, shape index: {0}]   ;;  %s2799_s12 = inlined_call_operand.vmem [shape: f32[1,3], index: 12, kind: input, shape index: {}]   ;;  %s2800_s14 = inlined_call_operand.vmem [shape: f32[2,3], index: 14, kind: output, shape index: {1}]  }
   0x1   :  { %1912 = vmatprep.subr.bf16.mxu0 %v2164_v0  ;;  %1924 = vmatprep.subr.bf16.mxu1 %v2164_v0  ;;  %v2072_v1 = vld [vmem:[%s2786_s3] sm:$0xff]   ;;  %v2074_v3 = vld [vmem:[%s2786_s3 + $0x8] sm:$0xff]   ;;  %v2076_v5 = vld [vmem:[%s2786_s3 + $0x10] sm:$0xff]   ;;  %vm368_vm3 = vcmask 1041408   ;;  %vm370_vm4 = vcmask 1042432   ;;  %v2166_v54 = vmov 0   ;;  %v422_v55 = vlaneseq }
   0x2   :  { %v2073_v2 = vld [vmem:[%s2786_s3 + $0x20] sm:$0xff]   ;;  %1920 = vmatprep.mubr.msk.bf16.mxu0 %vm2165_vm0, %v2164_v0  ;;  %1932 = vmatprep.mubr.msk.bf16.mxu1 %vm2165_vm0, %v2164_v0  ;;  %v2075_v4 = vld [vmem:[%s2786_s3 + $0x28] sm:$0xff]   ;;  %v2077_v6 = vld [vmem:[%s2786_s3 + $0x30] sm:$0xff]   ;;  %vm428_vm7 = vcmask 125952   ;;  %vm441_vm8 = vcmask 130048   ;;  %vm838_vm9 = vcmask 122880  }
   0x3   :  { %1913 = vmatpush3.bf16.msra.mxu0 %v2072_v1  ;;  %1925 = vmatpush3.bf16.msra.mxu1 %v2073_v2  ;;  %v2078_v7 = vld [vmem:[%s2786_s3 + $0x18] sm:$0xff]   ;;  %v2277_v8 = vld [vmem:[%s2787_s1] sm:$0x1]  ;;  %v2082_v13 = vld [vmem:[%s2786_s3 + $0x48] sm:$0xff]   ;;  %v2373_v57 = vshrl.u32 %v422_v55, 7  ;;  %vm867_vm10 = vcmask 518146  }
   0x4   :  { %1914 = vmatprep.subr.bf16.mxu0 %v2164_v0  ;;  %1926 = vmatprep.subr.bf16.mxu1 %v2164_v0  ;;  %v2079_v9 = vld [vmem:[%s2786_s3 + $0x38] sm:$0xff]   ;;  %v2286_v10 = vpack.c.bf16 %v2277_v8, %v2277_v8  ;;  %v2080_v11 = vld [vmem:[%s2786_s3 + $0x40] sm:$0xff]   ;;  %v2083_v14 = vld [vmem:[%s2786_s3 + $0x68] sm:$0xff]   ;;  %vm857_vm11 = vcmask 123904   ;;  %vm871_vm12 = vcmask 519171   ;;  %vm863_vm13 = vcmask 517121  }
   0x5   :  { %v2081_v12 = vld [vmem:[%s2786_s3 + $0x60] sm:$0xff]   ;;  %v2084_v15 = vld [vmem:[%s2786_s3 + $0x50] sm:$0xff]   ;;  %v2086_v17 = vld [vmem:[%s2786_s3 + $0x58] sm:$0xff]   ;;  %v2377_v58 = vsub.s32 0, %v2373_v57  ;;  %vm881_vm14 = vcmask 7168   ;;  %vm883_vm15 = vcmask 15360  }
   0x6   :  { %v2085_v16 = vld [vmem:[%s2786_s3 + $0x70] sm:$0xff]   ;;  %v2087_v18 = vld [vmem:[%s2786_s3 + $0x78] sm:$0xff]   ;;  %v51_v19 = vld [vmem:[%s2788_s0] sm:$0xff] }
   0x7   :  { %1915 = vmatpush3.bf16.msra.mxu0 %v2074_v3  ;;  %1927 = vmatpush3.bf16.msra.mxu1 %v2075_v4  ;;  %v52_v20 = vld [vmem:[%s2788_s0 + $0x8] sm:$0xff]  ;;  %v2351_v23 = vld [vmem:[%s2789_s4] sm:$0xf] }
   0x8   :  { %1916 = vmatprep.subr.bf16.mxu0 %v2164_v0  ;;  %1928 = vmatprep.subr.bf16.mxu1 %v2164_v0  ;;  %v373_v21 = vpack.c.bf16 %v52_v20, %v51_v19  ;;  %v165_v24 = vrot.slane %v2351_v23, 1  ;;  %v240_v37 = vrot.slane %v2351_v23, 2  ;;  %v315_v38 = vrot.slane %v2351_v23, 3  ;;  %v2371_v56 = vld [vmem:[%s2790_s2] sm:$0x1]  ;;  %s2167_s2 = smov 64  }
   0x9   :  { %vm420_vm5 = vcmp.gt.f32.partialorder %v2371_v56, 0.5  ;;  %v2435_v19 = vld [vmem:[%s2792_s5 + $0x34] ss:$8 sps:$4 sm:$0xff]   ;;  %v2441_v20 = vld [vmem:[%s2792_s5 + $0x30] ss:$8 sps:$4 sm:$0xff]  }
   0xa   :  { %v2345_v22 = vsel %vm87_vm1, %v373_v21, 0  ;;  %v421_v59 = vsel %vm420_vm5, 1, %v2166_v54 }
   0xb   :  { %1917 = vmatpush3.bf16.msra.mxu0 %v2076_v5  ;;  %1929 = vmatpush3.bf16.msra.mxu1 %v2077_v6  ;;  %v425_v60 = vrot.slane %v421_v59, %v2377_v58 }
   0xc   :  { %1918 = vmatprep.subr.bf16.mxu0 %v2164_v0  ;;  %1930 = vmatprep.subr.bf16.mxu1 %v2164_v0 }
   0xd   :  { %vm2383_vm6 = vcmp.eq.s32.totalorder %v425_v60, 1 }
   0xf   :  { %1919 = vmatpush3.bf16.msra.mxu0 %v2078_v7  ;;  %1931 = vmatpush3.bf16.msra.mxu1 %v2079_v9 }
  0x10   :  { %1936 = vmatprep.subr.bf16.mxu0 %v2164_v0  ;;  %1948 = vmatprep.subr.bf16.mxu1 %v2164_v0 }
  0x12   :  { %1921 = vmatmul.mubr.msk.bf16.vlgmr.msra.gmra.mrb[0].mxu0 %vm87_vm1, %v2286_v10  ;;  %1933 = vmatmul.mubr.msk.bf16.vlgmr.msra.gmra.mrb[0].mxu1 %vm87_vm1, %v2286_v10 }
  0x13   :  { %1937 = vmatpush3.bf16.msra.mxu0 %v2080_v11  ;;  %1949 = vmatpush3.bf16.msra.mxu1 %v2081_v12  ;;  %v2394_v12 = vld [vmem:[%s2791_s7 + $0x4] ss:$8 sps:$4 sm:$0xff]  }
  0x14   :  { %1938 = vmatprep.subr.bf16.mxu0 %v2164_v0  ;;  %1950 = vmatprep.subr.bf16.mxu1 %v2164_v0 }
  0x15   :  { %1944 = vmatprep.mubr.msk.bf16.mxu0 %vm2165_vm0, %v2164_v0  ;;  %1956 = vmatprep.mubr.msk.bf16.mxu1 %vm2165_vm0, %v2164_v0 }
  0x17   :  { %1939 = vmatpush3.bf16.msra.mxu0 %v2082_v13  ;;  %1951 = vmatpush3.bf16.msra.mxu1 %v2083_v14  ;;  %v2399_v13 = vld [vmem:[%s2792_s5] ss:$8 sps:$4 sm:$0xff]   ;;  %v2404_v14 = vld [vmem:[%s2792_s5 + $0x4] ss:$8 sps:$4 sm:$0xff]  }
  0x18   :  { %1940 = vmatprep.subr.bf16.mxu0 %v2164_v0  ;;  %1952 = vmatprep.subr.bf16.mxu1 %v2164_v0 }
  0x1b   :  { %1941 = vmatpush3.bf16.msra.mxu0 %v2084_v15  ;;  %1953 = vmatpush3.bf16.msra.mxu1 %v2085_v16  ;;  %v2411_v15 = vld [vmem:[%s2792_s5 + $0x10] ss:$8 sps:$4 sm:$0xff]   ;;  %v2417_v16 = vld [vmem:[%s2792_s5 + $0x14] ss:$8 sps:$4 sm:$0xff]  }
  0x1c   :  { %1942 = vmatprep.subr.bf16.mxu0 %v2164_v0  ;;  %1954 = vmatprep.subr.bf16.mxu1 %v2164_v0 }
  0x1f   :  { %1943 = vmatpush3.bf16.msra.mxu0 %v2086_v17  ;;  %1955 = vmatpush3.bf16.msra.mxu1 %v2087_v18  ;;  %v2423_v17 = vld [vmem:[%s2792_s5 + $0x24] ss:$8 sps:$4 sm:$0xff]   ;;  %v2429_v18 = vld [vmem:[%s2792_s5 + $0x20] ss:$8 sps:$4 sm:$0xff]  }
  0x20   :  { %1960 = vmatprep.subr.bf16.mxu0 %v2164_v0  ;;  %1966 = vmatprep.subr.bf16.mxu1 %v2164_v0 }
  0x22   :  { %1945 = vmatmul.mubr.msk.bf16.vlgmr.msra.gmra.mrb[4].mxu0 %vm87_vm1, %v2286_v10  ;;  %1957 = vmatmul.mubr.msk.bf16.vlgmr.msra.gmra.mrb[4].mxu1 %vm87_vm1, %v2286_v10 }
  0x23   :  { %1962 = vmatprep.mubr.msk.bf16.mxu0 %vm2165_vm0, %v2164_v0  ;;  %1968 = vmatprep.mubr.msk.bf16.mxu1 %vm2165_vm0, %v2164_v0 }
  0x24   :  { %1967 = vmatpush3.bf16.msra.mxu1 %v373_v21 }
  0x25   :  { %650 = vmatprep.subr.bf16.mxu1 %v2394_v12 }
  0x28   :  { %1961 = vmatpush3.bf16.xpose.msra.mxu0 %v2345_v22 }
  0x29   :  { %549 = vmatprep.subr.bf16.mxu0 %v2404_v14 }
  0xe5   :  { %v125_v25 = vpop.f32.mrb[0].mxu0  ;;  %v201_v26 = vpop.f32.mrb[0].mxu1 }
  0xe6   :  { %v1922_v27 = vpop.f32.mrb[1].mxu0  ;;  %v126_v28 = vadd.f32 %v125_v25, %v2351_v23  ;;  %v202_v29 = vadd.f32 %v201_v26, %v165_v24  ;;  %v1934_v30 = vpop.f32.mrb[1].mxu1 }
  0xe7   :  { %v128_v31 = vpop.f32.mrb[2].mxu0  ;;  %v204_v32 = vpop.f32.mrb[2].mxu1  ;;  %v2451_v27 = vld [vmem:[%s2791_s7] ss:$8 sps:$4 sm:$0xff]   ;;  %v2465_v30 = vld [vmem:[%s2791_s7 + $0x10] ss:$8 sps:$4 sm:$0xff]  }
  0xe8   :  { %v1923_v33 = vpop.f32.mrb[3].mxu0  ;;  %v358_v34 = vrot.slane %v202_v29, 7  ;;  %v1935_v35 = vpop.f32.mrb[3].mxu1  ;;  %v2458_v29 = vld [vmem:[%s2791_s7 + $0x14] ss:$8 sps:$4 sm:$0xff]  }
  0xe9   :  { %v2472_v31 = vld [vmem:[%s2791_s7 + $0x24] ss:$8 sps:$4 sm:$0xff]   ;;  %v2478_v32 = vld [vmem:[%s2791_s7 + $0x20] ss:$8 sps:$4 sm:$0xff]   ;;  %v2484_v33 = vld [vmem:[%s2791_s7 + $0x34] ss:$8 sps:$4 sm:$0xff]  }
  0xea   :  { %v367_v36 = vsel %vm366_vm2, %v126_v28, %v358_v34  ;;  %v2490_v34 = vld [vmem:[%s2791_s7 + $0x30] ss:$8 sps:$4 sm:$0xff]  }
  0xf5   :  { %v276_v39 = vpop.f32.mrb[4].mxu0  ;;  %v351_v41 = vpop.f32.mrb[4].mxu1 }
  0xf6   :  { %v277_v40 = vadd.f32 %v276_v39, %v240_v37  ;;  %v1946_v42 = vpop.f32.mrb[5].mxu0  ;;  %v352_v43 = vadd.f32 %v351_v41, %v315_v38  ;;  %v1958_v44 = vpop.f32.mrb[5].mxu1 }
  0xf7   :  { %v279_v45 = vpop.f32.mrb[6].mxu0  ;;  %v354_v47 = vpop.f32.mrb[6].mxu1 }
  0xf8   :  { %v361_v46 = vrot.slane %v277_v40, 6  ;;  %v1947_v48 = vpop.f32.mrb[7].mxu0  ;;  %v364_v49 = vrot.slane %v352_v43, 5  ;;  %v1959_v50 = vpop.f32.mrb[7].mxu1  ;;  %v494_v45 = vld [vmem:[%s2794_s6] sm:$0x3] }
  0xf9   :  { %v539_v47 = vrot.slane %v494_v45, %v2377_v58 }
  0xfa   :  { %v369_v51 = vsel %vm368_vm3, %v367_v36, %v361_v46 }
  0xfb   :  { %v371_v52 = vsel %vm370_vm4, %v369_v51, %v364_v49 }
  0xfc   :  { %v372_v53 = vpack.c.bf16 %v371_v52, %v371_v52 }
  0xfe   :  { %1963 = vmatmul.mubr.msk.bf16.vlgmr.msra.gmra.mrb[8].mxu0 %vm87_vm1, %v372_v53 }
  0xff   :  { %581 = vmatprep.mubr.bf16.mxu0 %v2166_v54  ;;  %550 = vmatpush1.bf16.msra.mxu0 %v2399_v13 }
 0x100   :  { %551 = vmatprep.subr.bf16.mxu0 %v2417_v16 }
 0x103   :  { %552 = vmatpush1.bf16.msra.mxu0 %v2411_v15 }
 0x104   :  { %553 = vmatprep.subr.bf16.mxu0 %v2423_v17 }
 0x107   :  { %554 = vmatpush1.bf16.msra.mxu0 %v2429_v18 }
 0x108   :  { %555 = vmatprep.subr.bf16.mxu0 %v2435_v19 }
 0x10b   :  { %556 = vmatpush1.bf16.msra.mxu0 %v2441_v20 }
 0x10c   :  { %1972 = vmatprep.subr.bf16.mxu0 %v2164_v0 }
 0x1d1   :  { %v414_v62 = vpop.f32.mrb[8].mxu0 }
 0x1d2   :  { %v427_v63 = vsel %vm2383_vm6, -1e+30, %v414_v62  ;;  %v1964_v1 = vpop.f32.mrb[9].mxu0 }
 0x1d3   :  { %v417_v2 = vpop.f32.mrb[10].mxu0  ;;  %v429_v3 = vsel %vm428_vm7, %v427_v63, -inf }
 0x1d4   :  { %430 = vmax.xlane.f32.xlu0 %v429_v3  ;;  %v1965_v4 = vpop.f32.mrb[11].mxu0 }
 0x261   :  { %v431_v5 = vpop.xlane.xlu0 %430 }
 0x262   :  { %v432_v6 = vsub.f32 %v427_v63, %v431_v5  ;;  %v2517_v63 = vsub.s32 1, %v2373_v57  ;;  %v2113_v57 = vld [vmem:[%s2795_s9 + $0x8] sm:$0xff]  }
 0x264   :  { %v433_v7 = vmul.f32 1.442695, %v432_v6  ;;  %v543_v2 = vrot.slane %v494_v45, %v2517_v63  ;;  %v2122_v45 = vld [vmem:[%s2786_s3 + $0x38] sm:$0xff]  }
 0x266   :  { %2136 = vpow2.f32 %v433_v7 }
 0x270   :  { %v2137_v9 = vpop.eup %2136 }
 0x271   :  { %v435_v11 = vsel %vm428_vm7, %v2137_v9, 0.0 }
 0x272   :  { %436 = vadd.xlane.f32.xlu0 %v435_v11 }
 0x2ff   :  { %v437_v21 = vpop.xlane.xlu0 %436 }
 0x300   :  { %2138 = vrcp.f32 %v437_v21  ;;  %v2114_v21 = vld [vmem:[%s2795_s9 + $0x10] sm:$0xff]  }
 0x30a   :  { %v2139_v25 = vpop.eup %2138 }
 0x30b   :  { %v2446_v26 = vmul.f32 %v2139_v25, %v2137_v9  ;;  %v2112_v9 = vld [vmem:[%s2795_s9] sm:$0xff]   ;;  %v2115_v25 = vld [vmem:[%s2795_s9 + $0x18] sm:$0xff]  }
 0x30d   :  { %v440_v28 = vpack.c.bf16 %v2446_v26, %v2446_v26 }
 0x30f   :  { %1969 = vmatmul.mubr.msk.bf16.vlgmr.msra.gmra.mrb[8].mxu1 %vm441_vm8, %v440_v28 }
 0x310   :  { %651 = vmatpush1.bf16.msra.mxu1 %v2451_v27  ;;  %682 = vmatprep.mubr.bf16.mxu1 %v2166_v54 }
 0x311   :  { %652 = vmatprep.subr.bf16.mxu1 %v2458_v29 }
 0x314   :  { %653 = vmatpush1.bf16.msra.mxu1 %v2465_v30 }
 0x315   :  { %654 = vmatprep.subr.bf16.mxu1 %v2472_v31 }
 0x318   :  { %655 = vmatpush1.bf16.msra.mxu1 %v2478_v32 }
 0x319   :  { %656 = vmatprep.subr.bf16.mxu1 %v2484_v33 }
 0x31c   :  { %657 = vmatpush1.bf16.msra.mxu1 %v2490_v34 }
 0x31d   :  { %1984 = vmatprep.subr.bf16.mxu1 %v2164_v0 }
 0x31f   :  { %1769 = vmatmul.mubr.msk.bf16.vlgmr.msra.gmra.mrb[12].mxu1 %vm87_vm1, %v2286_v10 }
 0x320   :  { %1986 = vmatprep.mubr.msk.bf16.mxu1 %vm2165_vm0, %v2164_v0 }
 0x325   :  { %1985 = vmatpush3.bf16.xpose.msra.mxu1 %v2345_v22  ;;  %v598_v22 = vld [vmem:[%s2793_s8] sm:$0x3] }
 0x326   :  { %1990 = vmatprep.subr.bf16.mxu1 %v2164_v0  ;;  %v643_v46 = vrot.slane %v598_v22, %v2377_v58  ;;  %v647_v1 = vrot.slane %v598_v22, %v2517_v63  ;;  %v2120_v22 = vld [vmem:[%s2786_s3 + $0x30] sm:$0xff]  }
 0x3e2   :  { %v2501_v35 = vpop.f32.mrb[8].mxu1 }
 0x3e3   :  { %v493_v36 = vpack.c.bf16 %v2501_v35, %v2501_v35  ;;  %v1970_v39 = vpop.f32.mrb[9].mxu1 }
 0x3e4   :  { %v482_v40 = vpop.f32.mrb[10].mxu1 }
 0x3e5   :  { %v1971_v41 = vpop.f32.mrb[11].mxu1  ;;  %1760 = vmatmul.mubr.msk.bf16.vlgmr.msra.gmra.mrb[12].mxu0 %vm87_vm1, %v493_v36 }
 0x3e6   :  { %1980 = vmatprep.mubr.msk.bf16.mxu0 %vm2165_vm0, %v2164_v0  ;;  %1973 = vmatpush3.bf16.msra.mxu0 %v2112_v9  ;;  %v2129_v9 = vld [vmem:[%s2786_s3 + $0x50] sm:$0xff]  }
 0x3e7   :  { %1974 = vmatprep.subr.bf16.mxu0 %v2164_v0 }
 0x3ea   :  { %1975 = vmatpush3.bf16.msra.mxu0 %v2113_v57 }
 0x3eb   :  { %1976 = vmatprep.subr.bf16.mxu0 %v2164_v0 }
 0x3ee   :  { %1977 = vmatpush3.bf16.msra.mxu0 %v2114_v21 }
 0x3ef   :  { %1978 = vmatprep.subr.bf16.mxu0 %v2164_v0 }
 0x3f2   :  { %v684_v10 = vpop.f32.mrb[12].mxu1  ;;  %1979 = vmatpush3.bf16.msra.mxu0 %v2115_v25 }
 0x3f3   :  { %v686_v42 = vpop.f32.mrb[13].mxu1  ;;  %v685_v48 = vadd.f32 %v684_v10, %v643_v46  ;;  %2002 = vmatprep.subr.bf16.mxu0 %v2164_v0  ;;  %v2563_v46 = vld [vmem:[%s2787_s1 + $0x1] sm:$0x1] }
 0x3f4   :  { %v688_v43 = vpop.f32.mrb[14].mxu1  ;;  %v687_v3 = vadd.f32 %v686_v42, %v647_v1 }
 0x3f5   :  { %v689_v44 = vpop.f32.mrb[15].mxu1  ;;  %v2116_v43 = vld [vmem:[%s2786_s3 + $0x20] sm:$0xff]  }
 0x3f6   :  { %v2118_v44 = vld [vmem:[%s2786_s3 + $0x28] sm:$0xff]  }
 0x4b8   :  { %v583_v49 = vpop.f32.mrb[12].mxu0 }
 0x4b9   :  { %v584_v50 = vadd.f32 %v583_v49, %v539_v47  ;;  %v585_v51 = vpop.f32.mrb[13].mxu0  ;;  %v2567_v47 = vpack.c.bf16 %v2563_v46, %v2563_v46  ;;  %v2126_v49 = vld [vmem:[%s2786_s3 + $0x68] sm:$0xff]  }
 0x4ba   :  { %v587_v52 = vpop.f32.mrb[14].mxu0  ;;  %v586_v5 = vadd.f32 %v585_v51, %v543_v2  ;;  %v2130_v51 = vld [vmem:[%s2786_s3 + $0x78] sm:$0xff]  }
 0x4bb   :  { %v691_v53 = vadd.f32 %v685_v48, %v584_v50  ;;  %v588_v55 = vpop.f32.mrb[15].mxu0  ;;  %v2124_v48 = vld [vmem:[%s2786_s3 + $0x60] sm:$0xff]   ;;  %v2128_v50 = vld [vmem:[%s2786_s3 + $0x70] sm:$0xff]  }
 0x4bc   :  { %v722_v52 = vld [vmem:[%s2796_s10] sm:$0x1] }
 0x4bd   :  { %v1770_v59 = vmul.f32 -1.442695, %v691_v53 }
 0x4bf   :  { %2140 = vpow2.f32 %v1770_v59 }
 0x4c9   :  { %v2141_v60 = vpop.eup %2140 }
 0x4ca   :  { %v695_v62 = vadd.f32 1.0, %v2141_v60 }
 0x4cc   :  { %2142 = vrcp.f32 %v695_v62  ;;  %v2117_v62 = vld [vmem:[%s2786_s3] sm:$0xff]  }
 0x4d6   :  { %v2143_v4 = vpop.eup %2142 }
 0x4d7   :  { %v698_v6 = vmul.f32 %v2143_v4, %v687_v3  ;;  %v701_v36 = vsub.f32 1.0, %v2143_v4  ;;  %v2119_v3 = vld [vmem:[%s2786_s3 + $0x8] sm:$0xff]  }
 0x4d9   :  { %v699_v7 = vadd.f32 %v698_v6, %v586_v5  ;;  %v2123_v5 = vld [vmem:[%s2786_s3 + $0x18] sm:$0xff]   ;;  %v2125_v6 = vld [vmem:[%s2786_s3 + $0x40] sm:$0xff]  }
 0x4db   :  { %2144 = vtanh.f32 %v699_v7  ;;  %v2127_v7 = vld [vmem:[%s2786_s3 + $0x48] sm:$0xff]  }
 0x4e5   :  { %v2145_v11 = vpop.eup %2144 }
 0x4e6   :  { %703 = vrot.lane.b32.xlu1 %v2145_v11, %s2167_s2  ;;  %v2131_v11 = vld [vmem:[%s2786_s3 + $0x58] sm:$0xff]  }
 0x4ea   :  { %708 = vrot.lane.b32.xlu1 %v2277_v8, %s2167_s2 }
 0x558   :  { %v704_v28 = vpop.permute.xlu1 %703 }
 0x559   :  { %v706_v39 = vmul.f32 %v704_v28, %v701_v36  ;;  %v894_v36 = vld [vmem:[%s2788_s0 + $0x10] sm:$0xff] }
 0x55c   :  { %v709_v8 = vpop.permute.xlu1 %708 }
 0x55d   :  { %v711_v40 = vmul.f32 %v2143_v4, %v709_v8  ;;  %v2121_v4 = vld [vmem:[%s2786_s3 + $0x10] sm:$0xff]   ;;  %v895_v8 = vld [vmem:[%s2788_s0 + $0x18] sm:$0xff] }
 0x55f   :  { %v712_v41 = vadd.f32 %v711_v40, %v706_v39  ;;  %v1202_v40 = vpack.c.bf16 %v895_v8, %v894_v36 }
 0x561   :  { %v721_v10 = vpack.c.bf16 %v712_v41, %v712_v41 }
 0x563   :  { %724 = vrot.lane.b32.xlu0 %v721_v10, %s2167_s2 }
 0x5d5   :  { %v725_v42 = vpop.permute.xlu0 %724 }
 0x5d6   :  { %1981 = vmatmul.mubr.msk.bf16.vlgmr.msra.gmra.mrb[16].mxu0 %vm87_vm1, %v725_v42  ;;  %v2646_v42 = vsel %vm87_vm1, %v1202_v40, 0 }
 0x5d7   :  { %2010 = vmatprep.mubr.msk.bf16.mxu0 %vm2165_vm0, %v2164_v0  ;;  %2003 = vmatpush3.bf16.msra.mxu0 %v2116_v43 }
 0x5d8   :  { %2004 = vmatprep.subr.bf16.mxu0 %v2164_v0 }
 0x5db   :  { %2005 = vmatpush3.bf16.msra.mxu0 %v2118_v44 }
 0x5dc   :  { %2006 = vmatprep.subr.bf16.mxu0 %v2164_v0 }
 0x5df   :  { %2007 = vmatpush3.bf16.msra.mxu0 %v2120_v22 }
 0x5e0   :  { %2008 = vmatprep.subr.bf16.mxu0 %v2164_v0 }
 0x5e3   :  { %2009 = vmatpush3.bf16.msra.mxu0 %v2122_v45 }
 0x5e4   :  { %2026 = vmatprep.subr.bf16.mxu0 %v2164_v0 }
 0x5e6   :  { %2011 = vmatmul.mubr.msk.bf16.vlgmr.msra.gmra.mrb[20].mxu0 %vm87_vm1, %v2567_v47 }
 0x5e7   :  { %2027 = vmatpush3.bf16.msra.mxu0 %v2124_v48  ;;  %2034 = vmatprep.mubr.msk.bf16.mxu0 %vm2165_vm0, %v2164_v0 }
 0x5e8   :  { %2028 = vmatprep.subr.bf16.mxu0 %v2164_v0 }
 0x5eb   :  { %2029 = vmatpush3.bf16.msra.mxu0 %v2126_v49 }
 0x5ec   :  { %2030 = vmatprep.subr.bf16.mxu0 %v2164_v0 }
 0x5ef   :  { %2031 = vmatpush3.bf16.msra.mxu0 %v2128_v50 }
 0x5f0   :  { %2032 = vmatprep.subr.bf16.mxu0 %v2164_v0 }
 0x5f3   :  { %2033 = vmatpush3.bf16.msra.mxu0 %v2130_v51 }
 0x5f4   :  { %2044 = vmatprep.subr.bf16.mxu0 %v2164_v0 }
 0x5f6   :  { %2035 = vmatmul.mubr.msk.bf16.vlgmr.msra.gmra.mrb[24].mxu0 %vm87_vm1, %v2567_v47 }
 0x5f7   :  { %2046 = vmatprep.mubr.msk.bf16.mxu0 %vm2165_vm0, %v2164_v0  ;;  %2045 = vmatpush3.bf16.msra.mxu0 %v1202_v40 }
 0x5f8   :  { %1470 = vmatprep.subr.bf16.mxu0 %v2394_v12 }
 0x6a9   :  { %v787_v53 = vpop.f32.mrb[16].mxu0 }
 0x6aa   :  { %v788_v55 = vadd.f32 %v787_v53, %v722_v52  ;;  %v1982_v59 = vpop.f32.mrb[17].mxu0 }
 0x6ab   :  { %v790_v60 = vpop.f32.mrb[18].mxu0 }
 0x6ac   :  { %v793_v1 = vpack.c.bf16 %v788_v55, %v788_v55  ;;  %v1983_v2 = vpop.f32.mrb[19].mxu0 }
 0x6ae   :  { %1987 = vmatmul.mubr.msk.bf16.vlgmr.msra.gmra.mrb[16].mxu1 %vm87_vm1, %v793_v1 }
 0x6af   :  { %1991 = vmatpush3.bf16.msra.mxu1 %v2117_v62  ;;  %1998 = vmatprep.mubr.msk.bf16.mxu1 %vm2165_vm0, %v2164_v0 }
 0x6b0   :  { %1992 = vmatprep.subr.bf16.mxu1 %v2164_v0 }
 0x6b3   :  { %1993 = vmatpush3.bf16.msra.mxu1 %v2119_v3 }
 0x6b4   :  { %1994 = vmatprep.subr.bf16.mxu1 %v2164_v0 }
 0x6b7   :  { %1995 = vmatpush3.bf16.msra.mxu1 %v2121_v4 }
 0x6b8   :  { %1996 = vmatprep.subr.bf16.mxu1 %v2164_v0 }
 0x6b9   :  { %v1039_v57 = vpop.f32.mrb[20].mxu0 }
 0x6ba   :  { %v2012_v21 = vpop.f32.mrb[21].mxu0  ;;  %v1040_v49 = vadd.f32 %v1039_v57, %v165_v24 }
 0x6bb   :  { %1997 = vmatpush3.bf16.msra.mxu1 %v2123_v5  ;;  %v1042_v25 = vpop.f32.mrb[22].mxu0 }
 0x6bc   :  { %2014 = vmatprep.subr.bf16.mxu1 %v2164_v0  ;;  %v2013_v28 = vpop.f32.mrb[23].mxu0  ;;  %v1190_v50 = vrot.slane %v1040_v49, 7  ;;  %v1314_v25 = vld [vmem:[%s2794_s6] sm:$0x3] }
 0x6bd   :  { %v1359_v36 = vrot.slane %v1314_v25, %v2377_v58 }
 0x6be   :  { %1999 = vmatmul.mubr.msk.bf16.vlgmr.msra.gmra.mrb[20].mxu1 %vm87_vm1, %v2567_v47 }
 0x6bf   :  { %2015 = vmatpush3.bf16.msra.mxu1 %v2125_v6  ;;  %2022 = vmatprep.mubr.msk.bf16.mxu1 %vm2165_vm0, %v2164_v0 }
 0x6c0   :  { %2016 = vmatprep.subr.bf16.mxu1 %v2164_v0 }
 0x6c3   :  { %2017 = vmatpush3.bf16.msra.mxu1 %v2127_v7 }
 0x6c4   :  { %2018 = vmatprep.subr.bf16.mxu1 %v2164_v0 }
 0x6c7   :  { %2019 = vmatpush3.bf16.msra.mxu1 %v2129_v9 }
 0x6c8   :  { %2020 = vmatprep.subr.bf16.mxu1 %v2164_v0 }
 0x6c9   :  { %v1183_v39 = vpop.f32.mrb[24].mxu0 }
 0x6ca   :  { %v2036_v41 = vpop.f32.mrb[25].mxu0  ;;  %v1184_v12 = vadd.f32 %v1183_v39, %v315_v38 }
 0x6cb   :  { %2021 = vmatpush3.bf16.msra.mxu1 %v2131_v11  ;;  %v1186_v10 = vpop.f32.mrb[26].mxu0 }
 0x6cc   :  { %2038 = vmatprep.subr.bf16.mxu1 %v2164_v0  ;;  %v2037_v43 = vpop.f32.mrb[27].mxu0  ;;  %v1196_v2 = vrot.slane %v1184_v12, 5  ;;  %v2132_v12 = vld [vmem:[%s2795_s9] sm:$0xff]  }
 0x6ce   :  { %2023 = vmatmul.mubr.msk.bf16.vlgmr.msra.gmra.mrb[24].mxu1 %vm87_vm1, %v2567_v47 }
 0x6cf   :  { %2040 = vmatprep.mubr.msk.bf16.mxu1 %vm2165_vm0, %v2164_v0 }
 0x6d4   :  { %2039 = vmatpush3.bf16.xpose.msra.mxu1 %v2646_v42 }
 0x6d5   :  { %1369 = vmatprep.subr.bf16.mxu1 %v2404_v14 }
 0x781   :  { %v2651_v44 = vpop.f32.mrb[16].mxu1 }
 0x782   :  { %v1988_v22 = vpop.f32.mrb[17].mxu1 }
 0x783   :  { %v834_v45 = vpop.f32.mrb[18].mxu1 }
 0x784   :  { %v1989_v48 = vpop.f32.mrb[19].mxu1 }
 0x791   :  { %v967_v51 = vpop.f32.mrb[20].mxu1 }
 0x792   :  { %v968_v52 = vadd.f32 %v967_v51, %v2351_v23  ;;  %v2000_v53 = vpop.f32.mrb[21].mxu1 }
 0x793   :  { %v970_v55 = vpop.f32.mrb[22].mxu1 }
 0x794   :  { %v1198_v59 = vsel %vm366_vm2, %v968_v52, %v1190_v50  ;;  %v2001_v60 = vpop.f32.mrb[23].mxu1  ;;  %v1363_v50 = vrot.slane %v1314_v25, %v2517_v63 }
 0x7a1   :  { %v1111_v14 = vpop.f32.mrb[24].mxu1 }
 0x7a2   :  { %v1112_v62 = vadd.f32 %v1111_v14, %v240_v37  ;;  %v2024_v1 = vpop.f32.mrb[25].mxu1  ;;  %v2133_v14 = vld [vmem:[%s2795_s9 + $0x8] sm:$0xff]  }
 0x7a3   :  { %v1114_v3 = vpop.f32.mrb[26].mxu1 }
 0x7a4   :  { %v1193_v24 = vrot.slane %v1112_v62, 6  ;;  %v2025_v4 = vpop.f32.mrb[27].mxu1  ;;  %v2135_v62 = vld [vmem:[%s2795_s9 + $0x18] sm:$0xff]  }
 0x7a6   :  { %v1199_v5 = vsel %vm368_vm3, %v1198_v59, %v1193_v24 }
 0x7a7   :  { %v1200_v6 = vsel %vm370_vm4, %v1199_v5, %v1196_v2 }
 0x7a8   :  { %v1201_v7 = vpack.c.bf16 %v1200_v6, %v1200_v6 }
 0x7aa   :  { %2041 = vmatmul.mubr.msk.bf16.vlgmr.msra.gmra.mrb[28].mxu1 %vm87_vm1, %v1201_v7  ;;  %v837_v7 = vsel %vm420_vm5, -1e+30, %v2651_v44 }
 0x7ab   :  { %1370 = vmatpush1.bf16.msra.mxu1 %v2399_v13  ;;  %1401 = vmatprep.mubr.bf16.mxu1 %v2166_v54 }
 0x7ac   :  { %1371 = vmatprep.subr.bf16.mxu1 %v2417_v16 }
 0x7af   :  { %1372 = vmatpush1.bf16.msra.mxu1 %v2411_v15 }
 0x7b0   :  { %1373 = vmatprep.subr.bf16.mxu1 %v2423_v17 }
 0x7b3   :  { %1374 = vmatpush1.bf16.msra.mxu1 %v2429_v18 }
 0x7b4   :  { %1375 = vmatprep.subr.bf16.mxu1 %v2435_v19 }
 0x7b7   :  { %1376 = vmatpush1.bf16.msra.mxu1 %v2441_v20 }
 0x7b8   :  { %2050 = vmatprep.subr.bf16.mxu1 %v2164_v0 }
 0x87d   :  { %v1243_v23 = vpop.f32.mrb[28].mxu1 }
 0x87e   :  { %v1249_v37 = vsel %vm2383_vm6, -1e+30, %v1243_v23  ;;  %v2042_v38 = vpop.f32.mrb[29].mxu1  ;;  %v839_v23 = vsel %vm838_vm9, %v837_v7, -inf }
 0x87f   :  { %v1246_v13 = vpop.f32.mrb[30].mxu1  ;;  %v1250_v16 = vsel %vm428_vm7, %v1249_v37, -inf }
 0x880   :  { %1251 = vmax.xlane.f32.xlu1 %v1250_v16  ;;  %v2043_v15 = vpop.f32.mrb[31].mxu1  ;;  %v49_v16 = vld [vmem:[%s2797_s11] sm:$0x7] }
 0x881   :  { %v860_v15 = vrot.slane %v49_v16, 7 }
 0x90d   :  { %v1252_v9 = vpop.xlane.xlu1 %1251 }
 0x90e   :  { %v1253_v17 = vsub.f32 %v1249_v37, %v1252_v9 }
 0x910   :  { %v1254_v11 = vmul.f32 1.442695, %v1253_v17  ;;  %v862_v17 = vmul.f32 %v860_v15, %v2501_v35 }
 0x912   :  { %2146 = vpow2.f32 %v1254_v11  ;;  %v868_v11 = vsel %vm867_vm10, %v862_v17, 0.0 }
 0x91c   :  { %v2147_v18 = vpop.eup %2146 }
 0x91d   :  { %v1256_v19 = vsel %vm428_vm7, %v2147_v18, 0.0 }
 0x91e   :  { %1257 = vadd.xlane.f32.xlu0 %v1256_v19 }
 0x934   :  { %1528 = vrot.lane.b32.xlu0 %v2563_v46, %s2167_s2 }
 0x9ab   :  { %v1258_v20 = vpop.xlane.xlu0 %1257 }
 0x9ac   :  { %2148 = vrcp.f32 %v1258_v20 }
 0x9af   :  { %v1529_v1 = vpop.permute.xlu0 %1528 }
 0x9b6   :  { %v2149_v61 = vpop.eup %2148 }
 0x9b7   :  { %v2679_v57 = vmul.f32 %v2149_v61, %v2147_v18  ;;  %v1542_v18 = vld [vmem:[%s2796_s10] sm:$0x1] }
 0x9b9   :  { %v1261_v21 = vpack.c.bf16 %v2679_v57, %v2679_v57 }
 0x9bb   :  { %2047 = vmatmul.mubr.msk.bf16.vlgmr.msra.gmra.mrb[28].mxu0 %vm441_vm8, %v1261_v21 }
 0x9bc   :  { %1471 = vmatpush1.bf16.msra.mxu0 %v2451_v27  ;;  %1502 = vmatprep.mubr.bf16.mxu0 %v2166_v54 }
 0x9bd   :  { %1472 = vmatprep.subr.bf16.mxu0 %v2458_v29 }
 0x9c0   :  { %1473 = vmatpush1.bf16.msra.mxu0 %v2465_v30 }
 0x9c1   :  { %1474 = vmatprep.subr.bf16.mxu0 %v2472_v31 }
 0x9c4   :  { %1475 = vmatpush1.bf16.msra.mxu0 %v2478_v32 }
 0x9c5   :  { %1476 = vmatprep.subr.bf16.mxu0 %v2484_v33 }
 0x9c8   :  { %1477 = vmatpush1.bf16.msra.mxu0 %v2490_v34 }
 0x9c9   :  { %2062 = vmatprep.subr.bf16.mxu0 %v2164_v0 }
 0x9cb   :  { %1841 = vmatmul.mubr.msk.bf16.vlgmr.msra.gmra.mrb[32].mxu0 %vm87_vm1, %v2567_v47  ;;  %v1418_v47 = vld [vmem:[%s2793_s8] sm:$0x3] }
 0x9cc   :  { %2064 = vmatprep.mubr.msk.bf16.mxu0 %vm2165_vm0, %v2164_v0  ;;  %v1463_v28 = vrot.slane %v1418_v47, %v2377_v58  ;;  %v1467_v49 = vrot.slane %v1418_v47, %v2517_v63  ;;  %v2134_v63 = vld [vmem:[%s2795_s9 + $0x10] sm:$0xff]  }
 0x9d1   :  { %2063 = vmatpush3.bf16.xpose.msra.mxu0 %v2646_v42 }
 0xa8e   :  { %v2698_v54 = vpop.f32.mrb[28].mxu0 }
 0xa8f   :  { %v1313_v27 = vpack.c.bf16 %v2698_v54, %v2698_v54  ;;  %v2048_v29 = vpop.f32.mrb[29].mxu0 }
 0xa90   :  { %v1302_v30 = vpop.f32.mrb[30].mxu0 }
 0xa91   :  { %v2049_v31 = vpop.f32.mrb[31].mxu0  ;;  %1832 = vmatmul.mubr.msk.bf16.vlgmr.msra.gmra.mrb[32].mxu1 %vm87_vm1, %v1313_v27 }
 0xa92   :  { %2058 = vmatprep.mubr.msk.bf16.mxu1 %vm2165_vm0, %v2164_v0  ;;  %2051 = vmatpush3.bf16.msra.mxu1 %v2132_v12  ;;  %vm892_vm0 = vcmask 17409  }
 0xa93   :  { %2052 = vmatprep.subr.bf16.mxu1 %v2164_v0 }
 0xa96   :  { %2053 = vmatpush3.bf16.msra.mxu1 %v2133_v14 }
 0xa97   :  { %2054 = vmatprep.subr.bf16.mxu1 %v2164_v0 }
 0xa9a   :  { %2055 = vmatpush3.bf16.msra.mxu1 %v2134_v63 }
 0xa9b   :  { %2056 = vmatprep.subr.bf16.mxu1 %v2164_v0 }
 0xa9e   :  { %v1504_v32 = vpop.f32.mrb[32].mxu0  ;;  %2057 = vmatpush3.bf16.msra.mxu1 %v2135_v62 }
 0xa9f   :  { %v1506_v33 = vpop.f32.mrb[33].mxu0  ;;  %v1505_v8 = vadd.f32 %v1504_v32, %v1463_v28 }
 0xaa0   :  { %v1508_v34 = vpop.f32.mrb[34].mxu0  ;;  %v1507_v51 = vadd.f32 %v1506_v33, %v1467_v49 }
 0xaa1   :  { %v1509_v46 = vpop.f32.mrb[35].mxu0 }
 0xb64   :  { %v1403_v39 = vpop.f32.mrb[32].mxu1 }
 0xb65   :  { %v1404_v40 = vadd.f32 %v1403_v39, %v1359_v36  ;;  %v1405_v41 = vpop.f32.mrb[33].mxu1 }
 0xb66   :  { %v1407_v10 = vpop.f32.mrb[34].mxu1  ;;  %v1406_v53 = vadd.f32 %v1405_v41, %v1363_v50 }
 0xb67   :  { %v1511_v42 = vadd.f32 %v1505_v8, %v1404_v40  ;;  %v1408_v43 = vpop.f32.mrb[35].mxu1  ;;  %v872_v8 = vsel %vm871_vm12, %v862_v17, 0.0 }
 0xb69   :  { %v1842_v22 = vmul.f32 -1.442695, %v1511_v42 }
 0xb6b   :  { %2150 = vpow2.f32 %v1842_v22  ;;  %v1777_v22 = vld [vmem:[%s2799_s12] ss:$0 sm:$0xff] }
 0xb75   :  { %v2151_v45 = vpop.eup %2150 }
 0xb76   :  { %v1515_v48 = vadd.f32 1.0, %v2151_v45 }
 0xb78   :  { %2152 = vrcp.f32 %v1515_v48 }
 0xb82   :  { %v2153_v52 = vpop.eup %2152 }
 0xb83   :  { %v1518_v55 = vmul.f32 %v2153_v52, %v1507_v51  ;;  %v1521_v2 = vsub.f32 1.0, %v2153_v52  ;;  %v1531_v24 = vmul.f32 %v2153_v52, %v1529_v1  ;;  %v1678_v52 = vmul.f32 %v2698_v54, %v860_v15 }
 0xb85   :  { %v1519_v59 = vadd.f32 %v1518_v55, %v1406_v53  ;;  %v1682_v55 = vsel %vm867_vm10, %v1678_v52, 0.0 }
 0xb87   :  { %2154 = vtanh.f32 %v1519_v59  ;;  %v1685_v59 = vsel %vm871_vm12, %v1678_v52, 0.0 }
 0xb91   :  { %v2155_v60 = vpop.eup %2154 }
 0xb92   :  { %1523 = vrot.lane.b32.xlu1 %v2155_v60, %s2167_s2  ;;  %v1679_v60 = vsel %vm863_vm13, %v1678_v52, 0.0 }
 0xc04   :  { %v1524_v3 = vpop.permute.xlu1 %1523 }
 0xc05   :  { %v1526_v4 = vmul.f32 %v1524_v3, %v1521_v2 }
 0xc07   :  { %v1532_v5 = vadd.f32 %v1531_v24, %v1526_v4 }
 0xc09   :  { %v1541_v6 = vpack.c.bf16 %v1532_v5, %v1532_v5 }
 0xc0b   :  { %1544 = vrot.lane.b32.xlu1 %v1541_v6, %s2167_s2 }
 0xc2f   :  { %840 = vmax.xlane.f32.xlu1 %v839_v23 }
 0xc7d   :  { %v1545_v37 = vpop.permute.xlu1 %1544 }
 0xc7e   :  { %2059 = vmatmul.mubr.msk.bf16.vlgmr.msra.gmra.mrb[36].mxu1 %vm87_vm1, %v1545_v37 }
 0xcbc   :  { %v841_v0 = vpop.xlane.xlu1 %840 }
 0xcbd   :  { %v842_v38 = vsub.f32 %v837_v7, %v841_v0 }
 0xcbf   :  { %v843_v13 = vmul.f32 1.442695, %v842_v38 }
 0xcc1   :  { %2156 = vpow2.f32 %v843_v13 }
 0xccb   :  { %v2157_v9 = vpop.eup %2156 }
 0xccc   :  { %v845_v44 = vsel %vm838_vm9, %v2157_v9, 0.0 }
 0xccd   :  { %846 = vadd.xlane.f32.xlu1 %v845_v44 }
 0xcd1   :  { %869 = vadd.xlane.f32.xlu1 %v868_v11 }
 0xd51   :  { %v1607_v19 = vpop.f32.mrb[36].mxu1 }
 0xd52   :  { %v1608_v20 = vadd.f32 %v1607_v19, %v1542_v18  ;;  %v2060_v61 = vpop.f32.mrb[37].mxu1 }
 0xd53   :  { %v1610_v21 = vpop.f32.mrb[38].mxu1 }
 0xd54   :  { %v1613_v27 = vpack.c.bf16 %v1608_v20, %v1608_v20  ;;  %v2061_v29 = vpop.f32.mrb[39].mxu1 }
 0xd56   :  { %2065 = vmatmul.mubr.msk.bf16.vlgmr.msra.gmra.mrb[36].mxu0 %vm87_vm1, %v1613_v27 }
 0xd5a   :  { %v847_v35 = vpop.xlane.xlu1 %846 }
 0xd5b   :  { %2158 = vrcp.f32 %v847_v35 }
 0xd5e   :  { %v870_v10 = vpop.xlane.xlu1 %869 }
 0xd5f   :  { %v876_v42 = vrot.slane %v870_v10, 1 }
 0xd65   :  { %v2159_v30 = vpop.eup %2158 }
 0xd66   :  { %v849_v31 = vmul.f32 %v2159_v30, %v2157_v9 }
 0xd68   :  { %v854_v32 = vrot.slane %v849_v31, %v2377_v58 }
 0xd6a   :  { %v856_v33 = vsel %vm366_vm2, %v2446_v26, %v854_v32  ;;  %v864_v26 = vsel %vm863_vm13, %v862_v17, 0.0 }
 0xd6b   :  { %858 = vst.msk [vmem:[%s2798_s13] sm:$0x3] %vm857_vm11, %v856_v33 }
 0xe29   :  { %v1651_v34 = vpop.f32.mrb[36].mxu0 }
 0xe2a   :  { %v1657_v46 = vsel %vm420_vm5, -1e+30, %v1651_v34  ;;  %v2066_v47 = vpop.f32.mrb[37].mxu0 }
 0xe2b   :  { %v1654_v25 = vpop.f32.mrb[38].mxu0  ;;  %v1658_v28 = vsel %vm838_vm9, %v1657_v46, -inf }
 0xe2c   :  { %1659 = vmax.xlane.f32.xlu0 %v1658_v28  ;;  %v2067_v36 = vpop.f32.mrb[39].mxu0 }
 0xe30   :  { %873 = vadd.xlane.f32.xlu0 %v872_v8 }
 0xe34   :  { %865 = vadd.xlane.f32.xlu0 %v864_v26 }
 0xeb9   :  { %v1660_v39 = vpop.xlane.xlu0 %1659 }
 0xeba   :  { %v1661_v40 = vsub.f32 %v1657_v46, %v1660_v39 }
 0xebc   :  { %v1662_v41 = vmul.f32 1.442695, %v1661_v40 }
 0xebd   :  { %v874_v56 = vpop.xlane.xlu0 %873 }
 0xebe   :  { %2160 = vpow2.f32 %v1662_v41  ;;  %v879_v43 = vrot.slane %v874_v56, 2 }
 0xec1   :  { %v866_v45 = vpop.xlane.xlu0 %865 }
 0xec2   :  { %v882_v48 = vsel %vm881_vm14, %v866_v45, %v876_v42 }
 0xec3   :  { %v884_v49 = vsel %vm883_vm15, %v882_v48, %v879_v43 }
 0xec4   :  { %v891_v50 = vadd.f32 %v1777_v22, %v884_v49 }
 0xec6   :  { %893 = vst.msk [vmem:[%s2800_s14 - $0x1] sm:$0x2] %vm892_vm0, %v891_v50 }
 0xec8   :  { %v2161_v51 = vpop.eup %2160 }
 0xec9   :  { %v1664_v53 = vsel %vm838_vm9, %v2161_v51, 0.0 }
 0xeca   :  { %1665 = vadd.xlane.f32.xlu1 %v1664_v53 }
 0xece   :  { %1683 = vadd.xlane.f32.xlu1 %v1682_v55 }
 0xed2   :  { %1686 = vadd.xlane.f32.xlu1 %v1685_v59 }
 0xed6   :  { %1680 = vadd.xlane.f32.xlu1 %v1679_v60 }
 0xf57   :  { %v1666_v12 = vpop.xlane.xlu1 %1665 }
 0xf58   :  { %2162 = vrcp.f32 %v1666_v12 }
 0xf5b   :  { %v1684_v14 = vpop.xlane.xlu1 %1683 }
 0xf5c   :  { %v1689_v1 = vrot.slane %v1684_v14, 1 }
 0xf5f   :  { %v1687_v63 = vpop.xlane.xlu1 %1686 }
 0xf60   :  { %v1692_v54 = vrot.slane %v1687_v63, 2 }
 0xf62   :  { %v2163_v62 = vpop.eup %2162 }
 0xf63   :  { %v1668_v2 = vmul.f32 %v2163_v62, %v2161_v51  ;;  %v1681_v3 = vpop.xlane.xlu1 %1680 }
 0xf64   :  { %v1694_v24 = vsel %vm881_vm14, %v1681_v3, %v1689_v1 }
 0xf65   :  { %v1673_v4 = vrot.slane %v1668_v2, %v2377_v58  ;;  %v1695_v5 = vsel %vm883_vm15, %v1694_v24, %v1692_v54 }
 0xf66   :  { %v1696_v6 = vadd.f32 %v1777_v22, %v1695_v5 }
 0xf67   :  { %v1675_v7 = vsel %vm366_vm2, %v2679_v57, %v1673_v4 }
 0xf68   :  { %1849 = vst.msk [vmem:[%s2798_s13 + $0x2] sm:$0x3] %vm857_vm11, %v1675_v7 }
 0xf69   :  { %1697 = vst.msk [vmem:[%s2800_s14] sm:$0x2] %vm892_vm0, %v1696_v6 }

// kernel: sdnet_forward.6
= control target key start
LH: loop header
LB: loop body
LE: loop exit
PB: predicated region body
PF: predicated region fallthrough
CT: control target
= control target key end

     0   :  { %v3129_v2 = vmov 0.0   ;;  %vm3130_vm0 = vmmov 0   ;;  %s3131_s19 = smov 32   ;;  %vm111_vm1 = vcmask 785408   ;;  %vm170_vm2 = vcmask 261120   ;;  %s3133_s26 = smov 64   ;;  %s3974_s1 = inlined_call_operand.vmem [shape: f32[32,64], index: 1, kind: input, shape index: {}]   ;;  %s3975_s6 = inlined_call_operand.vmem [shape: bf16[96,96], index: 6, kind: input, shape index: {}]   ;;  %s3976_s2 = inlined_call_operand.vmem [shape: f32[16,96], index: 2, kind: input, shape index: {}]   ;;  %s3977_s0 = inlined_call_operand.vmem [shape: f32[16,32], index: 0, kind: input, shape index: {}]   ;;  %s3978_s7 = inlined_call_operand.vmem [shape: f32[1,96], index: 7, kind: input, shape index: {}]   ;;  %s3979_s4 = inlined_call_operand.vmem [shape: f32[2,8], index: 4, kind: input, shape index: {}]   ;;  %s3980_s3 = inlined_call_operand.vmem [shape: f32[16,128], index: 3, kind: input, shape index: {}]   ;;  %s3981_s8 = inlined_call_operand.vmem [shape: bf16[192,64], index: 8, kind: input, shape index: {}]   ;;  %s3982_s10 = inlined_call_operand.vmem [shape: bf16[288,32], index: 10, kind: input, shape index: {}]   ;;  %s3983_s9 = inlined_call_operand.vmem [shape: f32[1,64], index: 9, kind: input, shape index: {}]   ;;  %s3984_s11 = inlined_call_operand.vmem [shape: f32[1,32], index: 11, kind: input, shape index: {}]   ;;  %s3985_s5 = inlined_call_operand.vmem [shape: f32[1,16], index: 5, kind: input, shape index: {}]   ;;  %s3986_s12 = inlined_call_operand.vmem [shape: bf16[128,64], index: 12, kind: input, shape index: {}]   ;;  %s3987_s13 = inlined_call_operand.vmem [shape: f32[1,64], index: 13, kind: input, shape index: {}]   ;;  %s3988_s14 = inlined_call_operand.vmem [shape: f32[32,64], index: 14, kind: output, shape index: {}]  }
   0x1   :  { %v3213_v0 = vld [vmem:[%s3974_s1] sm:$0xff]  ;;  %v3218_v1 = vld [vmem:[%s3974_s1 + $0x8] sm:$0xff]  ;;  %2708 = vmatprep.subr.bf16.mxu0 %v3129_v2  ;;  %2724 = vmatprep.subr.bf16.mxu1 %v3129_v2  ;;  %v2976_v6 = vld [vmem:[%s3975_s6 + $0x10] sm:$0xff]   ;;  %v53_v38 = vlaneseq  ;;  %v3132_v42 = vmov 0   ;;  %vm287_vm5 = vcmask 64512   ;;  %s3134_s29 = smov 96  }
   0x2   :  { %v2914_v3 = vpack.i.bf16 %v3218_v1, %v3213_v0  ;;  %v2974_v4 = vld [vmem:[%s3975_s6] sm:$0xff]   ;;  %2720 = vmatprep.mubr.msk.bf16.mxu0 %vm3130_vm0, %v3129_v2  ;;  %2736 = vmatprep.mubr.msk.bf16.mxu1 %vm3130_vm0, %v3129_v2  ;;  %v2975_v5 = vld [vmem:[%s3975_s6 + $0x8] sm:$0xff]   ;;  %v2977_v7 = vld [vmem:[%s3975_s6 + $0x18] sm:$0xff]   ;;  %vm315_vm6 = vcmask 1043456   ;;  %vm629_vm7 = vcmask 523264   ;;  %vm1107_vm11 = vcmask 130048  }
   0x3   :  { %2709 = vmatpush3.bf16.msra.mxu0 %v2974_v4  ;;  %2725 = vmatpush3.bf16.msra.mxu1 %v2974_v4  ;;  %v2978_v8 = vld [vmem:[%s3975_s6 + $0x20] sm:$0xff]   ;;  %v2979_v9 = vld [vmem:[%s3975_s6 + $0x28] sm:$0xff]   ;;  %v3302_v40 = vshrl.u32 %v53_v38, 7 }
   0x4   :  { %2915 = vrot.lane.b32.xlu0 %v2914_v3, %s3131_s19  ;;  %2710 = vmatprep.subr.bf16.mxu0 %v3129_v2  ;;  %v60_v10 = vld [vmem:[%s3976_s2] sm:$0xff]  ;;  %v61_v11 = vld [vmem:[%s3976_s2 + $0x8] sm:$0xff] }
   0x5   :  { %2726 = vmatprep.subr.bf16.mxu1 %v3129_v2  ;;  %v74_v12 = vpack.c.bf16 %v61_v11, %v60_v10  ;;  %v3271_v14 = vld [vmem:[%s3977_s0] sm:$0xff]  ;;  %v3276_v15 = vld [vmem:[%s3977_s0 + $0x8] sm:$0xff]  ;;  %v3305_v41 = vsub.s32 0, %v3302_v40 }
   0x6   :  { %v2478_v31 = vld [vmem:[%s3978_s7] ss:$0 sm:$0xff] }
   0x7   :  { %2711 = vmatpush3.bf16.msra.mxu0 %v2975_v5  ;;  %2727 = vmatpush3.bf16.msra.mxu1 %v2975_v5  ;;  %v173_v39 = vld [vmem:[%s3979_s4] sm:$0x1] }
   0x8   :  { %2712 = vmatprep.subr.bf16.mxu0 %v3129_v2  ;;  %2728 = vmatprep.subr.bf16.mxu1 %v3129_v2  ;;  %vm278_vm3 = vcmp.gt.f32.partialorder %v173_v39, 0.5  ;;  %v158_v3 = vld [vmem:[%s3980_s3] sm:$0xff] }
   0x9   :  { %v279_v43 = vsel %vm278_vm3, 1, %v3132_v42  ;;  %v3327_v4 = vpack.c.bf16 %v158_v3, %v158_v3 }
   0xa   :  { %v283_v44 = vrot.slane %v279_v43, %v3305_v41 }
   0xb   :  { %2713 = vmatpush3.bf16.msra.mxu0 %v2976_v6  ;;  %2729 = vmatpush3.bf16.msra.mxu1 %v2976_v6  ;;  %v317_v5 = vsel %vm315_vm6, %v3327_v4, 0 }
   0xc   :  { %2714 = vmatprep.subr.bf16.mxu0 %v3129_v2  ;;  %2730 = vmatprep.subr.bf16.mxu1 %v3129_v2  ;;  %vm3309_vm4 = vcmp.eq.s32.totalorder %v283_v44, 1 }
   0xf   :  { %2715 = vmatpush3.bf16.msra.mxu0 %v2977_v7  ;;  %2731 = vmatpush3.bf16.msra.mxu1 %v2977_v7 }
  0x10   :  { %2716 = vmatprep.subr.bf16.mxu0 %v3129_v2  ;;  %2732 = vmatprep.subr.bf16.mxu1 %v3129_v2 }
  0x13   :  { %2717 = vmatpush3.bf16.msra.mxu0 %v2978_v8  ;;  %2733 = vmatpush3.bf16.msra.mxu1 %v2978_v8 }
  0x14   :  { %2718 = vmatprep.subr.bf16.mxu0 %v3129_v2  ;;  %2734 = vmatprep.subr.bf16.mxu1 %v3129_v2 }
  0x17   :  { %2719 = vmatpush3.bf16.msra.mxu0 %v2979_v9  ;;  %2735 = vmatpush3.bf16.msra.mxu1 %v2979_v9 }
  0x18   :  { %2740 = vmatprep.subr.bf16.mxu0 %v3129_v2  ;;  %2758 = vmatprep.subr.bf16.mxu1 %v3129_v2 }
  0x1a   :  { %2721 = vmatmul.mubr.msk.bf16.vlgmr.msra.gmra.mrb[0].mxu0 %vm111_vm1, %v74_v12 }
  0x1b   :  { %2742 = vmatprep.mubr.msk.bf16.mxu0 %vm3130_vm0, %v3129_v2 }
  0x76   :  { %v2916_v13 = vpop.permute.xlu0 %2915 }
  0x77   :  { %v2918_v16 = vunpack.i.h.bf16 %v2916_v13  ;;  %v2917_v17 = vunpack.i.l.bf16 %v2916_v13 }
  0x79   :  { %v171_v18 = vsel %vm170_vm2, %v3271_v14, %v2917_v17  ;;  %v172_v19 = vsel %vm170_vm2, %v3276_v15, %v2918_v16 }
  0x7a   :  { %v174_v20 = vpack.c.bf16 %v172_v19, %v171_v18 }
  0x7c   :  { %2737 = vmatmul.mubr.msk.bf16.vlgmr.msra.gmra.mrb[0].mxu1 %vm111_vm1, %v174_v20 }
  0x7d   :  { %2760 = vmatprep.mubr.msk.bf16.mxu1 %vm3130_vm0, %v3129_v2 }
  0xed   :  { %v149_v21 = vpop.f32.mrb[0].mxu0 }
  0xee   :  { %v156_v22 = vmax.f32 %v149_v21, 0.0  ;;  %v2722_v23 = vpop.f32.mrb[1].mxu0 }
  0xef   :  { %v3285_v24 = vpop.f32.mrb[2].mxu0 }
  0xf0   :  { %v3287_v25 = vpack.c.bf16 %v156_v22, %v156_v22  ;;  %v2723_v26 = vpop.f32.mrb[3].mxu0 }
  0xf2   :  { %v235_v27 = vsel %vm170_vm2, %v3287_v25, 0 }
  0xf3   :  { %2741 = vmatpush3.bf16.xpose.msra.mxu0 %v235_v27 }
  0xf4   :  { %2746 = vmatprep.subr.bf16.mxu0 %v3129_v2 }
 0x14f   :  { %v212_v28 = vpop.f32.mrb[0].mxu1 }
 0x150   :  { %v219_v29 = vmax.f32 %v212_v28, 0.0  ;;  %v2738_v30 = vpop.f32.mrb[1].mxu1 }
 0x151   :  { %v215_v32 = vpop.f32.mrb[2].mxu1 }
 0x152   :  { %v220_v33 = vmax.f32 %v215_v32, 0.0  ;;  %v2739_v34 = vpop.f32.mrb[3].mxu1  ;;  %v227_v35 = vmul.f32 %v2478_v31, %v219_v29 }
 0x154   :  { %v228_v36 = vmul.f32 %v2478_v31, %v220_v33 }
 0x156   :  { %v229_v37 = vpack.c.bf16 %v228_v36, %v227_v35 }
 0x158   :  { %2743 = vmatmul.mubr.msk.bf16.vlgmr.msra.gmra.mrb[4].mxu0 %vm170_vm2, %v229_v37 }
 0x159   :  { %2748 = vmatprep.mubr.msk.bf16.mxu0 %vm3130_vm0, %v3129_v2  ;;  %2747 = vmatpush3.bf16.msra.mxu0 %v317_v5 }
 0x15a   :  { %2752 = vmatprep.subr.bf16.mxu0 %v3129_v2 }
 0x22b   :  { %v271_v46 = vpop.f32.mrb[4].mxu0 }
 0x22c   :  { %v285_v47 = vsel %vm3309_vm4, -1e+30, %v271_v46  ;;  %v2744_v48 = vpop.f32.mrb[5].mxu0 }
 0x22d   :  { %v274_v49 = vpop.f32.mrb[6].mxu0  ;;  %v288_v50 = vsel %vm287_vm5, %v285_v47, -inf }
 0x22e   :  { %v286_v51 = vsel %vm3309_vm4, -1e+30, %v274_v49  ;;  %289 = vmax.xlane.f32.xlu0 %v288_v50  ;;  %v2745_v52 = vpop.f32.mrb[7].mxu0 }
 0x22f   :  { %v291_v53 = vsel %vm287_vm5, %v286_v51, -inf }
 0x230   :  { %292 = vmax.xlane.f32.xlu1 %v291_v53 }
 0x244   :  { %488 = vrot.lane.b32.xlu0 %v229_v37, %s3133_s26 }
 0x2bb   :  { %v290_v54 = vpop.xlane.xlu0 %289 }
 0x2bc   :  { %v294_v55 = vsub.f32 %v285_v47, %v290_v54 }
 0x2bd   :  { %v293_v56 = vpop.xlane.xlu1 %292 }
 0x2be   :  { %v296_v57 = vmul.f32 1.442695, %v294_v55  ;;  %v295_v58 = vsub.f32 %v286_v51, %v293_v56 }
 0x2bf   :  { %v489_v20 = vpop.permute.xlu0 %488 }
 0x2c0   :  { %3062 = vpow2.f32 %v296_v57  ;;  %v298_v59 = vmul.f32 1.442695, %v295_v58 }
 0x2c2   :  { %3064 = vpow2.f32 %v298_v59 }
 0x2ca   :  { %v3063_v60 = vpop.eup %3062 }
 0x2cb   :  { %v300_v61 = vsel %vm287_vm5, %v3063_v60, 0.0 }
 0x2cc   :  { %v3065_v62 = vpop.eup %3064  ;;  %301 = vadd.xlane.f32.xlu1 %v300_v61 }
 0x2cd   :  { %v303_v63 = vsel %vm287_vm5, %v3065_v62, 0.0 }
 0x2d0   :  { %304 = vadd.xlane.f32.xlu1 %v303_v63 }
 0x2e1   :  { %364 = vrot.lane.b32.xlu1 %v3287_v25, %s3134_s29 }
 0x2e5   :  { %361 = vrot.lane.b32.xlu1 %v229_v37, %s3134_s29 }
 0x2e9   :  { %490 = vrot.lane.b32.xlu1 %v3287_v25, %s3133_s26 }
 0x359   :  { %v302_v6 = vpop.xlane.xlu1 %301 }
 0x35a   :  { %3066 = vrcp.f32 %v302_v6 }
 0x35d   :  { %v305_v7 = vpop.xlane.xlu1 %304 }
 0x35e   :  { %3068 = vrcp.f32 %v305_v7 }
 0x361   :  { %v365_v9 = vpop.permute.xlu1 %364 }
 0x362   :  { %v370_v17 = vsel %vm170_vm2, %v365_v9, 0 }
 0x364   :  { %v3067_v8 = vpop.eup %3066 }
 0x365   :  { %v308_v11 = vmul.f32 %v3067_v8, %v3063_v60  ;;  %v362_v16 = vpop.permute.xlu1 %361 }
 0x368   :  { %v3069_v10 = vpop.eup %3068 }
 0x369   :  { %v309_v12 = vmul.f32 %v3069_v10, %v3065_v62  ;;  %v491_v18 = vpop.permute.xlu1 %490 }
 0x36a   :  { %v496_v19 = vsel %vm170_vm2, %v491_v18, 0 }
 0x36b   :  { %v310_v13 = vpack.c.bf16 %v309_v12, %v308_v11 }
 0x36d   :  { %2749 = vmatmul.mubr.msk.bf16.vlgmr.msra.gmra.mrb[8].mxu0 %vm287_vm5, %v310_v13 }
 0x36e   :  { %2753 = vmatpush3.bf16.xpose.msra.mxu0 %v370_v17  ;;  %2754 = vmatprep.mubr.msk.bf16.mxu0 %vm3130_vm0, %v3129_v2 }
 0x36f   :  { %2764 = vmatprep.subr.bf16.mxu0 %v3129_v2 }
 0x375   :  { %2755 = vmatmul.mubr.msk.bf16.vlgmr.msra.gmra.mrb[12].mxu0 %vm170_vm2, %v362_v16 }
 0x376   :  { %2765 = vmatpush3.bf16.xpose.msra.mxu0 %v496_v19  ;;  %2766 = vmatprep.mubr.msk.bf16.mxu0 %vm3130_vm0, %v3129_v2 }
 0x377   :  { %742 = vmatprep.subr.bf16.mxu0 %v3132_v42 }
 0x37d   :  { %2767 = vmatmul.mubr.msk.bf16.vlgmr.msra.gmra.mrb[16].mxu0 %vm170_vm2, %v489_v20 }
 0x440   :  { %v353_v21 = vpop.f32.mrb[8].mxu0 }
 0x441   :  { %v2750_v22 = vpop.f32.mrb[9].mxu0 }
 0x442   :  { %v356_v23 = vpop.f32.mrb[10].mxu0 }
 0x443   :  { %v2919_v25 = vpack.i.bf16 %v356_v23, %v353_v21  ;;  %v2751_v26 = vpop.f32.mrb[11].mxu0 }
 0x448   :  { %v406_v27 = vpop.f32.mrb[12].mxu0 }
 0x449   :  { %v413_v28 = vsel %vm3309_vm4, -1e+30, %v406_v27  ;;  %v2756_v29 = vpop.f32.mrb[13].mxu0  ;;  %v2980_v27 = vld [vmem:[%s3981_s8] sm:$0xff]  }
 0x44a   :  { %v409_v30 = vpop.f32.mrb[14].mxu0  ;;  %v415_v31 = vsel %vm287_vm5, %v413_v28, -inf  ;;  %743 = vmatpush1.bf16.msra.mxu0 %v2980_v27  ;;  %v2982_v29 = vld [vmem:[%s3981_s8 + $0x10] sm:$0xff]  }
 0x44b   :  { %v414_v32 = vsel %vm3309_vm4, -1e+30, %v409_v30  ;;  %416 = vmax.xlane.f32.xlu1 %v415_v31  ;;  %v2757_v33 = vpop.f32.mrb[15].mxu0  ;;  %744 = vmatprep.subr.bf16.mxu0 %v3132_v42  ;;  %v2983_v30 = vld [vmem:[%s3981_s8 + $0x18] sm:$0xff]   ;;  %v2984_v31 = vld [vmem:[%s3981_s8 + $0x20] sm:$0xff]  }
 0x44c   :  { %v418_v34 = vsel %vm287_vm5, %v414_v32, -inf  ;;  %v2986_v33 = vld [vmem:[%s3981_s8 + $0x30] sm:$0xff]  }
 0x44d   :  { %419 = vmax.xlane.f32.xlu0 %v418_v34  ;;  %v2987_v34 = vld [vmem:[%s3981_s8 + $0x38] sm:$0xff]  }
 0x450   :  { %v532_v35 = vpop.f32.mrb[16].mxu0 }
 0x451   :  { %v539_v36 = vsel %vm3309_vm4, -1e+30, %v532_v35  ;;  %v2768_v37 = vpop.f32.mrb[17].mxu0  ;;  %v2988_v35 = vld [vmem:[%s3981_s8 + $0x40] sm:$0xff]  }
 0x452   :  { %v535_v39 = vpop.f32.mrb[18].mxu0  ;;  %v541_v43 = vsel %vm287_vm5, %v539_v36, -inf  ;;  %v2990_v37 = vld [vmem:[%s3981_s8 + $0x50] sm:$0xff]  }
 0x453   :  { %v540_v44 = vsel %vm3309_vm4, -1e+30, %v535_v39  ;;  %542 = vmax.xlane.f32.xlu1 %v541_v43  ;;  %v2769_v46 = vpop.f32.mrb[19].mxu0  ;;  %v2991_v39 = vld [vmem:[%s3981_s8 + $0x58] sm:$0xff]  }
 0x454   :  { %v544_v47 = vsel %vm287_vm5, %v540_v44, -inf }
 0x457   :  { %545 = vmax.xlane.f32.xlu1 %v544_v47 }
 0x463   :  { %439 = vrot.lane.b32.xlu0 %v3327_v4, %s3134_s29 }
 0x467   :  { %2920 = vrot.lane.b32.xlu0 %v2919_v25, %s3133_s26 }
 0x4d8   :  { %v417_v48 = vpop.xlane.xlu1 %416 }
 0x4d9   :  { %v421_v49 = vsub.f32 %v413_v28, %v417_v48  ;;  %v2981_v28 = vld [vmem:[%s3981_s8 + $0x8] sm:$0xff]  }
 0x4da   :  { %v420_v50 = vpop.xlane.xlu0 %419  ;;  %745 = vmatpush1.bf16.msra.mxu0 %v2981_v28 }
 0x4db   :  { %v423_v51 = vmul.f32 1.442695, %v421_v49  ;;  %v422_v52 = vsub.f32 %v414_v32, %v420_v50  ;;  %746 = vmatprep.subr.bf16.mxu0 %v3132_v42  ;;  %v2985_v32 = vld [vmem:[%s3981_s8 + $0x28] sm:$0xff]  }
 0x4dd   :  { %3070 = vpow2.f32 %v423_v51  ;;  %v425_v53 = vmul.f32 1.442695, %v422_v52 }
 0x4de   :  { %v440_v54 = vpop.permute.xlu0 %439  ;;  %747 = vmatpush1.bf16.msra.mxu0 %v2982_v29 }
 0x4df   :  { %3072 = vpow2.f32 %v425_v53  ;;  %v445_v45 = vsel %vm315_vm6, %v440_v54, 0  ;;  %748 = vmatprep.subr.bf16.mxu0 %v3132_v42 }
 0x4e0   :  { %v543_v55 = vpop.xlane.xlu1 %542  ;;  %2759 = vmatpush3.bf16.msra.mxu1 %v445_v45 }
 0x4e1   :  { %v547_v56 = vsub.f32 %v539_v36, %v543_v55  ;;  %2770 = vmatprep.subr.bf16.mxu1 %v3129_v2  ;;  %v2989_v36 = vld [vmem:[%s3981_s8 + $0x48] sm:$0xff]  }
 0x4e2   :  { %749 = vmatpush1.bf16.msra.mxu0 %v2983_v30  ;;  %v2921_v54 = vpop.permute.xlu0 %2920 }
 0x4e3   :  { %v549_v57 = vmul.f32 1.442695, %v547_v56  ;;  %750 = vmatprep.subr.bf16.mxu0 %v3132_v42  ;;  %v2923_v45 = vunpack.i.h.bf16 %v2921_v54  ;;  %v2922_v55 = vunpack.i.l.bf16 %v2921_v54  ;;  %v2992_v56 = vld [vmem:[%s3982_s10 + $0x40] sm:$0xff]  }
 0x4e4   :  { %v546_v58 = vpop.xlane.xlu1 %545 }
 0x4e5   :  { %3074 = vpow2.f32 %v549_v57  ;;  %v548_v59 = vsub.f32 %v540_v44, %v546_v58  ;;  %v2993_v58 = vld [vmem:[%s3982_s10] sm:$0xff]  }
 0x4e6   :  { %751 = vmatpush1.bf16.msra.mxu0 %v2984_v31  ;;  %v2485_v31 = vld [vmem:[%s3983_s9] ss:$0 sm:$0xff] }
 0x4e7   :  { %v3071_v60 = vpop.eup %3070  ;;  %v551_v61 = vmul.f32 1.442695, %v548_v59  ;;  %752 = vmatprep.subr.bf16.mxu0 %v3132_v42 }
 0x4e8   :  { %v427_v62 = vsel %vm287_vm5, %v3071_v60, 0.0 }
 0x4e9   :  { %v3073_v63 = vpop.eup %3072  ;;  %3076 = vpow2.f32 %v551_v61  ;;  %428 = vadd.xlane.f32.xlu1 %v427_v62  ;;  %v2994_v61 = vld [vmem:[%s3982_s10 + $0x48] sm:$0xff]   ;;  %v631_v62 = vsel %vm629_vm7, %v3218_v1, %v2923_v45  ;;  %v2996_v1 = vld [vmem:[%s3982_s10 + $0x50] sm:$0xff]  }
 0x4ea   :  { %v430_v3 = vsel %vm287_vm5, %v3073_v63, 0.0  ;;  %753 = vmatpush1.bf16.msra.mxu0 %v2985_v32 }
 0x4eb   :  { %754 = vmatprep.subr.bf16.mxu0 %v3132_v42 }
 0x4ed   :  { %431 = vadd.xlane.f32.xlu1 %v430_v3 }
 0x4ee   :  { %755 = vmatpush1.bf16.msra.mxu0 %v2986_v33 }
 0x4ef   :  { %v3075_v5 = vpop.eup %3074  ;;  %756 = vmatprep.subr.bf16.mxu0 %v3132_v42 }
 0x4f0   :  { %v553_v6 = vsel %vm287_vm5, %v3075_v5, 0.0 }
 0x4f1   :  { %554 = vadd.xlane.f32.xlu1 %v553_v6  ;;  %v2995_v6 = vld [vmem:[%s3982_s10 + $0x8] sm:$0xff]  }
 0x4f2   :  { %757 = vmatpush1.bf16.msra.mxu0 %v2987_v34 }
 0x4f3   :  { %v3077_v7 = vpop.eup %3076  ;;  %758 = vmatprep.subr.bf16.mxu0 %v3132_v42 }
 0x4f4   :  { %v556_v8 = vsel %vm287_vm5, %v3077_v7, 0.0 }
 0x4f5   :  { %557 = vadd.xlane.f32.xlu1 %v556_v8 }
 0x4f6   :  { %759 = vmatpush1.bf16.msra.mxu0 %v2988_v35 }
 0x4f7   :  { %760 = vmatprep.subr.bf16.mxu0 %v3132_v42 }
 0x4fa   :  { %761 = vmatpush1.bf16.msra.mxu0 %v2989_v36 }
 0x4fb   :  { %762 = vmatprep.subr.bf16.mxu0 %v3132_v42 }
 0x4fe   :  { %763 = vmatpush1.bf16.msra.mxu0 %v2990_v37 }
 0x4ff   :  { %764 = vmatprep.subr.bf16.mxu0 %v3132_v42 }
 0x502   :  { %765 = vmatpush1.bf16.msra.mxu0 %v2991_v39 }
 0x503   :  { %2790 = vmatprep.subr.bf16.mxu0 %v3129_v2 }
 0x506   :  { %564 = vrot.lane.b32.xlu1 %v3327_v4, %s3133_s26 }
 0x576   :  { %v429_v9 = vpop.xlane.xlu1 %428 }
 0x577   :  { %3078 = vrcp.f32 %v429_v9 }
 0x57a   :  { %v432_v10 = vpop.xlane.xlu1 %431 }
 0x57b   :  { %3080 = vrcp.f32 %v432_v10  ;;  %v2998_v10 = vld [vmem:[%s3982_s10 + $0x58] sm:$0xff]  }
 0x57e   :  { %v555_v11 = vpop.xlane.xlu1 %554 }
 0x57f   :  { %3082 = vrcp.f32 %v555_v11  ;;  %v2999_v11 = vld [vmem:[%s3982_s10 + $0x18] sm:$0xff]  }
 0x581   :  { %v3079_v13 = vpop.eup %3078 }
 0x582   :  { %v558_v12 = vpop.xlane.xlu1 %557  ;;  %v435_v17 = vmul.f32 %v3079_v13, %v3071_v60  ;;  %v3001_v13 = vld [vmem:[%s3982_s10 + $0x20] sm:$0xff]  }
 0x583   :  { %3084 = vrcp.f32 %v558_v12  ;;  %v3000_v12 = vld [vmem:[%s3982_s10 + $0x60] sm:$0xff]  }
 0x585   :  { %v3081_v16 = vpop.eup %3080 }
 0x586   :  { %v436_v18 = vmul.f32 %v3081_v16, %v3073_v63  ;;  %v565_v19 = vpop.permute.xlu1 %564  ;;  %v630_v63 = vsel %vm629_vm7, %v3213_v0, %v2922_v55  ;;  %v2997_v0 = vld [vmem:[%s3982_s10 + $0x10] sm:$0xff]   ;;  %v3002_v16 = vld [vmem:[%s3982_s10 + $0x68] sm:$0xff]  }
 0x587   :  { %v570_v21 = vsel %vm315_vm6, %v565_v19, 0  ;;  %v3005_v19 = vld [vmem:[%s3982_s10 + $0x30] sm:$0xff]  }
 0x588   :  { %v437_v20 = vpack.c.bf16 %v436_v18, %v435_v17  ;;  %v3003_v17 = vld [vmem:[%s3982_s10 + $0x28] sm:$0xff]   ;;  %v3004_v18 = vld [vmem:[%s3982_s10 + $0x70] sm:$0xff]  }
 0x589   :  { %v3083_v22 = vpop.eup %3082 }
 0x58a   :  { %2761 = vmatmul.mubr.msk.bf16.vlgmr.msra.gmra.mrb[4].mxu1 %vm287_vm5, %v437_v20  ;;  %v561_v23 = vmul.f32 %v3083_v22, %v3075_v5  ;;  %v3006_v20 = vld [vmem:[%s3982_s10 + $0x78] sm:$0xff]  }
 0x58b   :  { %2771 = vmatpush3.bf16.msra.mxu1 %v570_v21  ;;  %2772 = vmatprep.mubr.msk.bf16.mxu1 %vm3130_vm0, %v3129_v2  ;;  %v3007_v21 = vld [vmem:[%s3982_s10 + $0x38] sm:$0xff]  }
 0x58c   :  { %2613 = vmatprep.subr.bf16.mxu1 %v2992_v56 }
 0x58d   :  { %v3085_v4 = vpop.eup %3084 }
 0x58e   :  { %v562_v25 = vmul.f32 %v3085_v4, %v3077_v7 }
 0x590   :  { %v563_v26 = vpack.c.bf16 %v562_v25, %v561_v23 }
 0x592   :  { %2773 = vmatmul.mubr.msk.bf16.vlgmr.msra.gmra.mrb[8].mxu1 %vm287_vm5, %v563_v26 }
 0x593   :  { %2614 = vmatpush3.bf16.msra.mxu1 %v2993_v58 }
 0x594   :  { %2615 = vmatprep.subr.bf16.mxu1 %v2994_v61 }
 0x597   :  { %2616 = vmatpush3.bf16.msra.mxu1 %v2995_v6 }
 0x598   :  { %2617 = vmatprep.subr.bf16.mxu1 %v2996_v1 }
 0x59b   :  { %2618 = vmatpush3.bf16.msra.mxu1 %v2997_v0 }
 0x59c   :  { %2619 = vmatprep.subr.bf16.mxu1 %v2998_v10  ;;  %v3535_v10 = vand.u32 127, %v53_v38 }
 0x59e   :  { %vm58_vm10 = vcmp.eq.s32.totalorder %v3302_v40, %v3535_v10 }
 0x59f   :  { %2620 = vmatpush3.bf16.msra.mxu1 %v2999_v11  ;;  %v3538_v11 = vadd.s32 8, %v3302_v40 }
 0x5a0   :  { %2621 = vmatprep.subr.bf16.mxu1 %v3000_v12 }
 0x5a1   :  { %vm59_vm12 = vcmp.eq.s32.totalorder %v3538_v11, %v3535_v10 }
 0x5a3   :  { %2622 = vmatpush3.bf16.msra.mxu1 %v3001_v13 }
 0x5a4   :  { %2623 = vmatprep.subr.bf16.mxu1 %v3002_v16 }
 0x5a7   :  { %2624 = vmatpush3.bf16.msra.mxu1 %v3003_v17 }
 0x5a8   :  { %2625 = vmatprep.subr.bf16.mxu1 %v3004_v18 }
 0x5ab   :  { %2626 = vmatpush3.bf16.msra.mxu1 %v3005_v19 }
 0x5ac   :  { %2627 = vmatprep.subr.bf16.mxu1 %v3006_v20 }
 0x5af   :  { %2628 = vmatpush3.bf16.msra.mxu1 %v3007_v21 }
 0x5b0   :  { %2776 = vmatprep.subr.bf16.mxu1 %v3129_v2 }
 0x65d   :  { %v481_v43 = vpop.f32.mrb[4].mxu1 }
 0x65e   :  { %v2762_v44 = vpop.f32.mrb[5].mxu1 }
 0x65f   :  { %v484_v46 = vpop.f32.mrb[6].mxu1 }
 0x660   :  { %v2924_v47 = vpack.i.bf16 %v484_v46, %v481_v43  ;;  %v2763_v48 = vpop.f32.mrb[7].mxu1 }
 0x661   :  { %v3008_v48 = vld [vmem:[%s3982_s10 + $0x80] sm:$0xff]  }
 0x662   :  { %2925 = vrot.lane.b32.xlu0 %v2924_v47, %s3134_s29 }
 0x665   :  { %v606_v49 = vpop.f32.mrb[8].mxu1 }
 0x666   :  { %v2774_v50 = vpop.f32.mrb[9].mxu1 }
 0x667   :  { %v609_v51 = vpop.f32.mrb[10].mxu1  ;;  %v3009_v50 = vld [vmem:[%s3982_s10 + $0x88] sm:$0xff]  }
 0x668   :  { %v659_v52 = vpack.c.bf16 %v609_v51, %v606_v49  ;;  %v2775_v53 = vpop.f32.mrb[11].mxu1 }
 0x66a   :  { %2498 = vmatprep.mubr.msk.bf16.mxu0 %vm629_vm7, %v659_v52 }
 0x6d4   :  { %v2926_v57 = vpop.permute.xlu0 %2925 }
 0x6d5   :  { %v2928_v59 = vunpack.i.h.bf16 %v2926_v57  ;;  %v2927_v60 = vunpack.i.l.bf16 %v2926_v57 }
 0x6d7   :  { %v632_v3 = vsel %vm111_vm1, %v630_v63, %v2927_v60  ;;  %v633_v5 = vsel %vm111_vm1, %v631_v62, %v2928_v59  ;;  %v3520_v62 = vld [vmem:[%s3984_s11] ss:$0 sm:$0xff] }
 0x6d8   :  { %v2929_v7 = vpack.i.bf16 %v606_v49, %v632_v3  ;;  %v658_v8 = vpack.c.bf16 %v633_v5, %v632_v3  ;;  %v2934_v9 = vpack.i.bf16 %v609_v51, %v633_v5  ;;  %v3510_v51 = vpack.c.bf16 %v3276_v15, %v3271_v14 }
 0x6da   :  { %2930 = vrot.lane.b32.xlu1 %v2929_v7, %s3133_s26  ;;  %2935 = vrot.lane.b32.xlu0 %v2934_v9, %s3133_s26  ;;  %v50_v9 = vld [vmem:[%s3985_s5] sm:$0x1] }
 0x6db   :  { %775 = vmatmul.mubr.bf16.vlgmr.msra.gmra.mrb[20].mxu0 %v658_v8  ;;  %vm1096_vm8 = vcmp.gt.f32.partialorder %v50_v9, 0.5 }
 0x6dc   :  { %2792 = vmatprep.mubr.msk.bf16.mxu0 %vm3130_vm0, %v3129_v2  ;;  %v1097_v1 = vsel %vm1096_vm8, 1, %v3132_v42 }
 0x6dd   :  { %v1101_v0 = vrot.slane %v1097_v1, %v3305_v41 }
 0x6df   :  { %vm3540_vm9 = vcmp.eq.s32.totalorder %v1101_v0, 1 }
 0x74c   :  { %v2931_v22 = vpop.permute.xlu1 %2930  ;;  %v2936_v4 = vpop.permute.xlu0 %2935 }
 0x74d   :  { %v2933_v23 = vunpack.i.h.bf16 %v2931_v22  ;;  %v2932_v25 = vunpack.i.l.bf16 %v2931_v22  ;;  %v2938_v26 = vunpack.i.h.bf16 %v2936_v4  ;;  %v2937_v27 = vunpack.i.l.bf16 %v2936_v4 }
 0x74f   :  { %v797_v28 = vsel %vm629_vm7, %v2932_v25, %v2933_v23  ;;  %v798_v29 = vsel %vm629_vm7, %v2937_v27, %v2938_v26 }
 0x750   :  { %v842_v30 = vpack.c.bf16 %v798_v29, %v797_v28 }
 0x752   :  { %987 = vmatprep.mubr.bf16.mxu1 %v842_v30 }
 0x7ae   :  { %v776_v32 = vpop.f32.mrb[20].mxu0 }
 0x7af   :  { %v777_v33 = vadd.f32 %v2485_v31, %v776_v32  ;;  %v778_v34 = vpop.f32.mrb[21].mxu0 }
 0x7b0   :  { %v779_v35 = vpop.f32.mrb[22].mxu0  ;;  %v157_v34 = vmax.f32 %v3285_v24, 0.0 }
 0x7b1   :  { %v3488_v36 = vmax.f32 %v777_v33, 0.0  ;;  %v780_v37 = vadd.f32 %v2485_v31, %v779_v35  ;;  %v781_v39 = vpop.f32.mrb[23].mxu0  ;;  %v3566_v35 = vld [vmem:[%s3974_s1 + $0x10] sm:$0xff] }
 0x7b2   :  { %v1414_v39 = vpack.c.bf16 %v157_v34, %v157_v34 }
 0x7b3   :  { %v3490_v43 = vmax.f32 %v780_v37, 0.0  ;;  %v803_v44 = vsel %vm629_vm7, %v3488_v36, %v2932_v25  ;;  %v3571_v37 = vld [vmem:[%s3974_s1 + $0x18] sm:$0xff] }
 0x7b5   :  { %v804_v46 = vsel %vm629_vm7, %v3490_v43, %v2937_v27  ;;  %v1131_v47 = vpack.c.bf16 %v3490_v43, %v3488_v36 }
 0x7b6   :  { %v841_v49 = vpack.c.bf16 %v804_v46, %v803_v44  ;;  %v2939_v44 = vpack.i.bf16 %v3571_v37, %v3566_v35 }
 0x7b7   :  { %2791 = vmatpush3.bf16.msra.mxu0 %v1131_v47 }
 0x7b8   :  { %988 = vmatmul.mubr.bf16.vlgmr.msra.gmra.mrb[12].mxu1 %v841_v49  ;;  %2816 = vmatprep.subr.bf16.mxu0 %v3129_v2 }
 0x7b9   :  { %2777 = vmatpush3.bf16.msra.mxu1 %v3008_v48  ;;  %2780 = vmatprep.mubr.msk.bf16.mxu1 %vm3130_vm0, %v3129_v2 }
 0x7ba   :  { %2778 = vmatprep.subr.bf16.mxu1 %v3129_v2 }
 0x7bd   :  { %2779 = vmatpush3.bf16.msra.mxu1 %v3009_v50 }
 0x7be   :  { %2784 = vmatprep.subr.bf16.mxu1 %v3129_v2 }
 0x7c0   :  { %2781 = vmatmul.mubr.msk.bf16.vlgmr.msra.gmra.mrb[16].mxu1 %vm170_vm2, %v3510_v51 }
 0x7c1   :  { %2786 = vmatprep.mubr.msk.bf16.mxu1 %vm3130_vm0, %v3129_v2 }
 0x88b   :  { %v2629_v52 = vpop.f32.mrb[12].mxu1 }
 0x88c   :  { %v2630_v53 = vpop.f32.mrb[13].mxu1 }
 0x88d   :  { %v2631_v54 = vadd.f32 %v2630_v53, %v2629_v52  ;;  %v2632_v45 = vpop.f32.mrb[14].mxu1  ;;  %v3010_v52 = vld [vmem:[%s3975_s6] sm:$0xff]  }
 0x88e   :  { %v2633_v55 = vpop.f32.mrb[15].mxu1 }
 0x88f   :  { %v2634_v56 = vadd.f32 %v2633_v55, %v2632_v45  ;;  %v3012_v45 = vld [vmem:[%s3975_s6 + $0x10] sm:$0xff]   ;;  %v3013_v55 = vld [vmem:[%s3975_s6 + $0x18] sm:$0xff]  }
 0x893   :  { %v1030_v57 = vpop.f32.mrb[16].mxu1 }
 0x894   :  { %v1031_v58 = vadd.f32 %v2631_v54, %v1030_v57  ;;  %v2782_v59 = vpop.f32.mrb[17].mxu1  ;;  %v3011_v54 = vld [vmem:[%s3975_s6 + $0x8] sm:$0xff]  }
 0x895   :  { %v1033_v14 = vpop.f32.mrb[18].mxu1  ;;  %v3014_v59 = vld [vmem:[%s3975_s6 + $0x20] sm:$0xff]  }
 0x896   :  { %v1037_v15 = vmax.f32 %v1031_v58, 0.0  ;;  %v1034_v60 = vadd.f32 %v2634_v56, %v1033_v14  ;;  %v2783_v61 = vpop.f32.mrb[19].mxu1  ;;  %v3126_v14 = vld [vmem:[%s3977_s0 + $0x8] sm:$0xff] }
 0x898   :  { %v1038_v63 = vmax.f32 %v1034_v60, 0.0  ;;  %v1045_v3 = vmul.f32 %v3520_v62, %v1037_v15  ;;  %v3127_v60 = vld [vmem:[%s3977_s0] sm:$0xff] }
 0x89a   :  { %v1046_v5 = vmul.f32 %v3520_v62, %v1038_v63  ;;  %v1048_v6 = vpack.c.bf16 %v1038_v63, %v1037_v15  ;;  %v3015_v63 = vld [vmem:[%s3975_s6 + $0x28] sm:$0xff]  }
 0x89c   :  { %v1047_v7 = vpack.c.bf16 %v1046_v5, %v1045_v3  ;;  %v1053_v8 = vsel %vm170_vm2, %v1048_v6, 0  ;;  %v1419_v5 = vsel %vm170_vm2, %v1414_v39, 0 }
 0x89d   :  { %2785 = vmatpush3.bf16.xpose.msra.mxu1 %v1053_v8 }
 0x89e   :  { %2796 = vmatprep.subr.bf16.mxu1 %v3129_v2 }
 0x8a4   :  { %2787 = vmatmul.mubr.msk.bf16.vlgmr.msra.gmra.mrb[20].mxu1 %vm170_vm2, %v1047_v7 }
 0x8a5   :  { %2812 = vmatprep.mubr.msk.bf16.mxu1 %vm3130_vm0, %v3129_v2 }
 0x977   :  { %v1089_v13 = vpop.f32.mrb[20].mxu1 }
 0x978   :  { %v1103_v16 = vsel %vm3540_vm9, -1e+30, %v1089_v13  ;;  %v2788_v17 = vpop.f32.mrb[21].mxu1 }
 0x979   :  { %v1092_v38 = vpop.f32.mrb[22].mxu1  ;;  %v1105_v18 = vsel %vm58_vm10, -1e+30, %v1103_v16 }
 0x97a   :  { %v1104_v19 = vsel %vm3540_vm9, -1e+30, %v1092_v38  ;;  %v2789_v20 = vpop.f32.mrb[23].mxu1  ;;  %v1108_v21 = vsel %vm1107_vm11, %v1105_v18, -inf }
 0x97b   :  { %1109 = vmax.xlane.f32.xlu1 %v1108_v21  ;;  %v1106_v22 = vsel %vm59_vm12, -1e+30, %v1104_v19  ;;  %v3128_v19 = vld [vmem:[%s3978_s7] ss:$0 sm:$0xff] }
 0x97c   :  { %v1111_v4 = vsel %vm1107_vm11, %v1106_v22, -inf }
 0x97d   :  { %1112 = vmax.xlane.f32.xlu0 %v1111_v4 }
 0xa08   :  { %v1110_v23 = vpop.xlane.xlu1 %1109 }
 0xa09   :  { %v1114_v25 = vsub.f32 %v1105_v18, %v1110_v23 }
 0xa0a   :  { %v1113_v26 = vpop.xlane.xlu0 %1112 }
 0xa0b   :  { %v1116_v27 = vmul.f32 1.442695, %v1114_v25  ;;  %v1115_v28 = vsub.f32 %v1106_v22, %v1113_v26 }
 0xa0d   :  { %3086 = vpow2.f32 %v1116_v27  ;;  %v1118_v29 = vmul.f32 1.442695, %v1115_v28 }
 0xa0f   :  { %3088 = vpow2.f32 %v1118_v29  ;;  %v1315_v29 = vld [vmem:[%s3979_s4 + $0x1] sm:$0x1] }
 0xa10   :  { %vm1462_vm13 = vcmp.gt.f32.partialorder %v1315_v29, 0.5 }
 0xa17   :  { %v3087_v30 = vpop.eup %3086 }
 0xa18   :  { %v1120_v31 = vsel %vm1107_vm11, %v3087_v30, 0.0 }
 0xa19   :  { %v3089_v32 = vpop.eup %3088  ;;  %1121 = vadd.xlane.f32.xlu0 %v1120_v31 }
 0xa1a   :  { %v1123_v33 = vsel %vm1107_vm11, %v3089_v32, 0.0 }
 0xa1b   :  { %1124 = vadd.xlane.f32.xlu1 %v1123_v33 }
 0xa2c   :  { %1546 = vrot.lane.b32.xlu1 %v1414_v39, %s3134_s29 }
 0xa2f   :  { %2940 = vrot.lane.b32.xlu0 %v2939_v44, %s3131_s19 }
 0xa33   :  { %1672 = vrot.lane.b32.xlu0 %v1414_v39, %s3133_s26 }
 0xaa6   :  { %v1122_v24 = vpop.xlane.xlu0 %1121 }
 0xaa7   :  { %3090 = vrcp.f32 %v1122_v24 }
 0xaa8   :  { %v1125_v46 = vpop.xlane.xlu1 %1124 }
 0xaa9   :  { %3092 = vrcp.f32 %v1125_v46 }
 0xaaa   :  { %v2941_v56 = vpop.permute.xlu0 %2940 }
 0xaab   :  { %v2943_v57 = vunpack.i.h.bf16 %v2941_v56  ;;  %v2942_v58 = vunpack.i.l.bf16 %v2941_v56 }
 0xaac   :  { %v1547_v22 = vpop.permute.xlu1 %1546 }
 0xaad   :  { %v1314_v15 = vsel %vm170_vm2, %v3126_v14, %v2943_v57  ;;  %v1313_v61 = vsel %vm170_vm2, %v3127_v60, %v2942_v58  ;;  %v1552_v23 = vsel %vm170_vm2, %v1547_v22, 0  ;;  %v3020_v22 = vld [vmem:[%s3986_s12 + $0x20] sm:$0xff]  }
 0xaae   :  { %v1328_v3 = vpack.c.bf16 %v1314_v15, %v1313_v61  ;;  %v1673_v25 = vpop.permute.xlu0 %1672 }
 0xaaf   :  { %v1678_v27 = vsel %vm170_vm2, %v1673_v25, 0 }
 0xab1   :  { %v3091_v47 = vpop.eup %3090 }
 0xab2   :  { %v1128_v49 = vmul.f32 %v3091_v47, %v3087_v30  ;;  %v1463_v30 = vsel %vm1462_vm13, 1, %v3132_v42 }
 0xab3   :  { %v3093_v48 = vpop.eup %3092  ;;  %v1467_v31 = vrot.slane %v1463_v30, %v3305_v41 }
 0xab4   :  { %v1129_v50 = vmul.f32 %v3093_v48, %v3089_v32 }
 0xab5   :  { %vm3645_vm14 = vcmp.eq.s32.totalorder %v1467_v31, 1 }
 0xab6   :  { %v1130_v53 = vpack.c.bf16 %v1129_v50, %v1128_v49 }
 0xab8   :  { %2793 = vmatmul.mubr.msk.bf16.vlgmr.msra.gmra.mrb[24].mxu0 %vm1107_vm11, %v1130_v53 }
 0xab9   :  { %2817 = vmatpush3.bf16.msra.mxu0 %v3010_v52  ;;  %2828 = vmatprep.mubr.msk.bf16.mxu0 %vm3130_vm0, %v3129_v2 }
 0xaba   :  { %2818 = vmatprep.subr.bf16.mxu0 %v3129_v2 }
 0xabd   :  { %2819 = vmatpush3.bf16.msra.mxu0 %v3011_v54 }
 0xabe   :  { %2820 = vmatprep.subr.bf16.mxu0 %v3129_v2 }
 0xac1   :  { %2821 = vmatpush3.bf16.msra.mxu0 %v3012_v45 }
 0xac2   :  { %2822 = vmatprep.subr.bf16.mxu0 %v3129_v2 }
 0xac5   :  { %2823 = vmatpush3.bf16.msra.mxu0 %v3013_v55 }
 0xac6   :  { %2824 = vmatprep.subr.bf16.mxu0 %v3129_v2 }
 0xac9   :  { %2825 = vmatpush3.bf16.msra.mxu0 %v3014_v59 }
 0xaca   :  { %2826 = vmatprep.subr.bf16.mxu0 %v3129_v2 }
 0xacd   :  { %2827 = vmatpush3.bf16.msra.mxu0 %v3015_v63 }
 0xace   :  { %2832 = vmatprep.subr.bf16.mxu0 %v3129_v2 }
 0xad0   :  { %2829 = vmatmul.mubr.msk.bf16.vlgmr.msra.gmra.mrb[28].mxu0 %vm111_vm1, %v1328_v3 }
 0xad1   :  { %2834 = vmatprep.mubr.msk.bf16.mxu0 %vm3130_vm0, %v3129_v2 }
 0xad6   :  { %2833 = vmatpush3.bf16.xpose.msra.mxu0 %v1419_v5 }
 0xad7   :  { %2844 = vmatprep.subr.bf16.mxu0 %v3129_v2 }
 0xb8b   :  { %v3618_v6 = vpop.f32.mrb[24].mxu0 }
 0xb8c   :  { %v2794_v7 = vpop.f32.mrb[25].mxu0 }
 0xb8d   :  { %v3620_v8 = vpop.f32.mrb[26].mxu0 }
 0xb8e   :  { %v2944_v9 = vpack.i.bf16 %v3620_v8, %v3618_v6  ;;  %v2795_v1 = vpop.f32.mrb[27].mxu0 }
 0xba3   :  { %v1402_v0 = vpop.f32.mrb[28].mxu0 }
 0xba4   :  { %v1409_v13 = vmax.f32 %v1402_v0, 0.0  ;;  %v2830_v16 = vpop.f32.mrb[29].mxu0 }
 0xba5   :  { %v1405_v17 = vpop.f32.mrb[30].mxu0 }
 0xba6   :  { %v1410_v38 = vmax.f32 %v1405_v17, 0.0  ;;  %v2831_v18 = vpop.f32.mrb[31].mxu0  ;;  %v1411_v20 = vmul.f32 %v3128_v19, %v1409_v13 }
 0xba7   :  { %v3016_v18 = vld [vmem:[%s3986_s12] sm:$0xff]  }
 0xba8   :  { %v1412_v21 = vmul.f32 %v3128_v19, %v1410_v38  ;;  %2797 = vmatpush3.bf16.msra.mxu1 %v3016_v18  ;;  %v3017_v19 = vld [vmem:[%s3986_s12 + $0x8] sm:$0xff]  }
 0xba9   :  { %2798 = vmatprep.subr.bf16.mxu1 %v3129_v2 }
 0xbaa   :  { %v1413_v4 = vpack.c.bf16 %v1412_v21, %v1411_v20  ;;  %v3018_v20 = vld [vmem:[%s3986_s12 + $0x10] sm:$0xff]   ;;  %v3019_v21 = vld [vmem:[%s3986_s12 + $0x18] sm:$0xff]  }
 0xbac   :  { %1543 = vrot.lane.b32.xlu1 %v1413_v4, %s3134_s29  ;;  %2835 = vmatmul.mubr.msk.bf16.vlgmr.msra.gmra.mrb[32].mxu0 %vm170_vm2, %v1413_v4 }
 0xbad   :  { %2845 = vmatpush3.bf16.xpose.msra.mxu0 %v1552_v23  ;;  %2846 = vmatprep.mubr.msk.bf16.mxu0 %vm3130_vm0, %v3129_v2 }
 0xbae   :  { %2856 = vmatprep.subr.bf16.mxu0 %v3129_v2  ;;  %2799 = vmatpush3.bf16.msra.mxu1 %v3017_v19 }
 0xbaf   :  { %2800 = vmatprep.subr.bf16.mxu1 %v3129_v2 }
 0xbb0   :  { %1670 = vrot.lane.b32.xlu1 %v1413_v4, %s3133_s26  ;;  %v3021_v4 = vld [vmem:[%s3986_s12 + $0x28] sm:$0xff]  }
 0xbb2   :  { %2801 = vmatpush3.bf16.msra.mxu1 %v3018_v20 }
 0xbb3   :  { %2802 = vmatprep.subr.bf16.mxu1 %v3129_v2 }
 0xbb6   :  { %2803 = vmatpush3.bf16.msra.mxu1 %v3019_v21 }
 0xbb7   :  { %2804 = vmatprep.subr.bf16.mxu1 %v3129_v2 }
 0xbba   :  { %2805 = vmatpush3.bf16.msra.mxu1 %v3020_v22 }
 0xbbb   :  { %2806 = vmatprep.subr.bf16.mxu1 %v3129_v2 }
 0xbbe   :  { %2807 = vmatpush3.bf16.msra.mxu1 %v3021_v4 }
 0xbbf   :  { %2808 = vmatprep.subr.bf16.mxu1 %v3129_v2 }
 0xc1e   :  { %v1544_v26 = vpop.permute.xlu1 %1543 }
 0xc1f   :  { %2847 = vmatmul.mubr.msk.bf16.vlgmr.msra.gmra.mrb[36].mxu0 %vm170_vm2, %v1544_v26 }
 0xc20   :  { %2857 = vmatpush3.bf16.xpose.msra.mxu0 %v1678_v27  ;;  %2858 = vmatprep.mubr.msk.bf16.mxu0 %vm3130_vm0, %v3129_v2 }
 0xc21   :  { %1923 = vmatprep.subr.bf16.mxu0 %v3132_v42 }
 0xc22   :  { %v1671_v28 = vpop.permute.xlu1 %1670 }
 0xc27   :  { %2859 = vmatmul.mubr.msk.bf16.vlgmr.msra.gmra.mrb[40].mxu0 %vm170_vm2, %v1671_v28 }
 0xc7f   :  { %v1455_v33 = vpop.f32.mrb[32].mxu0 }
 0xc80   :  { %v1469_v34 = vsel %vm3645_vm14, -1e+30, %v1455_v33  ;;  %v2836_v39 = vpop.f32.mrb[33].mxu0 }
 0xc81   :  { %v1458_v44 = vpop.f32.mrb[34].mxu0  ;;  %v1471_v24 = vsel %vm287_vm5, %v1469_v34, -inf  ;;  %v159_v39 = vld [vmem:[%s3980_s3 + $0x8] sm:$0xff] }
 0xc82   :  { %v1470_v46 = vsel %vm3645_vm14, -1e+30, %v1458_v44  ;;  %1472 = vmax.xlane.f32.xlu0 %v1471_v24  ;;  %v2837_v47 = vpop.f32.mrb[35].mxu0  ;;  %v3023_v44 = vld [vmem:[%s3986_s12 + $0x38] sm:$0xff]   ;;  %v1494_v24 = vpack.c.bf16 %v159_v39, %v159_v39  ;;  %v3791_v39 = vld [vmem:[%s3987_s13] ss:$0 sm:$0xff] }
 0xc83   :  { %v1474_v48 = vsel %vm287_vm5, %v1470_v46, -inf }
 0xc84   :  { %1475 = vmax.xlane.f32.xlu1 %v1474_v48 }
 0xcf2   :  { %v1588_v41 = vpop.f32.mrb[36].mxu0 }
 0xcf3   :  { %v1595_v49 = vsel %vm3645_vm14, -1e+30, %v1588_v41  ;;  %v2848_v50 = vpop.f32.mrb[37].mxu0 }
 0xcf4   :  { %v1591_v52 = vpop.f32.mrb[38].mxu0  ;;  %v1597_v53 = vsel %vm287_vm5, %v1595_v49, -inf }
 0xcf5   :  { %v1596_v54 = vsel %vm3645_vm14, -1e+30, %v1591_v52  ;;  %1598 = vmax.xlane.f32.xlu0 %v1597_v53  ;;  %v2849_v45 = vpop.f32.mrb[39].mxu0 }
 0xcf6   :  { %v1600_v55 = vsel %vm287_vm5, %v1596_v54, -inf }
 0xcf9   :  { %1601 = vmax.xlane.f32.xlu0 %v1600_v55 }
 0xcfa   :  { %v1714_v56 = vpop.f32.mrb[40].mxu0 }
 0xcfb   :  { %v3663_v57 = vsel %vm3645_vm14, -1e+30, %v1714_v56  ;;  %v2860_v58 = vpop.f32.mrb[41].mxu0 }
 0xcfc   :  { %v1717_v59 = vpop.f32.mrb[42].mxu0  ;;  %v1723_v14 = vsel %vm287_vm5, %v3663_v57, -inf }
 0xcfd   :  { %v3669_v15 = vsel %vm3645_vm14, -1e+30, %v1717_v59  ;;  %1724 = vmax.xlane.f32.xlu1 %v1723_v14  ;;  %v2861_v60 = vpop.f32.mrb[43].mxu0 }
 0xcfe   :  { %v1726_v61 = vsel %vm287_vm5, %v3669_v15, -inf  ;;  %v1499_v60 = vsel %vm315_vm6, %v1494_v24, 0 }
 0xcff   :  { %1727 = vmax.xlane.f32.xlu0 %v1726_v61 }
 0xd0f   :  { %v1473_v63 = vpop.xlane.xlu0 %1472 }
 0xd10   :  { %v1477_v3 = vsub.f32 %v1469_v34, %v1473_v63  ;;  %v3022_v34 = vld [vmem:[%s3986_s12 + $0x30] sm:$0xff]  }
 0xd11   :  { %v1476_v5 = vpop.xlane.xlu1 %1475  ;;  %2809 = vmatpush3.bf16.msra.mxu1 %v3022_v34  ;;  %v3032_v34 = vld [vmem:[%s3981_s8 + $0x40] sm:$0xff]  }
 0xd12   :  { %v1479_v7 = vmul.f32 1.442695, %v1477_v3  ;;  %v1478_v1 = vsub.f32 %v1470_v46, %v1476_v5  ;;  %2810 = vmatprep.subr.bf16.mxu1 %v3129_v2 }
 0xd14   :  { %3094 = vpow2.f32 %v1479_v7  ;;  %v1481_v0 = vmul.f32 1.442695, %v1478_v1 }
 0xd15   :  { %2811 = vmatpush3.bf16.msra.mxu1 %v3023_v44 }
 0xd16   :  { %3096 = vpow2.f32 %v1481_v0  ;;  %2838 = vmatprep.subr.bf16.mxu1 %v3129_v2 }
 0xd1e   :  { %v3673_v13 = vpop.eup %3094 }
 0xd1f   :  { %v1483_v16 = vsel %vm287_vm5, %v3673_v13, 0.0 }
 0xd20   :  { %v3677_v17 = vpop.eup %3096  ;;  %1484 = vadd.xlane.f32.xlu1 %v1483_v16 }
 0xd21   :  { %v1486_v38 = vsel %vm287_vm5, %v3677_v17, 0.0 }
 0xd22   :  { %1487 = vadd.xlane.f32.xlu0 %v1486_v38 }
 0xd82   :  { %v1599_v23 = vpop.xlane.xlu0 %1598 }
 0xd83   :  { %v1603_v25 = vsub.f32 %v1595_v49, %v1599_v23 }
 0xd85   :  { %v1605_v26 = vmul.f32 1.442695, %v1603_v25 }
 0xd86   :  { %v1602_v27 = vpop.xlane.xlu0 %1601 }
 0xd87   :  { %3098 = vpow2.f32 %v1605_v26  ;;  %v1604_v28 = vsub.f32 %v1596_v54, %v1602_v27  ;;  %v3024_v26 = vld [vmem:[%s3981_s8] sm:$0xff]   ;;  %v3025_v27 = vld [vmem:[%s3981_s8 + $0x8] sm:$0xff]  }
 0xd88   :  { %1924 = vmatpush1.bf16.msra.mxu0 %v3024_v26  ;;  %v3044_v26 = vld [vmem:[%s3982_s10 + $0x60] sm:$0xff]  }
 0xd89   :  { %v1607_v29 = vmul.f32 1.442695, %v1604_v28  ;;  %1925 = vmatprep.subr.bf16.mxu0 %v3132_v42  ;;  %v3026_v28 = vld [vmem:[%s3981_s8 + $0x10] sm:$0xff]  }
 0xd8a   :  { %v1725_v46 = vpop.xlane.xlu1 %1724 }
 0xd8b   :  { %3100 = vpow2.f32 %v1607_v29  ;;  %v1729_v6 = vsub.f32 %v3663_v57, %v1725_v46  ;;  %v3027_v29 = vld [vmem:[%s3981_s8 + $0x18] sm:$0xff]  }
 0xd8c   :  { %v1728_v8 = vpop.xlane.xlu0 %1727  ;;  %1926 = vmatpush1.bf16.msra.mxu0 %v3025_v27  ;;  %v3045_v27 = vld [vmem:[%s3982_s10 + $0x20] sm:$0xff]  }
 0xd8d   :  { %v1730_v47 = vsub.f32 %v3669_v15, %v1728_v8  ;;  %1927 = vmatprep.subr.bf16.mxu0 %v3132_v42 }
 0xd8f   :  { %v1733_v48 = vmul.f32 1.442695, %v1730_v47 }
 0xd90   :  { %1928 = vmatpush1.bf16.msra.mxu0 %v3026_v28  ;;  %v3046_v28 = vld [vmem:[%s3982_s10 + $0x68] sm:$0xff]  }
 0xd91   :  { %v3705_v30 = vpop.eup %3098  ;;  %1929 = vmatprep.subr.bf16.mxu0 %v3132_v42 }
 0xd92   :  { %v1609_v31 = vsel %vm287_vm5, %v3705_v30, 0.0 }
 0xd93   :  { %1610 = vadd.xlane.f32.xlu1 %v1609_v31  ;;  %v3029_v31 = vld [vmem:[%s3981_s8 + $0x28] sm:$0xff]  }
 0xd94   :  { %1930 = vmatpush1.bf16.msra.mxu0 %v3027_v29  ;;  %v3047_v29 = vld [vmem:[%s3982_s10 + $0x28] sm:$0xff]  }
 0xd95   :  { %v3101_v32 = vpop.eup %3100  ;;  %1931 = vmatprep.subr.bf16.mxu0 %v3132_v42 }
 0xd96   :  { %v1612_v33 = vsel %vm287_vm5, %v3101_v32, 0.0 }
 0xd97   :  { %1613 = vadd.xlane.f32.xlu0 %v1612_v33  ;;  %v3031_v33 = vld [vmem:[%s3981_s8 + $0x38] sm:$0xff]  }
 0xda4   :  { %2945 = vrot.lane.b32.xlu1 %v2944_v9, %s3133_s26  ;;  %v1731_v9 = vmul.f32 1.442695, %v1729_v6  ;;  %v3033_v6 = vld [vmem:[%s3981_s8 + $0x48] sm:$0xff]  }
 0xda6   :  { %3102 = vpow2.f32 %v1731_v9 }
 0xda7   :  { %3104 = vpow2.f32 %v1733_v48 }
 0xdad   :  { %1621 = vrot.lane.b32.xlu0 %v1494_v24, %s3134_s29  ;;  %v1485_v53 = vpop.xlane.xlu1 %1484 }
 0xdaf   :  { %v1488_v54 = vpop.xlane.xlu0 %1487 }
 0xdb0   :  { %v3103_v41 = vpop.eup %3102  ;;  %3106 = vrcp.f32 %v1488_v54 }
 0xdb1   :  { %v1735_v49 = vsel %vm287_vm5, %v3103_v41, 0.0  ;;  %v3105_v50 = vpop.eup %3104  ;;  %3108 = vrcp.f32 %v1485_v53 }
 0xdb2   :  { %v1738_v52 = vsel %vm287_vm5, %v3105_v50, 0.0 }
 0xdba   :  { %v3107_v61 = vpop.eup %3106 }
 0xdbb   :  { %v3109_v63 = vpop.eup %3108  ;;  %v1492_v3 = vmul.f32 %v3107_v61, %v3677_v17 }
 0xdbc   :  { %v1491_v5 = vmul.f32 %v3109_v63, %v3673_v13 }
 0xdbe   :  { %v1493_v7 = vpack.c.bf16 %v1492_v3, %v1491_v5 }
 0xdc8   :  { %1736 = vadd.xlane.f32.xlu1 %v1735_v49 }
 0xdcc   :  { %1739 = vadd.xlane.f32.xlu0 %v1738_v52  ;;  %v3035_v52 = vld [vmem:[%s3981_s8 + $0x58] sm:$0xff]  }
 0xdd9   :  { %1746 = vrot.lane.b32.xlu1 %v1494_v24, %s3133_s26 }
 0xe20   :  { %v1611_v45 = vpop.xlane.xlu1 %1610 }
 0xe24   :  { %v2946_v55 = vpop.permute.xlu1 %2945  ;;  %v1614_v56 = vpop.xlane.xlu0 %1613 }
 0xe25   :  { %v2948_v57 = vunpack.i.h.bf16 %v2946_v55  ;;  %v2947_v58 = vunpack.i.l.bf16 %v2946_v55  ;;  %3110 = vrcp.f32 %v1614_v56 }
 0xe26   :  { %3112 = vrcp.f32 %v1611_v45 }
 0xe27   :  { %v1185_v59 = vsel %vm629_vm7, %v3490_v43, %v2948_v57  ;;  %v1184_v14 = vsel %vm629_vm7, %v3488_v36, %v2947_v58 }
 0xe28   :  { %v1202_v15 = vpack.c.bf16 %v1185_v59, %v1184_v14  ;;  %v1622_v43 = vpop.permute.xlu0 %1621 }
 0xe29   :  { %v1627_v36 = vsel %vm315_vm6, %v1622_v43, 0 }
 0xe2a   :  { %2813 = vmatmul.mubr.bf16.vlgmr.msra.gmra.mrb[24].mxu1 %v1202_v15 }
 0xe2b   :  { %2839 = vmatpush3.bf16.msra.mxu1 %v1499_v60  ;;  %2840 = vmatprep.mubr.msk.bf16.mxu1 %vm3130_vm0, %v3129_v2 }
 0xe2c   :  { %2850 = vmatprep.subr.bf16.mxu1 %v3129_v2 }
 0xe2f   :  { %v3111_v1 = vpop.eup %3110 }
 0xe30   :  { %v3113_v0 = vpop.eup %3112  ;;  %v1618_v16 = vmul.f32 %v3111_v1, %v3101_v32  ;;  %v3030_v32 = vld [vmem:[%s3981_s8 + $0x30] sm:$0xff]   ;;  %v3038_v1 = vld [vmem:[%s3982_s10 + $0x48] sm:$0xff]  }
 0xe31   :  { %v1617_v17 = vmul.f32 %v3113_v0, %v3705_v30  ;;  %v3028_v30 = vld [vmem:[%s3981_s8 + $0x20] sm:$0xff]  }
 0xe32   :  { %2841 = vmatmul.mubr.msk.bf16.vlgmr.msra.gmra.mrb[28].mxu1 %vm287_vm5, %v1493_v7  ;;  %1932 = vmatpush1.bf16.msra.mxu0 %v3028_v30  ;;  %v3037_v7 = vld [vmem:[%s3982_s10] sm:$0xff]   ;;  %v3048_v30 = vld [vmem:[%s3982_s10 + $0x70] sm:$0xff]  }
 0xe33   :  { %2851 = vmatpush3.bf16.msra.mxu1 %v1627_v36  ;;  %2852 = vmatprep.mubr.msk.bf16.mxu1 %vm3130_vm0, %v3129_v2  ;;  %v1619_v38 = vpack.c.bf16 %v1618_v16, %v1617_v17  ;;  %v3036_v36 = vld [vmem:[%s3982_s10 + $0x40] sm:$0xff]  }
 0xe34   :  { %2862 = vmatprep.subr.bf16.mxu1 %v3129_v2  ;;  %1933 = vmatprep.subr.bf16.mxu0 %v3132_v42 }
 0xe36   :  { %1934 = vmatpush1.bf16.msra.mxu0 %v3029_v31  ;;  %v3049_v31 = vld [vmem:[%s3982_s10 + $0x30] sm:$0xff]  }
 0xe37   :  { %1935 = vmatprep.subr.bf16.mxu0 %v3132_v42 }
 0xe3a   :  { %2853 = vmatmul.mubr.msk.bf16.vlgmr.msra.gmra.mrb[32].mxu1 %vm287_vm5, %v1619_v38  ;;  %1936 = vmatpush1.bf16.msra.mxu0 %v3030_v32  ;;  %v3039_v38 = vld [vmem:[%s3982_s10 + $0x8] sm:$0xff]   ;;  %v3050_v32 = vld [vmem:[%s3982_s10 + $0x78] sm:$0xff]  }
 0xe3b   :  { %2864 = vmatprep.mubr.msk.bf16.mxu1 %vm3130_vm0, %v3129_v2  ;;  %1937 = vmatprep.subr.bf16.mxu0 %v3132_v42 }
 0xe3e   :  { %1938 = vmatpush1.bf16.msra.mxu0 %v3031_v33  ;;  %v3051_v33 = vld [vmem:[%s3982_s10 + $0x38] sm:$0xff]  }
 0xe3f   :  { %1939 = vmatprep.subr.bf16.mxu0 %v3132_v42 }
 0xe42   :  { %1940 = vmatpush1.bf16.msra.mxu0 %v3032_v34 }
 0xe43   :  { %1941 = vmatprep.subr.bf16.mxu0 %v3132_v42 }
 0xe46   :  { %1942 = vmatpush1.bf16.msra.mxu0 %v3033_v6 }
 0xe47   :  { %1943 = vmatprep.subr.bf16.mxu0 %v3132_v42 }
 0xe55   :  { %v1737_v13 = vpop.xlane.xlu1 %1736 }
 0xe56   :  { %3114 = vrcp.f32 %v1737_v13 }
 0xe59   :  { %v1740_v18 = vpop.xlane.xlu0 %1739  ;;  %v1747_v19 = vpop.permute.xlu1 %1746 }
 0xe5a   :  { %3116 = vrcp.f32 %v1740_v18  ;;  %v1752_v20 = vsel %vm315_vm6, %v1747_v19, 0 }
 0xe5b   :  { %2863 = vmatpush3.bf16.msra.mxu1 %v1752_v20 }
 0xe5c   :  { %2670 = vmatprep.subr.bf16.mxu1 %v3036_v36 }
 0xe60   :  { %v3115_v21 = vpop.eup %3114 }
 0xe61   :  { %v1743_v4 = vmul.f32 %v3115_v21, %v3103_v41  ;;  %v3034_v41 = vld [vmem:[%s3981_s8 + $0x50] sm:$0xff]  }
 0xe62   :  { %1944 = vmatpush1.bf16.msra.mxu0 %v3034_v41  ;;  %v3040_v21 = vld [vmem:[%s3982_s10 + $0x50] sm:$0xff]   ;;  %v2543_v41 = vld [vmem:[%s3983_s9] ss:$0 sm:$0xff] }
 0xe63   :  { %1945 = vmatprep.subr.bf16.mxu0 %v3132_v42 }
 0xe64   :  { %v3117_v22 = vpop.eup %3116 }
 0xe65   :  { %v1744_v23 = vmul.f32 %v3117_v22, %v3105_v50 }
 0xe66   :  { %1946 = vmatpush1.bf16.msra.mxu0 %v3035_v52 }
 0xe67   :  { %v1745_v25 = vpack.c.bf16 %v1744_v23, %v1743_v4  ;;  %2882 = vmatprep.subr.bf16.mxu0 %v3129_v2 }
 0xe69   :  { %2865 = vmatmul.mubr.msk.bf16.vlgmr.msra.gmra.mrb[36].mxu1 %vm287_vm5, %v1745_v25  ;;  %v3043_v25 = vld [vmem:[%s3982_s10 + $0x18] sm:$0xff]  }
 0xe6a   :  { %2671 = vmatpush3.bf16.msra.mxu1 %v3037_v7 }
 0xe6b   :  { %2672 = vmatprep.subr.bf16.mxu1 %v3038_v1 }
 0xe6e   :  { %2673 = vmatpush3.bf16.msra.mxu1 %v3039_v38 }
 0xe6f   :  { %2674 = vmatprep.subr.bf16.mxu1 %v3040_v21 }
 0xefd   :  { %v1292_v44 = vpop.f32.mrb[24].mxu1 }
 0xefe   :  { %v1293_v24 = vadd.f32 %v3791_v39, %v1292_v44  ;;  %v2814_v46 = vpop.f32.mrb[25].mxu1 }
 0xeff   :  { %v1295_v8 = vpop.f32.mrb[26].mxu1 }
 0xf00   :  { %v1299_v9 = vmax.f32 %v1293_v24, 0.0  ;;  %v1296_v47 = vadd.f32 %v3791_v39, %v1295_v8  ;;  %v2815_v48 = vpop.f32.mrb[27].mxu1 }
 0xf02   :  { %1301 = vst.msk [vmem:[%s3988_s14] sm:$0xff] %vm629_vm7, %v1299_v9  ;;  %v1300_v49 = vmax.f32 %v1296_v47, 0.0 }
 0xf04   :  { %1302 = vst.msk [vmem:[%s3988_s14 + $0x8] sm:$0xff] %vm629_vm7, %v1300_v49 }
 0xf05   :  { %v1535_v50 = vpop.f32.mrb[28].mxu1 }
 0xf06   :  { %v2842_v53 = vpop.f32.mrb[29].mxu1 }
 0xf07   :  { %v1538_v54 = vpop.f32.mrb[30].mxu1 }
 0xf08   :  { %v2949_v45 = vpack.i.bf16 %v1538_v54, %v1535_v50  ;;  %v2843_v55 = vpop.f32.mrb[31].mxu1 }
 0xf0a   :  { %2950 = vrot.lane.b32.xlu0 %v2949_v45, %s3133_s26 }
 0xf0d   :  { %v1663_v56 = vpop.f32.mrb[32].mxu1 }
 0xf0e   :  { %v2854_v57 = vpop.f32.mrb[33].mxu1 }
 0xf0f   :  { %v1666_v58 = vpop.f32.mrb[34].mxu1 }
 0xf10   :  { %v2954_v59 = vpack.i.bf16 %v1666_v58, %v1663_v56  ;;  %v2855_v14 = vpop.f32.mrb[35].mxu1 }
 0xf11   :  { %v3052_v14 = vld [vmem:[%s3982_s10 + $0x80] sm:$0xff]  }
 0xf12   :  { %2955 = vrot.lane.b32.xlu1 %v2954_v59, %s3134_s29 }
 0xf3c   :  { %v1788_v42 = vpop.f32.mrb[36].mxu1 }
 0xf3d   :  { %v2866_v15 = vpop.f32.mrb[37].mxu1 }
 0xf3e   :  { %v1791_v60 = vpop.f32.mrb[38].mxu1  ;;  %v3053_v15 = vld [vmem:[%s3982_s10 + $0x88] sm:$0xff]  }
 0xf3f   :  { %v1840_v61 = vpack.c.bf16 %v1791_v60, %v1788_v42  ;;  %v2867_v63 = vpop.f32.mrb[39].mxu1 }
 0xf41   :  { %2556 = vmatprep.mubr.msk.bf16.mxu0 %vm629_vm7, %v1840_v61 }
 0xf7c   :  { %v2951_v3 = vpop.permute.xlu0 %2950 }
 0xf7d   :  { %v2953_v43 = vunpack.i.h.bf16 %v2951_v3  ;;  %v2952_v5 = vunpack.i.l.bf16 %v2951_v3 }
 0xf7f   :  { %v1812_v13 = vsel %vm629_vm7, %v3571_v37, %v2953_v43  ;;  %v1811_v18 = vsel %vm629_vm7, %v3566_v35, %v2952_v5  ;;  %v3041_v37 = vld [vmem:[%s3982_s10 + $0x10] sm:$0xff]   ;;  %v3042_v35 = vld [vmem:[%s3982_s10 + $0x58] sm:$0xff]  }
 0xf80   :  { %2675 = vmatpush3.bf16.msra.mxu1 %v3041_v37 }
 0xf81   :  { %2676 = vmatprep.subr.bf16.mxu1 %v3042_v35 }
 0xf84   :  { %v2956_v0 = vpop.permute.xlu1 %2955  ;;  %2677 = vmatpush3.bf16.msra.mxu1 %v3043_v25 }
 0xf85   :  { %v2958_v16 = vunpack.i.h.bf16 %v2956_v0  ;;  %v2957_v17 = vunpack.i.l.bf16 %v2956_v0  ;;  %2678 = vmatprep.subr.bf16.mxu1 %v3044_v26 }
 0xf87   :  { %v1813_v19 = vsel %vm111_vm1, %v1811_v18, %v2957_v17  ;;  %v1814_v20 = vsel %vm111_vm1, %v1812_v13, %v2958_v16 }
 0xf88   :  { %v2959_v22 = vpack.i.bf16 %v1788_v42, %v1813_v19  ;;  %v1839_v4 = vpack.c.bf16 %v1814_v20, %v1813_v19  ;;  %v2964_v23 = vpack.i.bf16 %v1791_v60, %v1814_v20  ;;  %2679 = vmatpush3.bf16.msra.mxu1 %v3045_v27 }
 0xf89   :  { %2680 = vmatprep.subr.bf16.mxu1 %v3046_v28 }
 0xf8a   :  { %2960 = vrot.lane.b32.xlu1 %v2959_v22, %s3133_s26  ;;  %2965 = vrot.lane.b32.xlu0 %v2964_v23, %s3133_s26 }
 0xf8b   :  { %1956 = vmatmul.mubr.bf16.vlgmr.msra.gmra.mrb[44].mxu0 %v1839_v4 }
 0xf8c   :  { %2884 = vmatprep.mubr.msk.bf16.mxu0 %vm3130_vm0, %v3129_v2  ;;  %2681 = vmatpush3.bf16.msra.mxu1 %v3047_v29 }
 0xf8d   :  { %2682 = vmatprep.subr.bf16.mxu1 %v3048_v30 }
 0xf90   :  { %2683 = vmatpush3.bf16.msra.mxu1 %v3049_v31 }
 0xf91   :  { %2684 = vmatprep.subr.bf16.mxu1 %v3050_v32 }
 0xf94   :  { %2685 = vmatpush3.bf16.msra.mxu1 %v3051_v33 }
 0xf95   :  { %2868 = vmatprep.subr.bf16.mxu1 %v3129_v2 }
 0xffc   :  { %v2961_v34 = vpop.permute.xlu1 %2960  ;;  %v2966_v44 = vpop.permute.xlu0 %2965 }
 0xffd   :  { %v2963_v24 = vunpack.i.h.bf16 %v2961_v34  ;;  %v2962_v46 = vunpack.i.l.bf16 %v2961_v34  ;;  %v2968_v6 = vunpack.i.h.bf16 %v2966_v44  ;;  %v2967_v8 = vunpack.i.l.bf16 %v2966_v44 }
 0xfff   :  { %v1978_v9 = vsel %vm629_vm7, %v2962_v46, %v2963_v24  ;;  %v1979_v47 = vsel %vm629_vm7, %v2967_v8, %v2968_v6 }
0x1000   :  { %v2023_v48 = vpack.c.bf16 %v1979_v47, %v1978_v9 }
0x1002   :  { %2164 = vmatprep.mubr.bf16.mxu1 %v2023_v48  ;;  %v3054_v48 = vld [vmem:[%s3986_s12] sm:$0xff]  }
0x105e   :  { %v1957_v49 = vpop.f32.mrb[44].mxu0 }
0x105f   :  { %v1958_v50 = vadd.f32 %v2543_v41, %v1957_v49  ;;  %v1959_v52 = vpop.f32.mrb[45].mxu0  ;;  %v3056_v49 = vld [vmem:[%s3986_s12 + $0x10] sm:$0xff]  }
0x1060   :  { %v1960_v53 = vpop.f32.mrb[46].mxu0  ;;  %v3058_v52 = vld [vmem:[%s3986_s12 + $0x20] sm:$0xff]  }
0x1061   :  { %v3882_v54 = vmax.f32 %v1958_v50, 0.0  ;;  %v1961_v45 = vadd.f32 %v2543_v41, %v1960_v53  ;;  %v1962_v55 = vpop.f32.mrb[47].mxu0  ;;  %v3055_v41 = vld [vmem:[%s3986_s12 + $0x8] sm:$0xff]   ;;  %v3057_v50 = vld [vmem:[%s3986_s12 + $0x18] sm:$0xff]  }
0x1062   :  { %v3059_v53 = vld [vmem:[%s3986_s12 + $0x28] sm:$0xff]   ;;  %v3061_v55 = vld [vmem:[%s3986_s12 + $0x38] sm:$0xff]  }
0x1063   :  { %v3884_v56 = vmax.f32 %v1961_v45, 0.0  ;;  %v1984_v57 = vsel %vm629_vm7, %v3882_v54, %v2962_v46  ;;  %v3060_v45 = vld [vmem:[%s3986_s12 + $0x30] sm:$0xff]  }
0x1065   :  { %v1985_v58 = vsel %vm629_vm7, %v3884_v56, %v2967_v8  ;;  %v2294_v59 = vpack.c.bf16 %v3884_v56, %v3882_v54 }
0x1066   :  { %v2022_v42 = vpack.c.bf16 %v1985_v58, %v1984_v57 }
0x1067   :  { %2883 = vmatpush3.bf16.msra.mxu0 %v2294_v59 }
0x1068   :  { %2165 = vmatmul.mubr.bf16.vlgmr.msra.gmra.mrb[40].mxu1 %v2022_v42 }
0x1069   :  { %2869 = vmatpush3.bf16.msra.mxu1 %v3052_v14  ;;  %2872 = vmatprep.mubr.msk.bf16.mxu1 %vm3130_vm0, %v3129_v2 }
0x106a   :  { %2870 = vmatprep.subr.bf16.mxu1 %v3129_v2 }
0x106d   :  { %2871 = vmatpush3.bf16.msra.mxu1 %v3053_v15 }
0x106e   :  { %2876 = vmatprep.subr.bf16.mxu1 %v3129_v2 }
0x1070   :  { %2873 = vmatmul.mubr.msk.bf16.vlgmr.msra.gmra.mrb[44].mxu1 %vm170_vm2, %v3510_v51 }
0x1071   :  { %2878 = vmatprep.mubr.msk.bf16.mxu1 %vm3130_vm0, %v3129_v2 }
0x113b   :  { %v2686_v60 = vpop.f32.mrb[40].mxu1 }
0x113c   :  { %v2687_v61 = vpop.f32.mrb[41].mxu1 }
0x113d   :  { %v2688_v63 = vadd.f32 %v2687_v61, %v2686_v60  ;;  %v2689_v3 = vpop.f32.mrb[42].mxu1 }
0x113e   :  { %v2690_v43 = vpop.f32.mrb[43].mxu1 }
0x113f   :  { %v2691_v5 = vadd.f32 %v2690_v43, %v2689_v3 }
0x1143   :  { %v2207_v36 = vpop.f32.mrb[44].mxu1 }
0x1144   :  { %v2208_v7 = vadd.f32 %v2688_v63, %v2207_v36  ;;  %v2874_v1 = vpop.f32.mrb[45].mxu1 }
0x1145   :  { %v2210_v0 = vpop.f32.mrb[46].mxu1 }
0x1146   :  { %v2214_v16 = vmax.f32 %v2208_v7, 0.0  ;;  %v2211_v17 = vadd.f32 %v2691_v5, %v2210_v0  ;;  %v2875_v38 = vpop.f32.mrb[47].mxu1 }
0x1148   :  { %v2215_v13 = vmax.f32 %v2211_v17, 0.0  ;;  %v2216_v18 = vmul.f32 %v3520_v62, %v2214_v16 }
0x114a   :  { %v2217_v51 = vmul.f32 %v3520_v62, %v2215_v13  ;;  %v2219_v19 = vpack.c.bf16 %v2215_v13, %v2214_v16 }
0x114c   :  { %v2218_v20 = vpack.c.bf16 %v2217_v51, %v2216_v18  ;;  %v2224_v21 = vsel %vm170_vm2, %v2219_v19, 0 }
0x114d   :  { %2877 = vmatpush3.bf16.xpose.msra.mxu1 %v2224_v21 }
0x114e   :  { %2888 = vmatprep.subr.bf16.mxu1 %v3129_v2 }
0x1154   :  { %2879 = vmatmul.mubr.msk.bf16.vlgmr.msra.gmra.mrb[48].mxu1 %vm170_vm2, %v2218_v20 }
0x1155   :  { %2904 = vmatprep.mubr.msk.bf16.mxu1 %vm3130_vm0, %v3129_v2  ;;  %2889 = vmatpush3.bf16.msra.mxu1 %v3054_v48 }
0x1156   :  { %2890 = vmatprep.subr.bf16.mxu1 %v3129_v2 }
0x1159   :  { %2891 = vmatpush3.bf16.msra.mxu1 %v3055_v41 }
0x115a   :  { %2892 = vmatprep.subr.bf16.mxu1 %v3129_v2 }
0x115d   :  { %2893 = vmatpush3.bf16.msra.mxu1 %v3056_v49 }
0x115e   :  { %2894 = vmatprep.subr.bf16.mxu1 %v3129_v2 }
0x1161   :  { %2895 = vmatpush3.bf16.msra.mxu1 %v3057_v50 }
0x1162   :  { %2896 = vmatprep.subr.bf16.mxu1 %v3129_v2 }
0x1165   :  { %2897 = vmatpush3.bf16.msra.mxu1 %v3058_v52 }
0x1166   :  { %2898 = vmatprep.subr.bf16.mxu1 %v3129_v2 }
0x1169   :  { %2899 = vmatpush3.bf16.msra.mxu1 %v3059_v53 }
0x116a   :  { %2900 = vmatprep.subr.bf16.mxu1 %v3129_v2 }
0x116d   :  { %2901 = vmatpush3.bf16.msra.mxu1 %v3060_v45 }
0x116e   :  { %2902 = vmatprep.subr.bf16.mxu1 %v3129_v2 }
0x1171   :  { %2903 = vmatpush3.bf16.msra.mxu1 %v3061_v55 }
0x1227   :  { %v2260_v22 = vpop.f32.mrb[48].mxu1 }
0x1228   :  { %v2267_v4 = vsel %vm3540_vm9, -1e+30, %v2260_v22  ;;  %v2880_v23 = vpop.f32.mrb[49].mxu1 }
0x1229   :  { %v2263_v37 = vpop.f32.mrb[50].mxu1  ;;  %v2269_v62 = vsel %vm58_vm10, -1e+30, %v2267_v4 }
0x122a   :  { %v2268_v35 = vsel %vm3540_vm9, -1e+30, %v2263_v37  ;;  %v2881_v25 = vpop.f32.mrb[51].mxu1  ;;  %v2271_v26 = vsel %vm1107_vm11, %v2269_v62, -inf }
0x122b   :  { %2272 = vmax.xlane.f32.xlu1 %v2271_v26  ;;  %v2270_v27 = vsel %vm59_vm12, -1e+30, %v2268_v35 }
0x122c   :  { %v2274_v28 = vsel %vm1107_vm11, %v2270_v27, -inf }
0x122d   :  { %2275 = vmax.xlane.f32.xlu0 %v2274_v28 }
0x12b8   :  { %v2273_v29 = vpop.xlane.xlu1 %2272 }
0x12b9   :  { %v2277_v30 = vsub.f32 %v2269_v62, %v2273_v29 }
0x12ba   :  { %v2276_v31 = vpop.xlane.xlu0 %2275 }
0x12bb   :  { %v2279_v32 = vmul.f32 1.442695, %v2277_v30  ;;  %v2278_v40 = vsub.f32 %v2270_v27, %v2276_v31 }
0x12bd   :  { %3118 = vpow2.f32 %v2279_v32  ;;  %v2281_v33 = vmul.f32 1.442695, %v2278_v40 }
0x12bf   :  { %3120 = vpow2.f32 %v2281_v33 }
0x12c7   :  { %v3119_v12 = vpop.eup %3118 }
0x12c8   :  { %v2283_v34 = vsel %vm1107_vm11, %v3119_v12, 0.0 }
0x12c9   :  { %v3121_v44 = vpop.eup %3120  ;;  %2284 = vadd.xlane.f32.xlu0 %v2283_v34 }
0x12ca   :  { %v2286_v24 = vsel %vm1107_vm11, %v3121_v44, 0.0 }
0x12cb   :  { %2287 = vadd.xlane.f32.xlu1 %v2286_v24 }
0x1356   :  { %v2285_v10 = vpop.xlane.xlu0 %2284 }
0x1357   :  { %3122 = vrcp.f32 %v2285_v10 }
0x1358   :  { %v2288_v11 = vpop.xlane.xlu1 %2287 }
0x1359   :  { %3124 = vrcp.f32 %v2288_v11 }
0x1361   :  { %v3123_v46 = vpop.eup %3122 }
0x1362   :  { %v2291_v8 = vmul.f32 %v3123_v46, %v3119_v12 }
0x1363   :  { %v3125_v6 = vpop.eup %3124 }
0x1364   :  { %v2292_v9 = vmul.f32 %v3125_v6, %v3121_v44 }
0x1366   :  { %v2293_v47 = vpack.c.bf16 %v2292_v9, %v2291_v8 }
0x1368   :  { %2885 = vmatmul.mubr.msk.bf16.vlgmr.msra.gmra.mrb[48].mxu0 %vm1107_vm11, %v2293_v47 }
0x143b   :  { %v2332_v57 = vpop.f32.mrb[48].mxu0 }
0x143c   :  { %v2886_v58 = vpop.f32.mrb[49].mxu0 }
0x143d   :  { %v2335_v59 = vpop.f32.mrb[50].mxu0 }
0x143e   :  { %v2969_v14 = vpack.i.bf16 %v2335_v59, %v2332_v57  ;;  %v2887_v42 = vpop.f32.mrb[51].mxu0 }
0x1440   :  { %2970 = vrot.lane.b32.xlu0 %v2969_v14, %s3133_s26 }
0x14b2   :  { %v2971_v15 = vpop.permute.xlu0 %2970 }
0x14b3   :  { %v2973_v60 = vunpack.i.h.bf16 %v2971_v15  ;;  %v2972_v61 = vunpack.i.l.bf16 %v2971_v15 }
0x14b5   :  { %v2348_v63 = vsel %vm629_vm7, %v3884_v56, %v2973_v60  ;;  %v2347_v2 = vsel %vm629_vm7, %v3882_v54, %v2972_v61 }
0x14b6   :  { %v2365_v3 = vpack.c.bf16 %v2348_v63, %v2347_v2 }
0x14b8   :  { %2905 = vmatmul.mubr.bf16.vlgmr.msra.gmra.mrb[52].mxu1 %v2365_v3 }
0x158b   :  { %v2455_v43 = vpop.f32.mrb[52].mxu1 }
0x158c   :  { %v2456_v5 = vadd.f32 %v3791_v39, %v2455_v43  ;;  %v2906_v36 = vpop.f32.mrb[53].mxu1 }
0x158d   :  { %v2458_v7 = vpop.f32.mrb[54].mxu1 }
0x158e   :  { %v2462_v1 = vmax.f32 %v2456_v5, 0.0  ;;  %v2459_v0 = vadd.f32 %v3791_v39, %v2458_v7  ;;  %v2907_v16 = vpop.f32.mrb[55].mxu1 }
0x1590   :  { %2464 = vst.msk [vmem:[%s3988_s14 + $0x10] sm:$0xff] %vm629_vm7, %v2462_v1  ;;  %v2463_v56 = vmax.f32 %v2459_v0, 0.0 }
0x1592   :  { %2465 = vst.msk [vmem:[%s3988_s14 + $0x18] sm:$0xff] %vm629_vm7, %v2463_v56 }

</bundles_post_ra>
